<compile_context>
chip_gen: v6e
topology: v6e:2x2x1
jax: 0.10.0
libtpu: 0.0.40
codegen_flags: <defaults>
</compile_context>

<pallas_src>
import functools

import jax
import jax.numpy as jnp
from jax.experimental import pallas as pl
from jax.experimental.pallas import tpu as pltpu

D_IN = 768
D_H = 512
D_OUT_HALF = 256  # each branch outputs 256; concat -> 512


def llm_embedding_kernel(x1_ref, x2_ref,
                         w1_ref, b1_ref,
                         wc1_ref, bc1_ref,
                         wc2_ref, bc2_ref,
                         out_ref):
    # bf16 operands on the MXU, f32 accumulation. Cast is a no-op if the
    # activations already arrive as bf16 (preferred: halves activation DMA).
    x1 = x1_ref[...]
    x2 = x2_ref[...]
    if x1.dtype != jnp.bfloat16:
        x1 = x1.astype(jnp.bfloat16)
    if x2.dtype != jnp.bfloat16:
        x2 = x2.astype(jnp.bfloat16)

    # Branch 1: linear1
    y1 = jnp.dot(x1, w1_ref[...],
                 preferred_element_type=jnp.float32) + b1_ref[...]

    # Branch 2: conv1(k=3, pad=1, len=1) == center-tap linear, then ReLU.
    # Bias-add / ReLU stay in f32 (v5e VPU has no bf16; cost hidden under DMA).
    h = jnp.dot(x2, wc1_ref[...],
                preferred_element_type=jnp.float32) + bc1_ref[...]
    h = jnp.maximum(h, 0.0).astype(jnp.bfloat16)

    # conv2(k=3, pad=1, len=1) == center-tap linear, then ReLU
    y2 = jnp.dot(h, wc2_ref[...],
                 preferred_element_type=jnp.float32) + bc2_ref[...]
    y2 = jnp.maximum(y2, 0.0)

    # torch.cat((y1, y2), dim=-1) as two lane-aligned direct stores
    # (256 = 2 full vregs per half -> unmasked vst, no temporary concat).
    out_ref[:, 0:D_OUT_HALF] = y1.astype(out_ref.dtype)
    out_ref[:, D_OUT_HALF:2 * D_OUT_HALF] = y2.astype(out_ref.dtype)


def prepare_params(params):
    """One-time weight prep (hoisted out of the per-call path).

    Takes PyTorch-shaped parameters and returns kernel-ready arrays:
    (in, out)-transposed center-tap weights in bf16, biases as (1, N) f32.
    """
    w1, b1, wc1_full, bc1, wc2_full, bc2 = params
    w1_t = jnp.transpose(w1).astype(jnp.bfloat16)                  # (768, 256)
    wc1_t = jnp.transpose(wc1_full[:, :, 1]).astype(jnp.bfloat16)  # (768, 512)
    wc2_t = jnp.transpose(wc2_full[:, :, 1]).astype(jnp.bfloat16)  # (512, 256)
    b1_2d = b1.reshape(1, -1).astype(jnp.float32)
    bc1_2d = bc1.reshape(1, -1).astype(jnp.float32)
    bc2_2d = bc2.reshape(1, -1).astype(jnp.float32)
    return tuple(jax.device_put(a)
                 for a in (w1_t, b1_2d, wc1_t, bc1_2d, wc2_t, bc2_2d))


def _round_up(x, m):
    return ((x + m - 1) // m) * m


def _pick_tile(B, tm):
    """Batch-tile selection (all values static at trace time)."""
    if B <= tm:
        if B <= 256:
            # Tiny batch: single tile. Splitting would duplicate the ~1.4 MB
            # weight DMA per core for < 1 MB of activations -- not worth it.
            return B
        # Mid-size batch: exactly two tiles so the ("parallel",) grid axis can
        # put one on each v7x TensorCore (activation bytes per tile now exceed
        # the duplicated weight fetch).
        return _round_up(pl.cdiv(B, 2), 8)
    if B >= 2048:
        # Large batch: bigger tile amortizes the ~0.35 us per-grid-step
        # overhead; ~19 MB peak VMEM at tm=1024 f32 fits the 32 MiB limit.
        return max(tm, 1024)
    return tm


@functools.partial(jax.jit,
                   static_argnames=("tm", "out_dtype", "single_buffer_weights"))
def _llm_embedding(x1, x2, prepped, *, tm, out_dtype, single_buffer_weights):
    B = x1.shape[0]
    w1_t, b1_2d, wc1_t, bc1_2d, wc2_t, bc2_2d = prepped

    tm_eff = _pick_tile(B, tm)
    grid = (pl.cdiv(B, tm_eff),)

    batch_tile = lambda i: (i, 0)
    resident = lambda i: (0, 0)

    def resident_spec(shape):
        # Weights/biases: constant index_map -> VMEM-resident across the grid.
        # Single-buffer them (never re-fetched) to free dead pipeline VMEM.
        if single_buffer_weights:
            return pl.BlockSpec(shape, resident, pipeline_mode=pl.Buffered(1))
        return pl.BlockSpec(shape, resident)

    # Advisory cost: weights counted once, activations at their real dtypes.
    in_bytes = (x1.size * x1.dtype.itemsize) + (x2.size * x2.dtype.itemsize)
    out_bytes = B * 2 * D_OUT_HALF * jnp.dtype(out_dtype).itemsize
    weight_bytes = (w1_t.size * w1_t.dtype.itemsize
                    + wc1_t.size * wc1_t.dtype.itemsize
                    + wc2_t.size * wc2_t.dtype.itemsize)
    bias_bytes = (b1_2d.size + bc1_2d.size + bc2_2d.size) * 4
    cost = pl.CostEstimate(
        flops=2 * B * (D_IN * D_OUT_HALF + D_IN * D_H + D_H * D_OUT_HALF),
        bytes_accessed=in_bytes + out_bytes + weight_bytes + bias_bytes,
        transcendentals=0,
    )

    return pl.pallas_call(
        llm_embedding_kernel,
        out_shape=jax.ShapeDtypeStruct((B, 2 * D_OUT_HALF), out_dtype),
        grid=grid,
        in_specs=[
            pl.BlockSpec((tm_eff, D_IN), batch_tile),     # x1
            pl.BlockSpec((tm_eff, D_IN), batch_tile),     # x2
            resident_spec((D_IN, D_OUT_HALF)),            # w1_t
            resident_spec((1, D_OUT_HALF)),               # b1
            resident_spec((D_IN, D_H)),                   # wc1_t
            resident_spec((1, D_H)),                      # bc1
            resident_spec((D_H, D_OUT_HALF)),             # wc2_t
            resident_spec((1, D_OUT_HALF)),               # bc2
        ],
        out_specs=pl.BlockSpec((tm_eff, 2 * D_OUT_HALF), batch_tile),
        compiler_params=pltpu.CompilerParams(
            dimension_semantics=("parallel",),
            vmem_limit_bytes=32 << 20,
        ),
        cost_estimate=cost,
    )(x1, x2, w1_t, b1_2d, wc1_t, bc1_2d, wc2_t, bc2_2d)


# Flipped to False (once) if this jax build rejects single-buffer pipeline_mode.
_SINGLE_BUFFER_WEIGHTS_OK = hasattr(pl, "Buffered")


def llm_embedding(x1, x2, prepped, *, tm=512, out_dtype=jnp.float32):
    """Public entry point. Gracefully degrades if pl.Buffered(1) is rejected."""
    global _SINGLE_BUFFER_WEIGHTS_OK
    if _SINGLE_BUFFER_WEIGHTS_OK:
        try:
            return _llm_embedding(x1, x2, prepped, tm=tm, out_dtype=out_dtype,
                                  single_buffer_weights=True)
        except Exception:
            _SINGLE_BUFFER_WEIGHTS_OK = False
    return _llm_embedding(x1, x2, prepped, tm=tm, out_dtype=out_dtype,
                          single_buffer_weights=False)


def init_params(key):
    ks = jax.random.split(key, 6)
    # Deterministic synthetic parameters (PyTorch shapes, not a checkpoint).
    w1 = jax.random.normal(ks[0], (256, 768), jnp.float32) * 0.02      # linear1.weight
    b1 = jax.random.normal(ks[1], (256,), jnp.float32) * 0.02          # linear1.bias
    wc1 = jax.random.normal(ks[2], (512, 768, 3), jnp.float32) * 0.02  # conv1.weight
    bc1 = jax.random.normal(ks[3], (512,), jnp.float32) * 0.02         # conv1.bias
    wc2 = jax.random.normal(ks[4], (256, 512, 3), jnp.float32) * 0.02  # conv2.weight
    bc2 = jax.random.normal(ks[5], (256,), jnp.float32) * 0.02         # conv2.bias
    return (w1, b1, wc1, bc1, wc2, bc2)


def reference(x1, x2, params):
    # Pure-JAX f32 reference of the PyTorch forward (conv on a length-1 seq
    # with padding=1: side taps only hit zero padding -> center tap only).
    w1, b1, wc1, bc1, wc2, bc2 = params
    y1 = x1 @ w1.T + b1
    h = jnp.maximum(x2 @ wc1[:, :, 1].T + bc1, 0.0)
    y2 = jnp.maximum(h @ wc2[:, :, 1].T + bc2, 0.0)
    return jnp.concatenate([y1, y2], axis=-1)


if __name__ == "__main__":
    key = jax.random.PRNGKey(0)
    kp, k1, k2, k3, k4 = jax.random.split(key, 5)

    params = init_params(kp)
    prepped = prepare_params(params)   # one-time weight prep, not per-call

    # Case 1: tiny batch (single tile path).
    B1 = 8
    x1a = jax.random.normal(k1, (B1, D_IN), jnp.float32)
    x2a = jax.random.normal(k2, (B1, D_IN), jnp.float32)
    out_a = jax.block_until_ready(llm_embedding(x1a, x2a, prepped))
    ref_a = reference(x1a, x2a, params)
    assert out_a.shape == (B1, 2 * D_OUT_HALF), out_a.shape
    # bf16 weights/activations on the MXU vs f32 reference -> loosened tol.
    assert jnp.allclose(out_a, ref_a, atol=5e-2, rtol=5e-2), "mismatch (B=8)"

    # Case 2: batch not a multiple of the tile -> multi-step grid with a
    # clipped trailing tile (exercises the partial-block writeback path).
    B2 = 20
    x1b = jax.random.normal(k3, (B2, D_IN), jnp.float32)
    x2b = jax.random.normal(k4, (B2, D_IN), jnp.float32)
    out_b = jax.block_until_ready(llm_embedding(x1b, x2b, prepped, tm=8))
    ref_b = reference(x1b, x2b, params)
    assert out_b.shape == (B2, 2 * D_OUT_HALF), out_b.shape
    assert jnp.allclose(out_b, ref_b, atol=5e-2, rtol=5e-2), "mismatch (B=20, tm=8)"

    print("KERNEL_OK")
</pallas_src>

<mosaic_0001>
module attributes {stable_mosaic.version = 11 : i64} {
  func.func @llm_embedding_kernel(%arg0: i32, %arg1: memref<8x768xf32, #tpu.memory_space<vmem>>, %arg2: memref<8x768xf32, #tpu.memory_space<vmem>>, %arg3: memref<768x256xbf16, #tpu.memory_space<vmem>>, %arg4: memref<1x256xf32, #tpu.memory_space<vmem>>, %arg5: memref<768x512xbf16, #tpu.memory_space<vmem>>, %arg6: memref<1x512xf32, #tpu.memory_space<vmem>>, %arg7: memref<512x256xbf16, #tpu.memory_space<vmem>>, %arg8: memref<1x256xf32, #tpu.memory_space<vmem>>, %arg9: memref<8x512xf32, #tpu.memory_space<vmem>>) attributes {dimension_semantics = [#tpu.dimension_semantics<parallel>], iteration_bounds = array<i64: 1>, scalar_prefetch = 0 : i64, scratch_operands = 0 : i64, tpu.core_type = #tpu.core_type<tc>, window_params = [{transform_indices = @transform_0, window_bounds = array<i64: 8, 768>}, {transform_indices = @transform_1, window_bounds = array<i64: 8, 768>}, {pipeline_mode = #tpu.pipeline_mode<synchronous>, transform_indices = @transform_2, window_bounds = array<i64: 768, 256>}, {pipeline_mode = #tpu.pipeline_mode<synchronous>, transform_indices = @transform_3, window_bounds = array<i64: 1, 256>}, {pipeline_mode = #tpu.pipeline_mode<synchronous>, transform_indices = @transform_4, window_bounds = array<i64: 768, 512>}, {pipeline_mode = #tpu.pipeline_mode<synchronous>, transform_indices = @transform_5, window_bounds = array<i64: 1, 512>}, {pipeline_mode = #tpu.pipeline_mode<synchronous>, transform_indices = @transform_6, window_bounds = array<i64: 512, 256>}, {pipeline_mode = #tpu.pipeline_mode<synchronous>, transform_indices = @transform_7, window_bounds = array<i64: 1, 256>}, {transform_indices = @transform_8, window_bounds = array<i64: 8, 512>}]} {
    %c0 = arith.constant 0 : index
    %c0_0 = arith.constant 0 : index
    %0 = vector.load %arg1[%c0, %c0_0] : memref<8x768xf32, #tpu.memory_space<vmem>>, vector<8x768xf32>
    %c0_1 = arith.constant 0 : index
    %c0_2 = arith.constant 0 : index
    %1 = vector.load %arg2[%c0_1, %c0_2] : memref<8x768xf32, #tpu.memory_space<vmem>>, vector<8x768xf32>
    %2 = arith.truncf %0 : vector<8x768xf32> to vector<8x768xbf16>
    %3 = arith.truncf %1 : vector<8x768xf32> to vector<8x768xbf16>
    %c0_3 = arith.constant 0 : index
    %c0_4 = arith.constant 0 : index
    %4 = vector.load %arg3[%c0_3, %c0_4] : memref<768x256xbf16, #tpu.memory_space<vmem>>, vector<768x256xbf16>
    %cst = arith.constant dense<0.000000e+00> : vector<8x256xf32>
    %5 = tpu.matmul %2, %4, %cst {dimension_numbers = #tpu.dot_dimension_numbers<[1], [0], [0], [1], [0, 0, 1, 1], [], []>} : vector<8x768xbf16>, vector<768x256xbf16>, vector<8x256xf32> -> vector<8x256xf32>
    %c0_5 = arith.constant 0 : index
    %c0_6 = arith.constant 0 : index
    %6 = vector.load %arg4[%c0_5, %c0_6] : memref<1x256xf32, #tpu.memory_space<vmem>>, vector<1x256xf32>
    %7 = vector.broadcast %6 : vector<1x256xf32> to vector<8x256xf32>
    %8 = arith.addf %5, %7 : vector<8x256xf32>
    %c0_7 = arith.constant 0 : index
    %c0_8 = arith.constant 0 : index
    %9 = vector.load %arg5[%c0_7, %c0_8] : memref<768x512xbf16, #tpu.memory_space<vmem>>, vector<768x512xbf16>
    %cst_9 = arith.constant dense<0.000000e+00> : vector<8x512xf32>
    %10 = tpu.matmul %3, %9, %cst_9 {dimension_numbers = #tpu.dot_dimension_numbers<[1], [0], [0], [1], [0, 0, 1, 1], [], []>} : vector<8x768xbf16>, vector<768x512xbf16>, vector<8x512xf32> -> vector<8x512xf32>
    %c0_10 = arith.constant 0 : index
    %c0_11 = arith.constant 0 : index
    %11 = vector.load %arg6[%c0_10, %c0_11] : memref<1x512xf32, #tpu.memory_space<vmem>>, vector<1x512xf32>
    %12 = vector.broadcast %11 : vector<1x512xf32> to vector<8x512xf32>
    %13 = arith.addf %10, %12 : vector<8x512xf32>
    %cst_12 = arith.constant 0.000000e+00 : f32
    %14 = vector.broadcast %cst_12 : f32 to vector<8x512xf32>
    %15 = arith.maximumf %13, %14 : vector<8x512xf32>
    %16 = arith.truncf %15 : vector<8x512xf32> to vector<8x512xbf16>
    %c0_13 = arith.constant 0 : index
    %c0_14 = arith.constant 0 : index
    %17 = vector.load %arg7[%c0_13, %c0_14] : memref<512x256xbf16, #tpu.memory_space<vmem>>, vector<512x256xbf16>
    %cst_15 = arith.constant dense<0.000000e+00> : vector<8x256xf32>
    %18 = tpu.matmul %16, %17, %cst_15 {dimension_numbers = #tpu.dot_dimension_numbers<[1], [0], [0], [1], [0, 0, 1, 1], [], []>} : vector<8x512xbf16>, vector<512x256xbf16>, vector<8x256xf32> -> vector<8x256xf32>
    %c0_16 = arith.constant 0 : index
    %c0_17 = arith.constant 0 : index
    %19 = vector.load %arg8[%c0_16, %c0_17] : memref<1x256xf32, #tpu.memory_space<vmem>>, vector<1x256xf32>
    %20 = vector.broadcast %19 : vector<1x256xf32> to vector<8x256xf32>
    %21 = arith.addf %18, %20 : vector<8x256xf32>
    %cst_18 = arith.constant 0.000000e+00 : f32
    %22 = vector.broadcast %cst_18 : f32 to vector<8x256xf32>
    %23 = arith.maximumf %21, %22 : vector<8x256xf32>
    %c0_19 = arith.constant 0 : index
    %c0_20 = arith.constant 0 : index
    %24 = vector.load %arg9[%c0_19, %c0_20] : memref<8x512xf32, #tpu.memory_space<vmem>>, vector<8x256xf32>
    tpu.vector_store %arg9[%c0_19, %c0_20], %8 {strides = array<i32>} : memref<8x512xf32, #tpu.memory_space<vmem>>, vector<8x256xf32>,
    %c0_21 = arith.constant 0 : index
    %c256 = arith.constant 256 : index
    %25 = vector.load %arg9[%c0_21, %c256] : memref<8x512xf32, #tpu.memory_space<vmem>>, vector<8x256xf32>
    tpu.vector_store %arg9[%c0_21, %c256], %23 {strides = array<i32>} : memref<8x512xf32, #tpu.memory_space<vmem>>, vector<8x256xf32>,
    return
  }
  func.func @transform_0(%arg0: i32) -> (i32, i32) {
    %c0_i32 = arith.constant 0 : i32
    %c0_i32_0 = arith.constant 0 : i32
    return %arg0, %c0_i32 : i32, i32
  }
  func.func @transform_1(%arg0: i32) -> (i32, i32) {
    %c0_i32 = arith.constant 0 : i32
    %c0_i32_0 = arith.constant 0 : i32
    return %arg0, %c0_i32 : i32, i32
  }
  func.func @transform_2(%arg0: i32) -> (i32, i32) {
    %c0_i32 = arith.constant 0 : i32
    %c0_i32_0 = arith.constant 0 : i32
    %c0_i32_1 = arith.constant 0 : i32
    return %c0_i32, %c0_i32_0 : i32, i32
  }
  func.func @transform_3(%arg0: i32) -> (i32, i32) {
    %c0_i32 = arith.constant 0 : i32
    %c0_i32_0 = arith.constant 0 : i32
    %c0_i32_1 = arith.constant 0 : i32
    return %c0_i32, %c0_i32_0 : i32, i32
  }
  func.func @transform_4(%arg0: i32) -> (i32, i32) {
    %c0_i32 = arith.constant 0 : i32
    %c0_i32_0 = arith.constant 0 : i32
    %c0_i32_1 = arith.constant 0 : i32
    return %c0_i32, %c0_i32_0 : i32, i32
  }
  func.func @transform_5(%arg0: i32) -> (i32, i32) {
    %c0_i32 = arith.constant 0 : i32
    %c0_i32_0 = arith.constant 0 : i32
    %c0_i32_1 = arith.constant 0 : i32
    return %c0_i32, %c0_i32_0 : i32, i32
  }
  func.func @transform_6(%arg0: i32) -> (i32, i32) {
    %c0_i32 = arith.constant 0 : i32
    %c0_i32_0 = arith.constant 0 : i32
    %c0_i32_1 = arith.constant 0 : i32
    return %c0_i32, %c0_i32_0 : i32, i32
  }
  func.func @transform_7(%arg0: i32) -> (i32, i32) {
    %c0_i32 = arith.constant 0 : i32
    %c0_i32_0 = arith.constant 0 : i32
    %c0_i32_1 = arith.constant 0 : i32
    return %c0_i32, %c0_i32_0 : i32, i32
  }
  func.func @transform_8(%arg0: i32) -> (i32, i32) {
    %c0_i32 = arith.constant 0 : i32
    %c0_i32_0 = arith.constant 0 : i32
    return %arg0, %c0_i32 : i32, i32
  }
}

module attributes {stable_mosaic.version = 11 : i64} {
  func.func @llm_embedding_kernel(%arg0: i32, %arg1: memref<8x768xf32, #tpu.memory_space<vmem>>, %arg2: memref<8x768xf32, #tpu.memory_space<vmem>>, %arg3: memref<768x256xbf16, #tpu.memory_space<vmem>>, %arg4: memref<1x256xf32, #tpu.memory_space<vmem>>, %arg5: memref<768x512xbf16, #tpu.memory_space<vmem>>, %arg6: memref<1x512xf32, #tpu.memory_space<vmem>>, %arg7: memref<512x256xbf16, #tpu.memory_space<vmem>>, %arg8: memref<1x256xf32, #tpu.memory_space<vmem>>, %arg9: memref<8x512xf32, #tpu.memory_space<vmem>>) attributes {dimension_semantics = [#tpu.dimension_semantics<parallel>], iteration_bounds = array<i64: 1>, scalar_prefetch = 0 : i64, scratch_operands = 0 : i64, tpu.core_type = #tpu.core_type<tc>, window_params = [{transform_indices = @transform_0, window_bounds = array<i64: 8, 768>}, {transform_indices = @transform_1, window_bounds = array<i64: 8, 768>}, {pipeline_mode = #tpu.pipeline_mode<synchronous>, transform_indices = @transform_2, window_bounds = array<i64: 768, 256>}, {pipeline_mode = #tpu.pipeline_mode<synchronous>, transform_indices = @transform_3, window_bounds = array<i64: 1, 256>}, {pipeline_mode = #tpu.pipeline_mode<synchronous>, transform_indices = @transform_4, window_bounds = array<i64: 768, 512>}, {pipeline_mode = #tpu.pipeline_mode<synchronous>, transform_indices = @transform_5, window_bounds = array<i64: 1, 512>}, {pipeline_mode = #tpu.pipeline_mode<synchronous>, transform_indices = @transform_6, window_bounds = array<i64: 512, 256>}, {pipeline_mode = #tpu.pipeline_mode<synchronous>, transform_indices = @transform_7, window_bounds = array<i64: 1, 256>}, {transform_indices = @transform_8, window_bounds = array<i64: 8, 512>}]} {
    %c0 = arith.constant 0 : index
    %c0_0 = arith.constant 0 : index
    %0 = vector.load %arg1[%c0, %c0_0] : memref<8x768xf32, #tpu.memory_space<vmem>>, vector<8x768xf32>
    %c0_1 = arith.constant 0 : index
    %c0_2 = arith.constant 0 : index
    %1 = vector.load %arg2[%c0_1, %c0_2] : memref<8x768xf32, #tpu.memory_space<vmem>>, vector<8x768xf32>
    %2 = arith.truncf %0 : vector<8x768xf32> to vector<8x768xbf16>
    %3 = arith.truncf %1 : vector<8x768xf32> to vector<8x768xbf16>
    %c0_3 = arith.constant 0 : index
    %c0_4 = arith.constant 0 : index
    %4 = vector.load %arg3[%c0_3, %c0_4] : memref<768x256xbf16, #tpu.memory_space<vmem>>, vector<768x256xbf16>
    %cst = arith.constant dense<0.000000e+00> : vector<8x256xf32>
    %5 = tpu.matmul %2, %4, %cst {dimension_numbers = #tpu.dot_dimension_numbers<[1], [0], [0], [1], [0, 0, 1, 1], [], []>} : vector<8x768xbf16>, vector<768x256xbf16>, vector<8x256xf32> -> vector<8x256xf32>
    %c0_5 = arith.constant 0 : index
    %c0_6 = arith.constant 0 : index
    %6 = vector.load %arg4[%c0_5, %c0_6] : memref<1x256xf32, #tpu.memory_space<vmem>>, vector<1x256xf32>
    %7 = vector.broadcast %6 : vector<1x256xf32> to vector<8x256xf32>
    %8 = arith.addf %5, %7 : vector<8x256xf32>
    %c0_7 = arith.constant 0 : index
    %c0_8 = arith.constant 0 : index
    %9 = vector.load %arg5[%c0_7, %c0_8] : memref<768x512xbf16, #tpu.memory_space<vmem>>, vector<768x512xbf16>
    %cst_9 = arith.constant dense<0.000000e+00> : vector<8x512xf32>
    %10 = tpu.matmul %3, %9, %cst_9 {dimension_numbers = #tpu.dot_dimension_numbers<[1], [0], [0], [1], [0, 0, 1, 1], [], []>} : vector<8x768xbf16>, vector<768x512xbf16>, vector<8x512xf32> -> vector<8x512xf32>
    %c0_10 = arith.constant 0 : index
    %c0_11 = arith.constant 0 : index
    %11 = vector.load %arg6[%c0_10, %c0_11] : memref<1x512xf32, #tpu.memory_space<vmem>>, vector<1x512xf32>
    %12 = vector.broadcast %11 : vector<1x512xf32> to vector<8x512xf32>
    %13 = arith.addf %10, %12 : vector<8x512xf32>
    %cst_12 = arith.constant 0.000000e+00 : f32
    %14 = vector.broadcast %cst_12 : f32 to vector<8x512xf32>
    %15 = arith.maximumf %13, %14 : vector<8x512xf32>
    %16 = arith.truncf %15 : vector<8x512xf32> to vector<8x512xbf16>
    %c0_13 = arith.constant 0 : index
    %c0_14 = arith.constant 0 : index
    %17 = vector.load %arg7[%c0_13, %c0_14] : memref<512x256xbf16, #tpu.memory_space<vmem>>, vector<512x256xbf16>
    %cst_15 = arith.constant dense<0.000000e+00> : vector<8x256xf32>
    %18 = tpu.matmul %16, %17, %cst_15 {dimension_numbers = #tpu.dot_dimension_numbers<[1], [0], [0], [1], [0, 0, 1, 1], [], []>} : vector<8x512xbf16>, vector<512x256xbf16>, vector<8x256xf32> -> vector<8x256xf32>
    %c0_16 = arith.constant 0 : index
    %c0_17 = arith.constant 0 : index
    %19 = vector.load %arg8[%c0_16, %c0_17] : memref<1x256xf32, #tpu.memory_space<vmem>>, vector<1x256xf32>
    %20 = vector.broadcast %19 : vector<1x256xf32> to vector<8x256xf32>
    %21 = arith.addf %18, %20 : vector<8x256xf32>
    %cst_18 = arith.constant 0.000000e+00 : f32
    %22 = vector.broadcast %cst_18 : f32 to vector<8x256xf32>
    %23 = arith.maximumf %21, %22 : vector<8x256xf32>
    %c0_19 = arith.constant 0 : index
    %c0_20 = arith.constant 0 : index
    %24 = vector.load %arg9[%c0_19, %c0_20] : memref<8x512xf32, #tpu.memory_space<vmem>>, vector<8x256xf32>
    tpu.vector_store %arg9[%c0_19, %c0_20], %8 {strides = array<i32>} : memref<8x512xf32, #tpu.memory_space<vmem>>, vector<8x256xf32>,
    %c0_21 = arith.constant 0 : index
    %c256 = arith.constant 256 : index
    %25 = vector.load %arg9[%c0_21, %c256] : memref<8x512xf32, #tpu.memory_space<vmem>>, vector<8x256xf32>
    tpu.vector_store %arg9[%c0_21, %c256], %23 {strides = array<i32>} : memref<8x512xf32, #tpu.memory_space<vmem>>, vector<8x256xf32>,
    return
  }
  func.func @transform_0(%arg0: i32) -> (i32, i32) {
    %c0_i32 = arith.constant 0 : i32
    %c0_i32_0 = arith.constant 0 : i32
    return %arg0, %c0_i32 : i32, i32
  }
  func.func @transform_1(%arg0: i32) -> (i32, i32) {
    %c0_i32 = arith.constant 0 : i32
    %c0_i32_0 = arith.constant 0 : i32
    return %arg0, %c0_i32 : i32, i32
  }
  func.func @transform_2(%arg0: i32) -> (i32, i32) {
    %c0_i32 = arith.constant 0 : i32
    %c0_i32_0 = arith.constant 0 : i32
    %c0_i32_1 = arith.constant 0 : i32
    return %c0_i32, %c0_i32_0 : i32, i32
  }
  func.func @transform_3(%arg0: i32) -> (i32, i32) {
    %c0_i32 = arith.constant 0 : i32
    %c0_i32_0 = arith.constant 0 : i32
    %c0_i32_1 = arith.constant 0 : i32
    return %c0_i32, %c0_i32_0 : i32, i32
  }
  func.func @transform_4(%arg0: i32) -> (i32, i32) {
    %c0_i32 = arith.constant 0 : i32
    %c0_i32_0 = arith.constant 0 : i32
    %c0_i32_1 = arith.constant 0 : i32
    return %c0_i32, %c0_i32_0 : i32, i32
  }
  func.func @transform_5(%arg0: i32) -> (i32, i32) {
    %c0_i32 = arith.constant 0 : i32
    %c0_i32_0 = arith.constant 0 : i32
    %c0_i32_1 = arith.constant 0 : i32
    return %c0_i32, %c0_i32_0 : i32, i32
  }
  func.func @transform_6(%arg0: i32) -> (i32, i32) {
    %c0_i32 = arith.constant 0 : i32
    %c0_i32_0 = arith.constant 0 : i32
    %c0_i32_1 = arith.constant 0 : i32
    return %c0_i32, %c0_i32_0 : i32, i32
  }
  func.func @transform_7(%arg0: i32) -> (i32, i32) {
    %c0_i32 = arith.constant 0 : i32
    %c0_i32_0 = arith.constant 0 : i32
    %c0_i32_1 = arith.constant 0 : i32
    return %c0_i32, %c0_i32_0 : i32, i32
  }
  func.func @transform_8(%arg0: i32) -> (i32, i32) {
    %c0_i32 = arith.constant 0 : i32
    %c0_i32_0 = arith.constant 0 : i32
    return %arg0, %c0_i32 : i32, i32
  }
}

</mosaic_0001>

<bundles_post_ra>
// kernel: _llm_embedding.1
= control target key start
LH: loop header
LB: loop body
LE: loop exit
PB: predicated region body
PF: predicated region fallthrough
CT: control target
= control target key end

     0   :  { %13 = vsyncpa [#allocation3], 0  ;;  %s3916_s0 = inlined_call_operand.hbm [shape: f32[8,768], index: 0, kind: input, shape index: {}]   ;;  %s3917_s1 = inlined_call_operand.hbm [shape: f32[8,768], index: 1, kind: input, shape index: {}]   ;;  %s3918_s2 = inlined_call_operand.hbm [shape: bf16[768,256], index: 2, kind: input, shape index: {}]   ;;  %s3919_s3 = inlined_call_operand.vmem [shape: f32[1,256], index: 3, kind: input, shape index: {}]   ;;  %s3920_s4 = inlined_call_operand.hbm [shape: bf16[768,512], index: 4, kind: input, shape index: {}]   ;;  %s3921_s5 = inlined_call_operand.vmem [shape: f32[1,512], index: 5, kind: input, shape index: {}]   ;;  %s3922_s6 = inlined_call_operand.hbm [shape: bf16[512,256], index: 6, kind: input, shape index: {}]   ;;  %s3923_s7 = inlined_call_operand.vmem [shape: f32[1,256], index: 7, kind: input, shape index: {}]   ;;  %s3924_s8 = inlined_call_operand.hbm [shape: f32[8,512], index: 8, kind: output, shape index: {}]  }
   0x1   :  { %14 = vsyncpa [#allocation6], 0 }
   0x2   :  { %15 = vsyncpa [#allocation9], 0 }
   0x3   :  { %16 = vsyncpa [#allocation4], 0  ;;  %s3776_s27 = smov [#allocation5]   ;;  %s3777_s29 = smov [#allocation8]  }
   0x4   :  { %s33_s28 = sshll.u32 %s3776_s27, 4  ;;  %s56_s30 = sshll.u32 %s3777_s29, 4  ;;  %s34_s28 = int_to_ptr.vmem [resolvable:$true] %s33_s28  ;;  %s57_s30 = int_to_ptr.vmem [resolvable:$true] %s56_s30 }
   0x5   :  { %s3656_s9 = scalar_lea.vmem %s34_s28, 768  ;;  %p3661_p1 = scmp.lt.s32.totalorder %s34_s28, %s34_s28 }
   0x6   :  { %p3657_p0 = scmp.ne.s32.totalorder %s34_s28, %s3656_s9  ;;  %p3662_p2 = scmp.lt.s32.totalorder %s3656_s9, %s3656_s9 }
   0x8   :  { %p3663_p3 = por %p3662_p2, %p3661_p1 }
   0xa   :  { %p3664_p4 = pnand %p3663_p3, %p3657_p0 }
   0xc   :  { %3667 = shalt.err (!%p3664_p4)
}
   0xd   :  { %36 = dma.hbm_to_vmem [thread:$0]  %s3917_s1, 768, %s34_s28, [#allocation6]  }
   0xe   :  { %s3676_s12 = scalar_lea.vmem %s57_s30, 24576  ;;  %p3681_p6 = scmp.lt.s32.totalorder %s57_s30, %s57_s30 }
   0xf   :  { %p3677_p5 = scmp.ne.s32.totalorder %s57_s30, %s3676_s12  ;;  %p3682_p7 = scmp.lt.s32.totalorder %s3676_s12, %s3676_s12 }
  0x11   :  { %p3683_p8 = por %p3682_p7, %p3681_p6 }
  0x13   :  { %p3684_p9 = pnand %p3683_p8, %p3677_p5 }
  0x15   :  { %3687 = shalt.err (!%p3684_p9)
}
  0x16   :  { %s3778_s13 = smov 256   ;;  %s3779_s14 = smov 16  }
  0x17   :  { %62 = dma.hbm_to_vmem [thread:$0]  %s3920_s4, 24576, %s57_s30, [#allocation9], %s3778_s13, %s3778_s13, %s3779_s14  }
  0x18   :  { %s3780_s17 = smov [#allocation2]   ;;  %s3781_s19 = smov [#allocation7]  }
  0x19   :  { %s23_s18 = sshll.u32 %s3780_s17, 4  ;;  %s42_s20 = sshll.u32 %s3781_s19, 4  ;;  %s24_s18 = int_to_ptr.vmem [resolvable:$true] %s23_s18  ;;  %s43_s20 = int_to_ptr.vmem [resolvable:$true] %s42_s20 }
  0x1a   :  { %s3696_s1 = scalar_lea.vmem %s24_s18, 768  ;;  %p3701_p11 = scmp.lt.s32.totalorder %s24_s18, %s24_s18 }
  0x1b   :  { %p3697_p10 = scmp.ne.s32.totalorder %s24_s18, %s3696_s1  ;;  %p3702_p12 = scmp.lt.s32.totalorder %s3696_s1, %s3696_s1 }
  0x1d   :  { %p3703_p13 = por %p3702_p12, %p3701_p11 }
  0x1f   :  { %p3704_p0 = pnand %p3703_p13, %p3697_p10 }
  0x21   :  { %3707 = shalt.err (!%p3704_p0)
}
  0x22   :  { %26 = dma.hbm_to_vmem [thread:$0]  %s3916_s0, 768, %s24_s18, [#allocation3]  }
  0x23   :  { %s3716_s23 = scalar_lea.vmem %s43_s20, 12288  ;;  %p3721_p2 = scmp.lt.s32.totalorder %s43_s20, %s43_s20 }
  0x24   :  { %p3717_p1 = scmp.ne.s32.totalorder %s43_s20, %s3716_s23  ;;  %p3722_p3 = scmp.lt.s32.totalorder %s3716_s23, %s3716_s23 }
  0x26   :  { %p3723_p4 = por %p3722_p3, %p3721_p2 }
  0x28   :  { %p3724_p5 = pnand %p3723_p4, %p3717_p1 }
  0x2a   :  { %3727 = shalt.err (!%p3724_p5)
}
  0x2b   :  { %s3782_s4 = smov 128   ;;  %s3783_s24 = smov 8  }
  0x2c   :  { %48 = dma.hbm_to_vmem [thread:$0]  %s3918_s2, 12288, %s43_s20, [#allocation6], %s3782_s4, %s3782_s4, %s3783_s24  }
  0x2d   :  { %s3784_s27 = smov [#allocation10]  }
  0x2e   :  { %s70_s28 = sshll.u32 %s3784_s27, 4  ;;  %s71_s28 = int_to_ptr.vmem [resolvable:$true] %s70_s28 }
  0x2f   :  { %s3736_s29 = scalar_lea.vmem %s71_s28, 8192  ;;  %p3741_p7 = scmp.lt.s32.totalorder %s71_s28, %s71_s28 }
  0x30   :  { %p3737_p6 = scmp.ne.s32.totalorder %s71_s28, %s3736_s29  ;;  %p3742_p8 = scmp.lt.s32.totalorder %s3736_s29, %s3736_s29 }
  0x32   :  { %p3743_p9 = por %p3742_p8, %p3741_p7 }
  0x34   :  { %p3744_p10 = pnand %p3743_p9, %p3737_p6 }
  0x36   :  { %3747 = shalt.err (!%p3744_p10)
}
  0x37   :  { %76 = dma.hbm_to_vmem [thread:$0]  %s3922_s6, 8192, %s71_s28, [#allocation9], %s3782_s4, %s3782_s4, %s3783_s24  }
  0x38   :  { %3768 = dma.done.wait [#allocation3], 768  }
  0x39   :  { %3769 = vsyncadd [#allocation3], 4294966528 }
  0x3a   :  { %3770 = dma.done.wait [#allocation6], 13056  }
  0x3b   :  { %3771 = vsyncadd [#allocation6], 4294954240 }
  0x3c   :  { %3772 = dma.done.wait [#allocation9], 32768  }
  0x3d   :  { %3773 = vsyncadd [#allocation9], 4294934528  ;;  %v3120_v0 = vld [vmem:[#allocation7 + $0x74] ss:$8 sps:$4 sm:$0xff]   ;;  %v3122_v1 = vld [vmem:[#allocation7 + $0x70] ss:$8 sps:$4 sm:$0xff]  }
  0x3e   :  { %706 = vmatprep.subr.bf16.mxu0 %v3120_v0  ;;  %v3123_v2 = vld [vmem:[#allocation7 + $0x174] ss:$8 sps:$4 sm:$0xff]   ;;  %v3125_v3 = vld [vmem:[#allocation7 + $0x170] ss:$8 sps:$4 sm:$0xff]   ;;  %v3126_v4 = vld [vmem:[#allocation7 + $0x64] ss:$8 sps:$4 sm:$0xff]  }
  0x3f   :  { %707 = vmatpush1.bf16.msra.mxu0 %v3122_v1  ;;  %v3128_v5 = vld [vmem:[#allocation7 + $0x60] ss:$8 sps:$4 sm:$0xff]   ;;  %747 = vmatprep.subr.bf16.mxu1 %v3123_v2  ;;  %v3129_v6 = vld [vmem:[#allocation7 + $0x164] ss:$8 sps:$4 sm:$0xff]   ;;  %v3132_v8 = vld [vmem:[#allocation7 + $0x54] ss:$8 sps:$4 sm:$0xff]  }
  0x40   :  { %748 = vmatpush1.bf16.msra.mxu1 %v3125_v3  ;;  %708 = vmatprep.subr.bf16.mxu0 %v3126_v4  ;;  %v3131_v7 = vld [vmem:[#allocation7 + $0x160] ss:$8 sps:$4 sm:$0xff]   ;;  %v3134_v9 = vld [vmem:[#allocation7 + $0x50] ss:$8 sps:$4 sm:$0xff]   ;;  %v3135_v10 = vld [vmem:[#allocation7 + $0x154] ss:$8 sps:$4 sm:$0xff]  }
  0x41   :  { %749 = vmatprep.subr.bf16.mxu1 %v3129_v6  ;;  %v3138_v11 = vld [vmem:[#allocation7 + $0x44] ss:$8 sps:$4 sm:$0xff]   ;;  %v3137_v12 = vld [vmem:[#allocation7 + $0x150] ss:$8 sps:$4 sm:$0xff]   ;;  %v3140_v14 = vld [vmem:[#allocation7 + $0x40] ss:$8 sps:$4 sm:$0xff]  }
  0x42   :  { %v3141_v13 = vld [vmem:[#allocation7 + $0x144] ss:$8 sps:$4 sm:$0xff]   ;;  %v3144_v15 = vld [vmem:[#allocation7 + $0x34] ss:$8 sps:$4 sm:$0xff]   ;;  %v3143_v16 = vld [vmem:[#allocation7 + $0x140] ss:$8 sps:$4 sm:$0xff]  }
  0x43   :  { %709 = vmatpush1.bf16.msra.mxu0 %v3128_v5  ;;  %v3147_v17 = vld [vmem:[#allocation7 + $0x134] ss:$8 sps:$4 sm:$0xff]   ;;  %v3146_v18 = vld [vmem:[#allocation7 + $0x30] ss:$8 sps:$4 sm:$0xff]   ;;  %v3150_v19 = vld [vmem:[#allocation7 + $0x24] ss:$8 sps:$4 sm:$0xff]  }
  0x44   :  { %710 = vmatprep.subr.bf16.mxu0 %v3132_v8  ;;  %750 = vmatpush1.bf16.msra.mxu1 %v3131_v7  ;;  %v3149_v20 = vld [vmem:[#allocation7 + $0x130] ss:$8 sps:$4 sm:$0xff]   ;;  %v3153_v21 = vld [vmem:[#allocation7 + $0x124] ss:$8 sps:$4 sm:$0xff]   ;;  %v3152_v22 = vld [vmem:[#allocation7 + $0x20] ss:$8 sps:$4 sm:$0xff]  }
  0x45   :  { %751 = vmatprep.subr.bf16.mxu1 %v3135_v10  ;;  %v3156_v23 = vld [vmem:[#allocation7 + $0x14] ss:$8 sps:$4 sm:$0xff]   ;;  %v3155_v24 = vld [vmem:[#allocation7 + $0x120] ss:$8 sps:$4 sm:$0xff]   ;;  %v3158_v26 = vld [vmem:[#allocation7 + $0x10] ss:$8 sps:$4 sm:$0xff]  }
  0x46   :  { %v3159_v25 = vld [vmem:[#allocation7 + $0x114] ss:$8 sps:$4 sm:$0xff]   ;;  %v3162_v27 = vld [vmem:[#allocation7 + $0x4] ss:$8 sps:$4 sm:$0xff]   ;;  %v3161_v28 = vld [vmem:[#allocation7 + $0x110] ss:$8 sps:$4 sm:$0xff]  }
  0x47   :  { %711 = vmatpush1.bf16.msra.mxu0 %v3134_v9  ;;  %v3165_v29 = vld [vmem:[#allocation7 + $0x104] ss:$8 sps:$4 sm:$0xff]   ;;  %v3164_v30 = vld [vmem:[#allocation7] ss:$8 sps:$4 sm:$0xff]   ;;  %v3168_v31 = vld [vmem:[#allocation7 + $0xf4] ss:$8 sps:$4 sm:$0xff]  }
  0x48   :  { %712 = vmatprep.subr.bf16.mxu0 %v3138_v11  ;;  %752 = vmatpush1.bf16.msra.mxu1 %v3137_v12  ;;  %v3167_v32 = vld [vmem:[#allocation7 + $0x100] ss:$8 sps:$4 sm:$0xff]   ;;  %v3171_v33 = vld [vmem:[#allocation7 + $0x1f4] ss:$8 sps:$4 sm:$0xff]   ;;  %v3170_v34 = vld [vmem:[#allocation7 + $0xf0] ss:$8 sps:$4 sm:$0xff]  }
  0x49   :  { %753 = vmatprep.subr.bf16.mxu1 %v3141_v13  ;;  %v3174_v35 = vld [vmem:[#allocation7 + $0xe4] ss:$8 sps:$4 sm:$0xff]   ;;  %v3173_v36 = vld [vmem:[#allocation7 + $0x1f0] ss:$8 sps:$4 sm:$0xff]   ;;  %v3176_v38 = vld [vmem:[#allocation7 + $0xe0] ss:$8 sps:$4 sm:$0xff]  }
  0x4a   :  { %v3177_v37 = vld [vmem:[#allocation7 + $0x1e4] ss:$8 sps:$4 sm:$0xff]   ;;  %v3180_v39 = vld [vmem:[#allocation7 + $0xd4] ss:$8 sps:$4 sm:$0xff]   ;;  %v3179_v40 = vld [vmem:[#allocation7 + $0x1e0] ss:$8 sps:$4 sm:$0xff]  }
  0x4b   :  { %713 = vmatpush1.bf16.msra.mxu0 %v3140_v14  ;;  %v3183_v41 = vld [vmem:[#allocation7 + $0x1d4] ss:$8 sps:$4 sm:$0xff]   ;;  %v3182_v42 = vld [vmem:[#allocation7 + $0xd0] ss:$8 sps:$4 sm:$0xff]   ;;  %v3186_v43 = vld [vmem:[#allocation7 + $0xc4] ss:$8 sps:$4 sm:$0xff]  }
  0x4c   :  { %714 = vmatprep.subr.bf16.mxu0 %v3144_v15  ;;  %754 = vmatpush1.bf16.msra.mxu1 %v3143_v16  ;;  %v3185_v44 = vld [vmem:[#allocation7 + $0x1d0] ss:$8 sps:$4 sm:$0xff]   ;;  %v3189_v45 = vld [vmem:[#allocation7 + $0x1c4] ss:$8 sps:$4 sm:$0xff]   ;;  %v3188_v47 = vld [vmem:[#allocation7 + $0xc0] ss:$8 sps:$4 sm:$0xff]  }
  0x4d   :  { %755 = vmatprep.subr.bf16.mxu1 %v3147_v17  ;;  %v95_v46 = vld [vmem:[#allocation2 + $0x8] sm:$0xff]  ;;  %v3192_v49 = vld [vmem:[#allocation7 + $0xb4] ss:$8 sps:$4 sm:$0xff]   ;;  %v3194_v54 = vld [vmem:[#allocation7 + $0xb0] ss:$8 sps:$4 sm:$0xff]   ;;  %s3785_s11 = smov [#allocation11]  }
  0x4e   :  { %v107_v48 = vpack.c.bf16 %v95_v46, %v95_v46  ;;  %v97_v50 = vld [vmem:[#allocation2 + $0x18] sm:$0xff]  ;;  %v3191_v51 = vld [vmem:[#allocation7 + $0x1c0] ss:$8 sps:$4 sm:$0xff]   ;;  %v3198_v55 = vld [vmem:[#allocation7 + $0xa4] ss:$8 sps:$4 sm:$0xff]   ;;  %s2747_s12 = sshll.u32 %s3785_s11, 4  ;;  %s2748_s12 = int_to_ptr.vmem [resolvable:$true] %s2747_s12 }
  0x4f   :  { %715 = vmatpush1.bf16.msra.mxu0 %v3146_v18  ;;  %v109_v52 = vpack.c.bf16 %v97_v50, %v97_v50  ;;  %v3195_v53 = vld [vmem:[#allocation7 + $0x1b4] ss:$8 sps:$4 sm:$0xff]   ;;  %v3197_v56 = vld [vmem:[#allocation7 + $0x1b0] ss:$8 sps:$4 sm:$0xff]   ;;  %v3201_v57 = vld [vmem:[#allocation7 + $0x1a4] ss:$8 sps:$4 sm:$0xff]   ;;  %p3753_p12 = scmp.lt.s32.totalorder %s2748_s12, %s2748_s12 }
  0x50   :  { %716 = vmatprep.subr.bf16.mxu0 %v3150_v19  ;;  %756 = vmatpush1.bf16.msra.mxu1 %v3149_v20  ;;  %v3200_v58 = vld [vmem:[#allocation7 + $0xa0] ss:$8 sps:$4 sm:$0xff]   ;;  %v3204_v59 = vld [vmem:[#allocation7 + $0x94] ss:$8 sps:$4 sm:$0xff]   ;;  %v3206_v62 = vld [vmem:[#allocation7 + $0x90] ss:$8 sps:$4 sm:$0xff]  }
  0x51   :  { %757 = vmatprep.subr.bf16.mxu1 %v3153_v21  ;;  %738 = vmatprep.mubr.bf16.mxu0 %v107_v48  ;;  %v3203_v60 = vld [vmem:[#allocation7 + $0x1a0] ss:$8 sps:$4 sm:$0xff]   ;;  %v3207_v61 = vld [vmem:[#allocation7 + $0x194] ss:$8 sps:$4 sm:$0xff]   ;;  %v3210_v63 = vld [vmem:[#allocation7 + $0x84] ss:$8 sps:$4 sm:$0xff]  }
  0x52   :  { %779 = vmatprep.mubr.bf16.mxu1 %v109_v52  ;;  %v3209_v0 = vld [vmem:[#allocation7 + $0x190] ss:$8 sps:$4 sm:$0xff]   ;;  %v3212_v1 = vld [vmem:[#allocation7 + $0x80] ss:$8 sps:$4 sm:$0xff]   ;;  %v3213_v2 = vld [vmem:[#allocation7 + $0x184] ss:$8 sps:$4 sm:$0xff]  }
  0x53   :  { %717 = vmatpush1.bf16.msra.mxu0 %v3152_v22  ;;  %v3215_v3 = vld [vmem:[#allocation7 + $0x180] ss:$8 sps:$4 sm:$0xff]   ;;  %v3218_v5 = vld [vmem:[#allocation7 + $0x274] ss:$8 sps:$4 sm:$0xff]   ;;  %v3216_v9 = vld [vmem:[#allocation7 + $0x270] ss:$8 sps:$4 sm:$0xff]  }
  0x54   :  { %718 = vmatprep.subr.bf16.mxu0 %v3156_v23  ;;  %758 = vmatpush1.bf16.msra.mxu1 %v3155_v24  ;;  %v94_v4 = vld [vmem:[#allocation2] sm:$0xff]  ;;  %v96_v6 = vld [vmem:[#allocation2 + $0x10] sm:$0xff] }
  0x55   :  { %759 = vmatprep.subr.bf16.mxu1 %v3159_v25  ;;  %v106_v7 = vpack.c.bf16 %v94_v4, %v94_v4  ;;  %v3221_v8 = vld [vmem:[#allocation8 + $0xe4] ss:$16 sps:$4 sm:$0xff]   ;;  %v108_v10 = vpack.c.bf16 %v96_v6, %v96_v6  ;;  %v3219_v12 = vld [vmem:[#allocation8 + $0xe0] ss:$16 sps:$4 sm:$0xff]  }
  0x56   :  { %v3224_v11 = vld [vmem:[#allocation7 + $0x264] ss:$8 sps:$4 sm:$0xff]   ;;  %v3222_v14 = vld [vmem:[#allocation7 + $0x260] ss:$8 sps:$4 sm:$0xff]   ;;  %v3230_v15 = vld [vmem:[#allocation7 + $0x254] ss:$8 sps:$4 sm:$0xff]  }
  0x57   :  { %719 = vmatpush1.bf16.msra.mxu0 %v3158_v26  ;;  %v3227_v13 = vld [vmem:[#allocation8 + $0xc4] ss:$16 sps:$4 sm:$0xff]   ;;  %v3225_v16 = vld [vmem:[#allocation8 + $0xc0] ss:$16 sps:$4 sm:$0xff]  }
  0x58   :  { %720 = vmatprep.subr.bf16.mxu0 %v3162_v27  ;;  %760 = vmatpush1.bf16.msra.mxu1 %v3161_v28  ;;  %v3233_v17 = vld [vmem:[#allocation8 + $0xa4] ss:$16 sps:$4 sm:$0xff]   ;;  %v3228_v18 = vld [vmem:[#allocation7 + $0x250] ss:$8 sps:$4 sm:$0xff]   ;;  %v3234_v22 = vld [vmem:[#allocation7 + $0x240] ss:$8 sps:$4 sm:$0xff]  }
  0x59   :  { %761 = vmatprep.subr.bf16.mxu1 %v3165_v29  ;;  %v3236_v19 = vld [vmem:[#allocation7 + $0x244] ss:$8 sps:$4 sm:$0xff]   ;;  %v3231_v20 = vld [vmem:[#allocation8 + $0xa0] ss:$16 sps:$4 sm:$0xff]   ;;  %v3242_v23 = vld [vmem:[#allocation7 + $0x234] ss:$8 sps:$4 sm:$0xff]  }
  0x5a   :  { %v3239_v21 = vld [vmem:[#allocation8 + $0x84] ss:$16 sps:$4 sm:$0xff]   ;;  %v3237_v24 = vld [vmem:[#allocation8 + $0x80] ss:$16 sps:$4 sm:$0xff]  }
  0x5b   :  { %721 = vmatpush1.bf16.msra.mxu0 %v3164_v30  ;;  %v3245_v25 = vld [vmem:[#allocation8 + $0x64] ss:$16 sps:$4 sm:$0xff]   ;;  %v3240_v26 = vld [vmem:[#allocation7 + $0x230] ss:$8 sps:$4 sm:$0xff]   ;;  %v3246_v30 = vld [vmem:[#allocation7 + $0x220] ss:$8 sps:$4 sm:$0xff]  }
  0x5c   :  { %722 = vmatprep.subr.bf16.mxu0 %v3168_v31  ;;  %762 = vmatpush1.bf16.msra.mxu1 %v3167_v32  ;;  %v3248_v27 = vld [vmem:[#allocation7 + $0x224] ss:$8 sps:$4 sm:$0xff]   ;;  %v3243_v28 = vld [vmem:[#allocation8 + $0x60] ss:$16 sps:$4 sm:$0xff]   ;;  %v3254_v31 = vld [vmem:[#allocation7 + $0x214] ss:$8 sps:$4 sm:$0xff]  }
  0x5d   :  { %763 = vmatprep.subr.bf16.mxu1 %v3171_v33  ;;  %v3251_v29 = vld [vmem:[#allocation8 + $0x44] ss:$16 sps:$4 sm:$0xff]   ;;  %v3249_v32 = vld [vmem:[#allocation8 + $0x40] ss:$16 sps:$4 sm:$0xff]  }
  0x5e   :  { %v3257_v33 = vld [vmem:[#allocation8 + $0x24] ss:$16 sps:$4 sm:$0xff]   ;;  %v3264_v46 = vld [vmem:[#allocation7 + $0x2f0] ss:$8 sps:$4 sm:$0xff]   ;;  %v3270_v50 = vld [vmem:[#allocation7 + $0x2e0] ss:$8 sps:$4 sm:$0xff]  }
  0x5f   :  { %723 = vmatpush2.bf16.msra.mxu0 %v3170_v34  ;;  %v99_v34 = vld [vmem:[#allocation2 + $0x28] sm:$0xff]  ;;  %v3267_v48 = vld [vmem:[#allocation8 + $0x1e0] ss:$16 sps:$4 sm:$0xff]  }
  0x60   :  { %724 = vmatprep.subr.bf16.mxu0 %v3174_v35  ;;  %764 = vmatpush2.bf16.msra.mxu1 %v3173_v36  ;;  %v3252_v35 = vld [vmem:[#allocation7 + $0x210] ss:$8 sps:$4 sm:$0xff]   ;;  %v111_v36 = vpack.c.bf16 %v99_v34, %v99_v34 }
  0x61   :  { %765 = vmatprep.subr.bf16.mxu1 %v3177_v37  ;;  %v3260_v37 = vld [vmem:[#allocation7 + $0x204] ss:$8 sps:$4 sm:$0xff]   ;;  %v3273_v52 = vld [vmem:[#allocation8 + $0x1c0] ss:$16 sps:$4 sm:$0xff]  }
  0x62   :  { %v3297_v4 = vld [vmem:[#allocation8 + $0x140] ss:$16 sps:$4 sm:$0xff]  }
  0x63   :  { %725 = vmatpush2.bf16.msra.mxu0 %v3176_v38  ;;  %v101_v38 = vld [vmem:[#allocation5 + $0x8] sm:$0xff]  ;;  %v3330_v34 = vld [vmem:[#allocation8 + $0x280] ss:$16 sps:$4 sm:$0xff]  }
  0x64   :  { %726 = vmatprep.subr.bf16.mxu0 %v3180_v39  ;;  %766 = vmatpush2.bf16.msra.mxu1 %v3179_v40  ;;  %v3255_v39 = vld [vmem:[#allocation8 + $0x20] ss:$16 sps:$4 sm:$0xff]   ;;  %v3846_v40 = vpack.c.bf16 %v101_v38, %v101_v38 }
  0x65   :  { %767 = vmatprep.subr.bf16.mxu1 %v3183_v41  ;;  %v3263_v41 = vld [vmem:[#allocation8 + $0x4] ss:$16 sps:$4 sm:$0xff]   ;;  %v3300_v6 = vld [vmem:[#allocation7 + $0x290] ss:$8 sps:$4 sm:$0xff]  }
  0x66   :  { %v3336_v38 = vld [vmem:[#allocation8 + $0x260] ss:$16 sps:$4 sm:$0xff]  }
  0x67   :  { %727 = vmatpush2.bf16.msra.mxu0 %v3182_v42  ;;  %v3258_v42 = vld [vmem:[#allocation7 + $0x200] ss:$8 sps:$4 sm:$0xff]  }
  0x68   :  { %728 = vmatprep.subr.bf16.mxu0 %v3186_v43  ;;  %768 = vmatpush2.bf16.msra.mxu1 %v3185_v44  ;;  %v3266_v43 = vld [vmem:[#allocation7 + $0x2f4] ss:$8 sps:$4 sm:$0xff]   ;;  %v3261_v44 = vld [vmem:[#allocation8] ss:$16 sps:$4 sm:$0xff]  }
  0x69   :  { %769 = vmatprep.subr.bf16.mxu1 %v3189_v45  ;;  %v3269_v45 = vld [vmem:[#allocation8 + $0x1e4] ss:$16 sps:$4 sm:$0xff]  }
  0x6b   :  { %729 = vmatpush2.bf16.msra.mxu0 %v3188_v47  ;;  %v3272_v47 = vld [vmem:[#allocation7 + $0x2e4] ss:$8 sps:$4 sm:$0xff]  }
  0x6c   :  { %730 = vmatprep.subr.bf16.mxu0 %v3192_v49  ;;  %770 = vmatpush2.bf16.msra.mxu1 %v3191_v51  ;;  %v3275_v49 = vld [vmem:[#allocation8 + $0x1c4] ss:$16 sps:$4 sm:$0xff]  }
  0x6d   :  { %771 = vmatprep.subr.bf16.mxu1 %v3195_v53  ;;  %v3278_v51 = vld [vmem:[#allocation7 + $0x2d4] ss:$8 sps:$4 sm:$0xff]  }
  0x6e   :  { %v3281_v53 = vld [vmem:[#allocation8 + $0x1a4] ss:$16 sps:$4 sm:$0xff]  }
  0x6f   :  { %731 = vmatpush2.bf16.msra.mxu0 %v3194_v54  ;;  %v3276_v54 = vld [vmem:[#allocation7 + $0x2d0] ss:$8 sps:$4 sm:$0xff]  }
  0x70   :  { %732 = vmatprep.subr.bf16.mxu0 %v3198_v55  ;;  %772 = vmatpush2.bf16.msra.mxu1 %v3197_v56  ;;  %v3284_v55 = vld [vmem:[#allocation7 + $0x2c4] ss:$8 sps:$4 sm:$0xff]   ;;  %v3279_v56 = vld [vmem:[#allocation8 + $0x1a0] ss:$16 sps:$4 sm:$0xff]  }
  0x71   :  { %773 = vmatprep.subr.bf16.mxu1 %v3201_v57  ;;  %v3287_v57 = vld [vmem:[#allocation8 + $0x184] ss:$16 sps:$4 sm:$0xff]  }
  0x73   :  { %733 = vmatpush2.bf16.msra.mxu0 %v3200_v58  ;;  %v3282_v58 = vld [vmem:[#allocation7 + $0x2c0] ss:$8 sps:$4 sm:$0xff]  }
  0x74   :  { %734 = vmatprep.subr.bf16.mxu0 %v3204_v59  ;;  %774 = vmatpush2.bf16.msra.mxu1 %v3203_v60  ;;  %v3290_v59 = vld [vmem:[#allocation7 + $0x2b4] ss:$8 sps:$4 sm:$0xff]   ;;  %v3285_v60 = vld [vmem:[#allocation8 + $0x180] ss:$16 sps:$4 sm:$0xff]  }
  0x75   :  { %775 = vmatprep.subr.bf16.mxu1 %v3207_v61  ;;  %v3293_v61 = vld [vmem:[#allocation8 + $0x164] ss:$16 sps:$4 sm:$0xff]  }
  0x77   :  { %735 = vmatpush2.bf16.msra.mxu0 %v3206_v62  ;;  %v3288_v62 = vld [vmem:[#allocation7 + $0x2b0] ss:$8 sps:$4 sm:$0xff]  }
  0x78   :  { %736 = vmatprep.subr.bf16.mxu0 %v3210_v63  ;;  %776 = vmatpush2.bf16.msra.mxu1 %v3209_v0  ;;  %v3296_v63 = vld [vmem:[#allocation7 + $0x2a4] ss:$8 sps:$4 sm:$0xff]   ;;  %v3291_v0 = vld [vmem:[#allocation8 + $0x160] ss:$16 sps:$4 sm:$0xff]  }
  0x79   :  { %777 = vmatprep.subr.bf16.mxu1 %v3213_v2  ;;  %v3294_v2 = vld [vmem:[#allocation7 + $0x2a0] ss:$8 sps:$4 sm:$0xff]  }
  0x7b   :  { %737 = vmatpush2.bf16.msra.mxu0 %v3212_v1  ;;  %v3299_v1 = vld [vmem:[#allocation8 + $0x144] ss:$16 sps:$4 sm:$0xff]  }
  0x7c   :  { %788 = vmatprep.subr.bf16.mxu0 %v3218_v5  ;;  %778 = vmatpush2.bf16.msra.mxu1 %v3215_v3  ;;  %v3302_v3 = vld [vmem:[#allocation7 + $0x294] ss:$8 sps:$4 sm:$0xff]  }
  0x7d   :  { %2003 = vmatprep.subr.bf16.mxu1 %v3221_v8  ;;  %v3305_v5 = vld [vmem:[#allocation8 + $0x124] ss:$16 sps:$4 sm:$0xff]   ;;  %v3303_v8 = vld [vmem:[#allocation8 + $0x120] ss:$16 sps:$4 sm:$0xff]  }
  0x7e   :  { %739 = vmatmul.mubr.bf16.vlgmr.msra.gmra.mxu0 %v106_v7  ;;  %v3308_v7 = vld [vmem:[#allocation7 + $0x284] ss:$8 sps:$4 sm:$0xff]  }
  0x7f   :  { %789 = vmatpush1.bf16.msra.mxu0 %v3216_v9  ;;  %780 = vmatmul.mubr.bf16.vlgmr.msra.gmra.mxu1 %v108_v10  ;;  %v3306_v9 = vld [vmem:[#allocation7 + $0x280] ss:$8 sps:$4 sm:$0xff]   ;;  %v3311_v10 = vld [vmem:[#allocation8 + $0x104] ss:$16 sps:$4 sm:$0xff]  }
  0x80   :  { %790 = vmatprep.subr.bf16.mxu0 %v3224_v11  ;;  %2004 = vmatpush1.bf16.msra.mxu1 %v3219_v12  ;;  %v3309_v11 = vld [vmem:[#allocation8 + $0x100] ss:$16 sps:$4 sm:$0xff]  }
  0x81   :  { %2005 = vmatprep.subr.bf16.mxu1 %v3227_v13  ;;  %820 = vmatprep.mubr.bf16.mxu0 %v111_v36  ;;  %v98_v12 = vld [vmem:[#allocation2 + $0x20] sm:$0xff] }
  0x82   :  { %2035 = vmatprep.mubr.bf16.mxu1 %v3846_v40  ;;  %v3314_v13 = vld [vmem:[#allocation8 + $0x2e4] ss:$16 sps:$4 sm:$0xff]   ;;  %v3333_v36 = vld [vmem:[#allocation8 + $0x480] ss:$16 sps:$4 sm:$0xff]  }
  0x83   :  { %791 = vmatpush1.bf16.msra.mxu0 %v3222_v14  ;;  %v100_v14 = vld [vmem:[#allocation5] sm:$0xff] }
  0x84   :  { %792 = vmatprep.subr.bf16.mxu0 %v3230_v15  ;;  %2006 = vmatpush1.bf16.msra.mxu1 %v3225_v16  ;;  %v110_v15 = vpack.c.bf16 %v98_v12, %v98_v12  ;;  %v3317_v16 = vld [vmem:[#allocation8 + $0x4e4] ss:$16 sps:$4 sm:$0xff]  }
  0x85   :  { %2007 = vmatprep.subr.bf16.mxu1 %v3233_v17  ;;  %v3312_v17 = vld [vmem:[#allocation8 + $0x2e0] ss:$16 sps:$4 sm:$0xff]   ;;  %v3398_v12 = vld [vmem:[#allocation8 + $0x324] ss:$16 sps:$4 sm:$0xff]  }
  0x87   :  { %793 = vmatpush1.bf16.msra.mxu0 %v3228_v18  ;;  %v3849_v18 = vpack.c.bf16 %v100_v14, %v100_v14  ;;  %v3401_v14 = vld [vmem:[#allocation8 + $0x524] ss:$16 sps:$4 sm:$0xff]  }
  0x88   :  { %794 = vmatprep.subr.bf16.mxu0 %v3236_v19  ;;  %2008 = vmatpush1.bf16.msra.mxu1 %v3231_v20  ;;  %v3320_v19 = vld [vmem:[#allocation8 + $0x2c4] ss:$16 sps:$4 sm:$0xff]   ;;  %v3315_v20 = vld [vmem:[#allocation8 + $0x4e0] ss:$16 sps:$4 sm:$0xff]  }
  0x89   :  { %2009 = vmatprep.subr.bf16.mxu1 %v3239_v21  ;;  %v3323_v21 = vld [vmem:[#allocation8 + $0x4c4] ss:$16 sps:$4 sm:$0xff]  }
  0x8b   :  { %795 = vmatpush1.bf16.msra.mxu0 %v3234_v22  ;;  %v103_v22 = vld [vmem:[#allocation5 + $0x18] sm:$0xff] }
  0x8c   :  { %796 = vmatprep.subr.bf16.mxu0 %v3242_v23  ;;  %2010 = vmatpush1.bf16.msra.mxu1 %v3237_v24  ;;  %v3318_v23 = vld [vmem:[#allocation8 + $0x2c0] ss:$16 sps:$4 sm:$0xff]   ;;  %v3851_v24 = vpack.c.bf16 %v103_v22, %v103_v22  ;;  %v3410_v22 = vld [vmem:[#allocation8 + $0xec] ss:$16 sps:$4 sm:$0xff]  }
  0x8d   :  { %2011 = vmatprep.subr.bf16.mxu1 %v3245_v25  ;;  %v3326_v25 = vld [vmem:[#allocation8 + $0x2a4] ss:$16 sps:$4 sm:$0xff]  }
  0x8f   :  { %797 = vmatpush1.bf16.msra.mxu0 %v3240_v26  ;;  %v105_v26 = vld [vmem:[#allocation5 + $0x28] sm:$0xff] }
  0x90   :  { %798 = vmatprep.subr.bf16.mxu0 %v3248_v27  ;;  %2012 = vmatpush1.bf16.msra.mxu1 %v3243_v28  ;;  %v3321_v27 = vld [vmem:[#allocation8 + $0x4c0] ss:$16 sps:$4 sm:$0xff]   ;;  %v3855_v28 = vpack.c.bf16 %v105_v26, %v105_v26 }
  0x91   :  { %2013 = vmatprep.subr.bf16.mxu1 %v3251_v29  ;;  %v3329_v29 = vld [vmem:[#allocation8 + $0x4a4] ss:$16 sps:$4 sm:$0xff]  }
  0x93   :  { %799 = vmatpush1.bf16.msra.mxu0 %v3246_v30  ;;  %v3324_v30 = vld [vmem:[#allocation8 + $0x2a0] ss:$16 sps:$4 sm:$0xff]  }
  0x94   :  { %800 = vmatprep.subr.bf16.mxu0 %v3254_v31  ;;  %2014 = vmatpush1.bf16.msra.mxu1 %v3249_v32  ;;  %v3332_v31 = vld [vmem:[#allocation8 + $0x284] ss:$16 sps:$4 sm:$0xff]   ;;  %v3327_v32 = vld [vmem:[#allocation8 + $0x4a0] ss:$16 sps:$4 sm:$0xff]  }
  0x95   :  { %2015 = vmatprep.subr.bf16.mxu1 %v3257_v33  ;;  %v3335_v33 = vld [vmem:[#allocation8 + $0x484] ss:$16 sps:$4 sm:$0xff]  }
  0x97   :  { %801 = vmatpush1.bf16.msra.mxu0 %v3252_v35  ;;  %v3338_v35 = vld [vmem:[#allocation8 + $0x264] ss:$16 sps:$4 sm:$0xff]  }
  0x98   :  { %802 = vmatprep.subr.bf16.mxu0 %v3260_v37  ;;  %2016 = vmatpush1.bf16.msra.mxu1 %v3255_v39  ;;  %v3341_v37 = vld [vmem:[#allocation8 + $0x464] ss:$16 sps:$4 sm:$0xff]  }
  0x99   :  { %2017 = vmatprep.subr.bf16.mxu1 %v3263_v41  ;;  %v3344_v39 = vld [vmem:[#allocation8 + $0x244] ss:$16 sps:$4 sm:$0xff]   ;;  %v3339_v41 = vld [vmem:[#allocation8 + $0x460] ss:$16 sps:$4 sm:$0xff]  }
  0x9b   :  { %803 = vmatpush1.bf16.msra.mxu0 %v3258_v42  ;;  %v3347_v42 = vld [vmem:[#allocation8 + $0x444] ss:$16 sps:$4 sm:$0xff]  }
  0x9c   :  { %804 = vmatprep.subr.bf16.mxu0 %v3266_v43  ;;  %2018 = vmatpush1.bf16.msra.mxu1 %v3261_v44  ;;  %v3342_v43 = vld [vmem:[#allocation8 + $0x240] ss:$16 sps:$4 sm:$0xff]   ;;  %v3350_v44 = vld [vmem:[#allocation8 + $0x224] ss:$16 sps:$4 sm:$0xff]  }
  0x9d   :  { %2019 = vmatprep.subr.bf16.mxu1 %v3269_v45  ;;  %v3345_v45 = vld [vmem:[#allocation8 + $0x440] ss:$16 sps:$4 sm:$0xff]  }
  0x9f   :  { %805 = vmatpush2.bf16.msra.mxu0 %v3264_v46  ;;  %v3353_v46 = vld [vmem:[#allocation8 + $0x424] ss:$16 sps:$4 sm:$0xff]  }
  0xa0   :  { %806 = vmatprep.subr.bf16.mxu0 %v3272_v47  ;;  %2020 = vmatpush2.bf16.msra.mxu1 %v3267_v48  ;;  %v3348_v47 = vld [vmem:[#allocation8 + $0x220] ss:$16 sps:$4 sm:$0xff]   ;;  %v3356_v48 = vld [vmem:[#allocation8 + $0x204] ss:$16 sps:$4 sm:$0xff]  }
  0xa1   :  { %2021 = vmatprep.subr.bf16.mxu1 %v3275_v49  ;;  %v3351_v49 = vld [vmem:[#allocation8 + $0x420] ss:$16 sps:$4 sm:$0xff]  }
  0xa3   :  { %807 = vmatpush2.bf16.msra.mxu0 %v3270_v50  ;;  %v3359_v50 = vld [vmem:[#allocation8 + $0x404] ss:$16 sps:$4 sm:$0xff]  }
  0xa4   :  { %808 = vmatprep.subr.bf16.mxu0 %v3278_v51  ;;  %2022 = vmatpush2.bf16.msra.mxu1 %v3273_v52  ;;  %v3354_v51 = vld [vmem:[#allocation8 + $0x200] ss:$16 sps:$4 sm:$0xff]   ;;  %v3362_v52 = vld [vmem:[#allocation8 + $0x3e4] ss:$16 sps:$4 sm:$0xff]  }
  0xa5   :  { %2023 = vmatprep.subr.bf16.mxu1 %v3281_v53  ;;  %v3357_v53 = vld [vmem:[#allocation8 + $0x400] ss:$16 sps:$4 sm:$0xff]  }
  0xa7   :  { %809 = vmatpush2.bf16.msra.mxu0 %v3276_v54  ;;  %v3365_v54 = vld [vmem:[#allocation8 + $0x5e4] ss:$16 sps:$4 sm:$0xff]  }
  0xa8   :  { %810 = vmatprep.subr.bf16.mxu0 %v3284_v55  ;;  %2024 = vmatpush2.bf16.msra.mxu1 %v3279_v56  ;;  %v3360_v55 = vld [vmem:[#allocation8 + $0x3e0] ss:$16 sps:$4 sm:$0xff]   ;;  %v3368_v56 = vld [vmem:[#allocation8 + $0x3c4] ss:$16 sps:$4 sm:$0xff]  }
  0xa9   :  { %2025 = vmatprep.subr.bf16.mxu1 %v3287_v57  ;;  %v3363_v57 = vld [vmem:[#allocation8 + $0x5e0] ss:$16 sps:$4 sm:$0xff]  }
  0xab   :  { %811 = vmatpush2.bf16.msra.mxu0 %v3282_v58  ;;  %v3371_v58 = vld [vmem:[#allocation8 + $0x5c4] ss:$16 sps:$4 sm:$0xff]  }
  0xac   :  { %812 = vmatprep.subr.bf16.mxu0 %v3290_v59  ;;  %2026 = vmatpush2.bf16.msra.mxu1 %v3285_v60  ;;  %v3366_v59 = vld [vmem:[#allocation8 + $0x3c0] ss:$16 sps:$4 sm:$0xff]   ;;  %v3374_v60 = vld [vmem:[#allocation8 + $0x3a4] ss:$16 sps:$4 sm:$0xff]  }
  0xad   :  { %2027 = vmatprep.subr.bf16.mxu1 %v3293_v61  ;;  %v3369_v61 = vld [vmem:[#allocation8 + $0x5c0] ss:$16 sps:$4 sm:$0xff]  }
  0xaf   :  { %813 = vmatpush2.bf16.msra.mxu0 %v3288_v62  ;;  %v3377_v62 = vld [vmem:[#allocation8 + $0x5a4] ss:$16 sps:$4 sm:$0xff]  }
  0xb0   :  { %814 = vmatprep.subr.bf16.mxu0 %v3296_v63  ;;  %2028 = vmatpush2.bf16.msra.mxu1 %v3291_v0  ;;  %v3372_v63 = vld [vmem:[#allocation8 + $0x3a0] ss:$16 sps:$4 sm:$0xff]   ;;  %v3380_v0 = vld [vmem:[#allocation8 + $0x384] ss:$16 sps:$4 sm:$0xff]  }
  0xb1   :  { %2029 = vmatprep.subr.bf16.mxu1 %v3299_v1  ;;  %v3375_v1 = vld [vmem:[#allocation8 + $0x5a0] ss:$16 sps:$4 sm:$0xff]  }
  0xb3   :  { %815 = vmatpush2.bf16.msra.mxu0 %v3294_v2  ;;  %v3383_v2 = vld [vmem:[#allocation8 + $0x584] ss:$16 sps:$4 sm:$0xff]  }
  0xb4   :  { %816 = vmatprep.subr.bf16.mxu0 %v3302_v3  ;;  %2030 = vmatpush2.bf16.msra.mxu1 %v3297_v4  ;;  %v3378_v3 = vld [vmem:[#allocation8 + $0x380] ss:$16 sps:$4 sm:$0xff]   ;;  %v3386_v4 = vld [vmem:[#allocation8 + $0x364] ss:$16 sps:$4 sm:$0xff]  }
  0xb5   :  { %2031 = vmatprep.subr.bf16.mxu1 %v3305_v5  ;;  %v3381_v5 = vld [vmem:[#allocation8 + $0x580] ss:$16 sps:$4 sm:$0xff]  }
  0xb7   :  { %817 = vmatpush2.bf16.msra.mxu0 %v3300_v6  ;;  %v3389_v6 = vld [vmem:[#allocation8 + $0x564] ss:$16 sps:$4 sm:$0xff]  }
  0xb8   :  { %818 = vmatprep.subr.bf16.mxu0 %v3308_v7  ;;  %2032 = vmatpush2.bf16.msra.mxu1 %v3303_v8  ;;  %v3384_v7 = vld [vmem:[#allocation8 + $0x360] ss:$16 sps:$4 sm:$0xff]   ;;  %v3392_v8 = vld [vmem:[#allocation8 + $0x344] ss:$16 sps:$4 sm:$0xff]  }
  0xb9   :  { %2033 = vmatprep.subr.bf16.mxu1 %v3311_v10  ;;  %v3395_v10 = vld [vmem:[#allocation8 + $0x544] ss:$16 sps:$4 sm:$0xff]  }
  0xbb   :  { %819 = vmatpush2.bf16.msra.mxu0 %v3306_v9  ;;  %v3387_v9 = vld [vmem:[#allocation8 + $0x560] ss:$16 sps:$4 sm:$0xff]  }
  0xbc   :  { %2044 = vmatprep.subr.bf16.mxu0 %v3314_v13  ;;  %2034 = vmatpush2.bf16.msra.mxu1 %v3309_v11  ;;  %v3390_v11 = vld [vmem:[#allocation8 + $0x340] ss:$16 sps:$4 sm:$0xff]  }
  0xbd   :  { %2085 = vmatprep.subr.bf16.mxu1 %v3317_v16  ;;  %v3393_v13 = vld [vmem:[#allocation8 + $0x540] ss:$16 sps:$4 sm:$0xff]   ;;  %v3404_v16 = vld [vmem:[#allocation8 + $0x304] ss:$16 sps:$4 sm:$0xff]  }
  0xbe   :  { %821 = vmatmul.mubr.bf16.vlgmr.msra.gmra.mxu0 %v110_v15  ;;  %v3396_v15 = vld [vmem:[#allocation8 + $0x320] ss:$16 sps:$4 sm:$0xff]  }
  0xbf   :  { %2045 = vmatpush1.bf16.msra.mxu0 %v3312_v17  ;;  %2036 = vmatmul.mubr.bf16.vlgmr.msra.gmra.mxu1 %v3849_v18  ;;  %v3399_v17 = vld [vmem:[#allocation8 + $0x520] ss:$16 sps:$4 sm:$0xff]  }
  0xc0   :  { %2046 = vmatprep.subr.bf16.mxu0 %v3320_v19  ;;  %2086 = vmatpush1.bf16.msra.mxu1 %v3315_v20  ;;  %v3402_v19 = vld [vmem:[#allocation8 + $0x300] ss:$16 sps:$4 sm:$0xff]   ;;  %v3407_v20 = vld [vmem:[#allocation8 + $0x504] ss:$16 sps:$4 sm:$0xff]  }
  0xc1   :  { %2076 = vmatprep.mubr.bf16.mxu0 %v3851_v24  ;;  %2087 = vmatprep.subr.bf16.mxu1 %v3323_v21  ;;  %v102_v21 = vld [vmem:[#allocation5 + $0x10] sm:$0xff] }
  0xc2   :  { %2117 = vmatprep.mubr.bf16.mxu1 %v3855_v28  ;;  %v3858_v26 = vpack.c.bf16 %v102_v21, %v102_v21  ;;  %v3497_v21 = vld [vmem:[#allocation8 + $0x32c] ss:$16 sps:$4 sm:$0xff]  }
  0xc3   :  { %2047 = vmatpush1.bf16.msra.mxu0 %v3318_v23  ;;  %v3405_v23 = vld [vmem:[#allocation8 + $0x500] ss:$16 sps:$4 sm:$0xff]  }
  0xc4   :  { %2048 = vmatprep.subr.bf16.mxu0 %v3326_v25  ;;  %2088 = vmatpush1.bf16.msra.mxu1 %v3321_v27  ;;  %v104_v25 = vld [vmem:[#allocation5 + $0x20] sm:$0xff]  ;;  %v3413_v27 = vld [vmem:[#allocation8 + $0x2ec] ss:$16 sps:$4 sm:$0xff]  }
  0xc5   :  { %2089 = vmatprep.subr.bf16.mxu1 %v3329_v29  ;;  %v3408_v29 = vld [vmem:[#allocation8 + $0xe8] ss:$16 sps:$4 sm:$0xff]  }
  0xc7   :  { %2049 = vmatpush1.bf16.msra.mxu0 %v3324_v30  ;;  %v3860_v30 = vpack.c.bf16 %v104_v25, %v104_v25  ;;  %v3495_v25 = vld [vmem:[#allocation8 + $0x328] ss:$16 sps:$4 sm:$0xff]  }
  0xc8   :  { %2050 = vmatprep.subr.bf16.mxu0 %v3332_v31  ;;  %2090 = vmatpush1.bf16.msra.mxu1 %v3327_v32  ;;  %v3416_v31 = vld [vmem:[#allocation8 + $0xcc] ss:$16 sps:$4 sm:$0xff]   ;;  %v3411_v32 = vld [vmem:[#allocation8 + $0x2e8] ss:$16 sps:$4 sm:$0xff]  }
  0xc9   :  { %2091 = vmatprep.subr.bf16.mxu1 %v3335_v33  ;;  %v3414_v33 = vld [vmem:[#allocation8 + $0xc8] ss:$16 sps:$4 sm:$0xff]  }
  0xcb   :  { %2051 = vmatpush1.bf16.msra.mxu0 %v3330_v34  ;;  %v3419_v34 = vld [vmem:[#allocation8 + $0x2cc] ss:$16 sps:$4 sm:$0xff]  }
  0xcc   :  { %2052 = vmatprep.subr.bf16.mxu0 %v3338_v35  ;;  %2092 = vmatpush1.bf16.msra.mxu1 %v3333_v36  ;;  %v3417_v35 = vld [vmem:[#allocation8 + $0x2c8] ss:$16 sps:$4 sm:$0xff]   ;;  %v3422_v36 = vld [vmem:[#allocation8 + $0xac] ss:$16 sps:$4 sm:$0xff]  }
  0xcd   :  { %2093 = vmatprep.subr.bf16.mxu1 %v3341_v37  ;;  %v3425_v37 = vld [vmem:[#allocation8 + $0x2ac] ss:$16 sps:$4 sm:$0xff]  }
  0xcf   :  { %2053 = vmatpush1.bf16.msra.mxu0 %v3336_v38  ;;  %v3420_v38 = vld [vmem:[#allocation8 + $0xa8] ss:$16 sps:$4 sm:$0xff]  }
  0xd0   :  { %2054 = vmatprep.subr.bf16.mxu0 %v3344_v39  ;;  %2094 = vmatpush1.bf16.msra.mxu1 %v3339_v41  ;;  %v3428_v39 = vld [vmem:[#allocation8 + $0x8c] ss:$16 sps:$4 sm:$0xff]   ;;  %v3423_v41 = vld [vmem:[#allocation8 + $0x2a8] ss:$16 sps:$4 sm:$0xff]  }
  0xd1   :  { %2095 = vmatprep.subr.bf16.mxu1 %v3347_v42  ;;  %v3431_v42 = vld [vmem:[#allocation8 + $0x28c] ss:$16 sps:$4 sm:$0xff]  }
  0xd3   :  { %2055 = vmatpush1.bf16.msra.mxu0 %v3342_v43  ;;  %v3426_v43 = vld [vmem:[#allocation8 + $0x88] ss:$16 sps:$4 sm:$0xff]  }
  0xd4   :  { %2056 = vmatprep.subr.bf16.mxu0 %v3350_v44  ;;  %2096 = vmatpush1.bf16.msra.mxu1 %v3345_v45  ;;  %v3429_v44 = vld [vmem:[#allocation8 + $0x288] ss:$16 sps:$4 sm:$0xff]   ;;  %v3437_v45 = vld [vmem:[#allocation8 + $0x26c] ss:$16 sps:$4 sm:$0xff]  }
  0xd5   :  { %2097 = vmatprep.subr.bf16.mxu1 %v3353_v46  ;;  %v3432_v46 = vld [vmem:[#allocation8 + $0x68] ss:$16 sps:$4 sm:$0xff]  }
  0xd7   :  { %2057 = vmatpush1.bf16.msra.mxu0 %v3348_v47  ;;  %v3435_v47 = vld [vmem:[#allocation8 + $0x268] ss:$16 sps:$4 sm:$0xff]  }
  0xd8   :  { %2058 = vmatprep.subr.bf16.mxu0 %v3356_v48  ;;  %2098 = vmatpush1.bf16.msra.mxu1 %v3351_v49  ;;  %v3443_v48 = vld [vmem:[#allocation8 + $0x24c] ss:$16 sps:$4 sm:$0xff]   ;;  %v3438_v49 = vld [vmem:[#allocation8 + $0x48] ss:$16 sps:$4 sm:$0xff]  }
  0xd9   :  { %2099 = vmatprep.subr.bf16.mxu1 %v3359_v50  ;;  %v3441_v50 = vld [vmem:[#allocation8 + $0x248] ss:$16 sps:$4 sm:$0xff]  }
  0xdb   :  { %2059 = vmatpush1.bf16.msra.mxu0 %v3354_v51  ;;  %v3446_v51 = vld [vmem:[#allocation8 + $0x2c] ss:$16 sps:$4 sm:$0xff]  }
  0xdc   :  { %2060 = vmatprep.subr.bf16.mxu0 %v3362_v52  ;;  %2100 = vmatpush1.bf16.msra.mxu1 %v3357_v53  ;;  %v3444_v52 = vld [vmem:[#allocation8 + $0x28] ss:$16 sps:$4 sm:$0xff]   ;;  %v3449_v53 = vld [vmem:[#allocation8 + $0x22c] ss:$16 sps:$4 sm:$0xff]  }
  0xdd   :  { %2101 = vmatprep.subr.bf16.mxu1 %v3365_v54  ;;  %v3452_v54 = vld [vmem:[#allocation8 + $0xc] ss:$16 sps:$4 sm:$0xff]  }
  0xdf   :  { %2061 = vmatpush2.bf16.msra.mxu0 %v3360_v55  ;;  %v3447_v55 = vld [vmem:[#allocation8 + $0x228] ss:$16 sps:$4 sm:$0xff]  }
  0xe0   :  { %2062 = vmatprep.subr.bf16.mxu0 %v3368_v56  ;;  %2102 = vmatpush2.bf16.msra.mxu1 %v3363_v57  ;;  %v3455_v56 = vld [vmem:[#allocation8 + $0x20c] ss:$16 sps:$4 sm:$0xff]   ;;  %v3450_v57 = vld [vmem:[#allocation8 + $0x8] ss:$16 sps:$4 sm:$0xff]  }
  0xe1   :  { %2103 = vmatprep.subr.bf16.mxu1 %v3371_v58  ;;  %v3458_v58 = vld [vmem:[#allocation8 + $0x1ec] ss:$16 sps:$4 sm:$0xff]  }
  0xe3   :  { %2063 = vmatpush2.bf16.msra.mxu0 %v3366_v59  ;;  %v3453_v59 = vld [vmem:[#allocation8 + $0x208] ss:$16 sps:$4 sm:$0xff]  }
  0xe4   :  { %2064 = vmatprep.subr.bf16.mxu0 %v3374_v60  ;;  %2104 = vmatpush2.bf16.msra.mxu1 %v3369_v61  ;;  %v3461_v60 = vld [vmem:[#allocation8 + $0x3ec] ss:$16 sps:$4 sm:$0xff]   ;;  %v3456_v61 = vld [vmem:[#allocation8 + $0x1e8] ss:$16 sps:$4 sm:$0xff]  }
  0xe5   :  { %2105 = vmatprep.subr.bf16.mxu1 %v3377_v62  ;;  %v3464_v62 = vld [vmem:[#allocation8 + $0x1cc] ss:$16 sps:$4 sm:$0xff]  }
  0xe7   :  { %2065 = vmatpush2.bf16.msra.mxu0 %v3372_v63  ;;  %v3459_v63 = vld [vmem:[#allocation8 + $0x3e8] ss:$16 sps:$4 sm:$0xff]  }
  0xe8   :  { %2066 = vmatprep.subr.bf16.mxu0 %v3380_v0  ;;  %2106 = vmatpush2.bf16.msra.mxu1 %v3375_v1  ;;  %v3467_v0 = vld [vmem:[#allocation8 + $0x3cc] ss:$16 sps:$4 sm:$0xff]   ;;  %v3462_v1 = vld [vmem:[#allocation8 + $0x1c8] ss:$16 sps:$4 sm:$0xff]  }
  0xe9   :  { %2107 = vmatprep.subr.bf16.mxu1 %v3383_v2  ;;  %v3470_v2 = vld [vmem:[#allocation8 + $0x1ac] ss:$16 sps:$4 sm:$0xff]  }
  0xeb   :  { %2067 = vmatpush2.bf16.msra.mxu0 %v3378_v3  ;;  %v3465_v3 = vld [vmem:[#allocation8 + $0x3c8] ss:$16 sps:$4 sm:$0xff]  }
  0xec   :  { %2068 = vmatprep.subr.bf16.mxu0 %v3386_v4  ;;  %2108 = vmatpush2.bf16.msra.mxu1 %v3381_v5  ;;  %v3473_v4 = vld [vmem:[#allocation8 + $0x3ac] ss:$16 sps:$4 sm:$0xff]   ;;  %v3468_v5 = vld [vmem:[#allocation8 + $0x1a8] ss:$16 sps:$4 sm:$0xff]  }
  0xed   :  { %2109 = vmatprep.subr.bf16.mxu1 %v3389_v6  ;;  %v3476_v6 = vld [vmem:[#allocation8 + $0x18c] ss:$16 sps:$4 sm:$0xff]  }
  0xef   :  { %2069 = vmatpush2.bf16.msra.mxu0 %v3384_v7  ;;  %v3471_v7 = vld [vmem:[#allocation8 + $0x3a8] ss:$16 sps:$4 sm:$0xff]  }
  0xf0   :  { %2070 = vmatprep.subr.bf16.mxu0 %v3392_v8  ;;  %2110 = vmatpush2.bf16.msra.mxu1 %v3387_v9  ;;  %v3479_v8 = vld [vmem:[#allocation8 + $0x38c] ss:$16 sps:$4 sm:$0xff]   ;;  %v3474_v9 = vld [vmem:[#allocation8 + $0x188] ss:$16 sps:$4 sm:$0xff]  }
  0xf1   :  { %2111 = vmatprep.subr.bf16.mxu1 %v3395_v10  ;;  %v3482_v10 = vld [vmem:[#allocation8 + $0x16c] ss:$16 sps:$4 sm:$0xff]  }
  0xf3   :  { %2071 = vmatpush2.bf16.msra.mxu0 %v3390_v11  ;;  %v3477_v11 = vld [vmem:[#allocation8 + $0x388] ss:$16 sps:$4 sm:$0xff]  }
  0xf4   :  { %2072 = vmatprep.subr.bf16.mxu0 %v3398_v12  ;;  %2112 = vmatpush2.bf16.msra.mxu1 %v3393_v13  ;;  %v3485_v12 = vld [vmem:[#allocation8 + $0x36c] ss:$16 sps:$4 sm:$0xff]   ;;  %v3480_v13 = vld [vmem:[#allocation8 + $0x168] ss:$16 sps:$4 sm:$0xff]  }
  0xf5   :  { %2113 = vmatprep.subr.bf16.mxu1 %v3401_v14  ;;  %v3488_v14 = vld [vmem:[#allocation8 + $0x14c] ss:$16 sps:$4 sm:$0xff]  }
  0xf7   :  { %2073 = vmatpush2.bf16.msra.mxu0 %v3396_v15  ;;  %v3483_v15 = vld [vmem:[#allocation8 + $0x368] ss:$16 sps:$4 sm:$0xff]  }
  0xf8   :  { %2074 = vmatprep.subr.bf16.mxu0 %v3404_v16  ;;  %2114 = vmatpush2.bf16.msra.mxu1 %v3399_v17  ;;  %v3491_v16 = vld [vmem:[#allocation8 + $0x34c] ss:$16 sps:$4 sm:$0xff]   ;;  %v3486_v17 = vld [vmem:[#allocation8 + $0x148] ss:$16 sps:$4 sm:$0xff]  }
  0xf9   :  { %2115 = vmatprep.subr.bf16.mxu1 %v3407_v20  ;;  %v3489_v20 = vld [vmem:[#allocation8 + $0x348] ss:$16 sps:$4 sm:$0xff]  }
  0xfb   :  { %2075 = vmatpush2.bf16.msra.mxu0 %v3402_v19  ;;  %v3494_v19 = vld [vmem:[#allocation8 + $0x12c] ss:$16 sps:$4 sm:$0xff]  }
  0xfc   :  { %2126 = vmatprep.subr.bf16.mxu0 %v3410_v22  ;;  %2116 = vmatpush2.bf16.msra.mxu1 %v3405_v23  ;;  %v3492_v22 = vld [vmem:[#allocation8 + $0x128] ss:$16 sps:$4 sm:$0xff]   ;;  %v3500_v23 = vld [vmem:[#allocation8 + $0x10c] ss:$16 sps:$4 sm:$0xff]  }
  0xfd   :  { %2167 = vmatprep.subr.bf16.mxu1 %v3413_v27  ;;  %v3503_v27 = vld [vmem:[#allocation8 + $0x30c] ss:$16 sps:$4 sm:$0xff]  }
  0xfe   :  { %2077 = vmatmul.mubr.bf16.vlgmr.msra.gmra.mxu0 %v3858_v26 }
  0xff   :  { %2127 = vmatpush1.bf16.msra.mxu0 %v3408_v29  ;;  %2158 = vmatprep.mubr.bf16.mxu0 %v3846_v40  ;;  %v3434_v40 = vld [vmem:[#allocation8 + $0x6c] ss:$16 sps:$4 sm:$0xff]   ;;  %v3498_v29 = vld [vmem:[#allocation8 + $0x108] ss:$16 sps:$4 sm:$0xff]  }
 0x100   :  { %2118 = vmatmul.mubr.bf16.vlgmr.msra.gmra.mxu1 %v3860_v30  ;;  %2128 = vmatprep.subr.bf16.mxu0 %v3416_v31  ;;  %v3506_v31 = vld [vmem:[#allocation8 + $0x4ec] ss:$16 sps:$4 sm:$0xff]  }
 0x101   :  { %2168 = vmatpush1.bf16.msra.mxu1 %v3411_v32  ;;  %2199 = vmatprep.mubr.bf16.mxu1 %v3851_v24  ;;  %v3440_v24 = vld [vmem:[#allocation8 + $0x4c] ss:$16 sps:$4 sm:$0xff]   ;;  %v3501_v32 = vld [vmem:[#allocation8 + $0x308] ss:$16 sps:$4 sm:$0xff]  }
 0x102   :  { %2169 = vmatprep.subr.bf16.mxu1 %v3419_v34  ;;  %v3504_v34 = vld [vmem:[#allocation8 + $0x4e8] ss:$16 sps:$4 sm:$0xff]  }
 0x103   :  { %2129 = vmatpush1.bf16.msra.mxu0 %v3414_v33  ;;  %v3554_v33 = vld [vmem:[#allocation10 + $0x74] ss:$8 sps:$4 sm:$0xff]  }
 0x104   :  { %2130 = vmatprep.subr.bf16.mxu0 %v3422_v36  ;;  %v3552_v36 = vld [vmem:[#allocation10 + $0x70] ss:$8 sps:$4 sm:$0xff]  }
 0x105   :  { %2170 = vmatpush1.bf16.msra.mxu1 %v3417_v35  ;;  %v3509_v35 = vld [vmem:[#allocation8 + $0x4cc] ss:$16 sps:$4 sm:$0xff]  }
 0x106   :  { %2171 = vmatprep.subr.bf16.mxu1 %v3425_v37 }
 0x107   :  { %2131 = vmatpush1.bf16.msra.mxu0 %v3420_v38  ;;  %v3557_v38 = vld [vmem:[#allocation10 + $0x64] ss:$8 sps:$4 sm:$0xff]  }
 0x108   :  { %2132 = vmatprep.subr.bf16.mxu0 %v3428_v39  ;;  %v3507_v39 = vld [vmem:[#allocation8 + $0x4c8] ss:$16 sps:$4 sm:$0xff]  }
 0x109   :  { %2172 = vmatpush1.bf16.msra.mxu1 %v3423_v41 }
 0x10a   :  { %2173 = vmatprep.subr.bf16.mxu1 %v3431_v42 }
 0x10b   :  { %2133 = vmatpush1.bf16.msra.mxu0 %v3426_v43  ;;  %v3512_v43 = vld [vmem:[#allocation8 + $0x4ac] ss:$16 sps:$4 sm:$0xff]  }
 0x10c   :  { %2134 = vmatprep.subr.bf16.mxu0 %v3434_v40  ;;  %v3555_v40 = vld [vmem:[#allocation10 + $0x60] ss:$8 sps:$4 sm:$0xff]  }
 0x10d   :  { %2174 = vmatpush1.bf16.msra.mxu1 %v3429_v44 }
 0x10e   :  { %2175 = vmatprep.subr.bf16.mxu1 %v3437_v45 }
 0x10f   :  { %2135 = vmatpush1.bf16.msra.mxu0 %v3432_v46  ;;  %v3510_v46 = vld [vmem:[#allocation8 + $0x4a8] ss:$16 sps:$4 sm:$0xff]  }
 0x110   :  { %2136 = vmatprep.subr.bf16.mxu0 %v3440_v24 }
 0x111   :  { %2176 = vmatpush1.bf16.msra.mxu1 %v3435_v47 }
 0x112   :  { %2177 = vmatprep.subr.bf16.mxu1 %v3443_v48  ;;  %v3558_v48 = vld [vmem:[#allocation10 + $0x50] ss:$8 sps:$4 sm:$0xff]  }
 0x113   :  { %2137 = vmatpush1.bf16.msra.mxu0 %v3438_v49 }
 0x114   :  { %2138 = vmatprep.subr.bf16.mxu0 %v3446_v51  ;;  %v3518_v51 = vld [vmem:[#allocation8 + $0x46c] ss:$16 sps:$4 sm:$0xff]  }
 0x115   :  { %2178 = vmatpush1.bf16.msra.mxu1 %v3441_v50  ;;  %v3513_v50 = vld [vmem:[#allocation8 + $0x488] ss:$16 sps:$4 sm:$0xff]  }
 0x116   :  { %2179 = vmatprep.subr.bf16.mxu1 %v3449_v53  ;;  %v3566_v53 = vld [vmem:[#allocation10 + $0x34] ss:$8 sps:$4 sm:$0xff]  }
 0x117   :  { %2139 = vmatpush1.bf16.msra.mxu0 %v3444_v52  ;;  %v3561_v52 = vld [vmem:[#allocation10 + $0x40] ss:$8 sps:$4 sm:$0xff]  }
 0x118   :  { %2140 = vmatprep.subr.bf16.mxu0 %v3452_v54  ;;  %v3516_v54 = vld [vmem:[#allocation8 + $0x468] ss:$16 sps:$4 sm:$0xff]  }
 0x119   :  { %2180 = vmatpush1.bf16.msra.mxu1 %v3447_v55  ;;  %v3521_v55 = vld [vmem:[#allocation8 + $0x44c] ss:$16 sps:$4 sm:$0xff]  }
 0x11a   :  { %2181 = vmatprep.subr.bf16.mxu1 %v3455_v56  ;;  %v3564_v56 = vld [vmem:[#allocation10 + $0x30] ss:$8 sps:$4 sm:$0xff]  }
 0x11b   :  { %2141 = vmatpush1.bf16.msra.mxu0 %v3450_v57  ;;  %v3569_v57 = vld [vmem:[#allocation10 + $0x24] ss:$8 sps:$4 sm:$0xff]  }
 0x11c   :  { %2142 = vmatprep.subr.bf16.mxu0 %v3458_v58  ;;  %v3519_v58 = vld [vmem:[#allocation8 + $0x448] ss:$16 sps:$4 sm:$0xff]  }
 0x11d   :  { %2182 = vmatpush1.bf16.msra.mxu1 %v3453_v59  ;;  %v3524_v59 = vld [vmem:[#allocation8 + $0x42c] ss:$16 sps:$4 sm:$0xff]  }
 0x11e   :  { %2183 = vmatprep.subr.bf16.mxu1 %v3461_v60  ;;  %v3567_v60 = vld [vmem:[#allocation10 + $0x20] ss:$8 sps:$4 sm:$0xff]  }
 0x11f   :  { %2143 = vmatpush2.bf16.msra.mxu0 %v3456_v61  ;;  %v3572_v61 = vld [vmem:[#allocation10 + $0x14] ss:$8 sps:$4 sm:$0xff]  }
 0x120   :  { %2144 = vmatprep.subr.bf16.mxu0 %v3464_v62  ;;  %v3522_v62 = vld [vmem:[#allocation8 + $0x428] ss:$16 sps:$4 sm:$0xff]  }
 0x121   :  { %2184 = vmatpush2.bf16.msra.mxu1 %v3459_v63  ;;  %v3527_v63 = vld [vmem:[#allocation8 + $0x40c] ss:$16 sps:$4 sm:$0xff]  }
 0x122   :  { %2185 = vmatprep.subr.bf16.mxu1 %v3467_v0  ;;  %v3570_v0 = vld [vmem:[#allocation10 + $0x10] ss:$8 sps:$4 sm:$0xff]  }
 0x123   :  { %2145 = vmatpush2.bf16.msra.mxu0 %v3462_v1  ;;  %v3575_v1 = vld [vmem:[#allocation10 + $0x4] ss:$8 sps:$4 sm:$0xff]  }
 0x124   :  { %2146 = vmatprep.subr.bf16.mxu0 %v3470_v2  ;;  %v3525_v2 = vld [vmem:[#allocation8 + $0x408] ss:$16 sps:$4 sm:$0xff]  }
 0x125   :  { %2186 = vmatpush2.bf16.msra.mxu1 %v3465_v3  ;;  %v3530_v3 = vld [vmem:[#allocation8 + $0x5ec] ss:$16 sps:$4 sm:$0xff]  }
 0x126   :  { %2187 = vmatprep.subr.bf16.mxu1 %v3473_v4  ;;  %v3573_v4 = vld [vmem:[#allocation10] ss:$8 sps:$4 sm:$0xff]  }
 0x127   :  { %2147 = vmatpush2.bf16.msra.mxu0 %v3468_v5  ;;  %v3578_v5 = vld [vmem:[#allocation10 + $0xf4] ss:$8 sps:$4 sm:$0xff]  }
 0x128   :  { %2148 = vmatprep.subr.bf16.mxu0 %v3476_v6  ;;  %v3528_v6 = vld [vmem:[#allocation8 + $0x5e8] ss:$16 sps:$4 sm:$0xff]  }
 0x129   :  { %2188 = vmatpush2.bf16.msra.mxu1 %v3471_v7  ;;  %v3533_v7 = vld [vmem:[#allocation8 + $0x5cc] ss:$16 sps:$4 sm:$0xff]  }
 0x12a   :  { %2189 = vmatprep.subr.bf16.mxu1 %v3479_v8  ;;  %v3576_v8 = vld [vmem:[#allocation10 + $0xf0] ss:$8 sps:$4 sm:$0xff]  }
 0x12b   :  { %2149 = vmatpush2.bf16.msra.mxu0 %v3474_v9  ;;  %v3581_v9 = vld [vmem:[#allocation10 + $0xe4] ss:$8 sps:$4 sm:$0xff]  }
 0x12c   :  { %2150 = vmatprep.subr.bf16.mxu0 %v3482_v10  ;;  %v3531_v10 = vld [vmem:[#allocation8 + $0x5c8] ss:$16 sps:$4 sm:$0xff]  }
 0x12d   :  { %2190 = vmatpush2.bf16.msra.mxu1 %v3477_v11  ;;  %v3536_v11 = vld [vmem:[#allocation8 + $0x5ac] ss:$16 sps:$4 sm:$0xff]  }
 0x12e   :  { %2191 = vmatprep.subr.bf16.mxu1 %v3485_v12  ;;  %v3579_v12 = vld [vmem:[#allocation10 + $0xe0] ss:$8 sps:$4 sm:$0xff]  }
 0x12f   :  { %2151 = vmatpush2.bf16.msra.mxu0 %v3480_v13  ;;  %v3584_v13 = vld [vmem:[#allocation10 + $0xd4] ss:$8 sps:$4 sm:$0xff]  }
 0x130   :  { %2152 = vmatprep.subr.bf16.mxu0 %v3488_v14  ;;  %v3534_v14 = vld [vmem:[#allocation8 + $0x5a8] ss:$16 sps:$4 sm:$0xff]  }
 0x131   :  { %2192 = vmatpush2.bf16.msra.mxu1 %v3483_v15  ;;  %v3539_v15 = vld [vmem:[#allocation8 + $0x58c] ss:$16 sps:$4 sm:$0xff]  }
 0x132   :  { %2193 = vmatprep.subr.bf16.mxu1 %v3491_v16  ;;  %v3582_v16 = vld [vmem:[#allocation10 + $0xd0] ss:$8 sps:$4 sm:$0xff]  }
 0x133   :  { %2153 = vmatpush2.bf16.msra.mxu0 %v3486_v17  ;;  %v3587_v17 = vld [vmem:[#allocation10 + $0xc4] ss:$8 sps:$4 sm:$0xff]  }
 0x134   :  { %2154 = vmatprep.subr.bf16.mxu0 %v3494_v19  ;;  %v3537_v19 = vld [vmem:[#allocation8 + $0x588] ss:$16 sps:$4 sm:$0xff]  }
 0x135   :  { %2194 = vmatpush2.bf16.msra.mxu1 %v3489_v20  ;;  %v3542_v20 = vld [vmem:[#allocation8 + $0x56c] ss:$16 sps:$4 sm:$0xff]  }
 0x136   :  { %2195 = vmatprep.subr.bf16.mxu1 %v3497_v21  ;;  %v216_v21 = vlaneseq }
 0x137   :  { %2155 = vmatpush2.bf16.msra.mxu0 %v3492_v22  ;;  %v3585_v22 = vld [vmem:[#allocation10 + $0xc0] ss:$8 sps:$4 sm:$0xff]  }
 0x138   :  { %2156 = vmatprep.subr.bf16.mxu0 %v3500_v23  ;;  %v3590_v23 = vld [vmem:[#allocation10 + $0xb4] ss:$8 sps:$4 sm:$0xff]  }
 0x139   :  { %2196 = vmatpush2.bf16.msra.mxu1 %v3495_v25  ;;  %v3540_v25 = vld [vmem:[#allocation8 + $0x568] ss:$16 sps:$4 sm:$0xff]  }
 0x13a   :  { %2197 = vmatprep.subr.bf16.mxu1 %v3503_v27  ;;  %v3545_v27 = vld [vmem:[#allocation8 + $0x54c] ss:$16 sps:$4 sm:$0xff]  }
 0x13b   :  { %2157 = vmatpush2.bf16.msra.mxu0 %v3498_v29  ;;  %v3877_v29 = vshrl.u32 %v216_v21, 7  ;;  %v3641_v21 = vld [vmem:[#allocation10 + $0x1a4] ss:$8 sps:$4 sm:$0xff]  }
 0x13c   :  { %2208 = vmatprep.subr.bf16.mxu0 %v3506_v31  ;;  %v3588_v31 = vld [vmem:[#allocation10 + $0xb0] ss:$8 sps:$4 sm:$0xff]  }
 0x13d   :  { %2198 = vmatpush2.bf16.msra.mxu1 %v3501_v32  ;;  %v3593_v32 = vld [vmem:[#allocation10 + $0xa4] ss:$8 sps:$4 sm:$0xff]  }
 0x13e   :  { %v3866_v37 = vpop.f32.mrf.mxu0  ;;  %2159 = vmatmul.mubr.bf16.vlgmr.msra.gmra.mxu0 %v3849_v18  ;;  %2653 = vmatprep.subr.bf16.mxu1 %v3554_v33  ;;  %v3560_v18 = vld [vmem:[#allocation10 + $0x54] ss:$8 sps:$4 sm:$0xff]   ;;  %v3543_v33 = vld [vmem:[#allocation8 + $0x548] ss:$16 sps:$4 sm:$0xff]  }
 0x13f   :  { %2209 = vmatpush1.bf16.msra.mxu0 %v3504_v34  ;;  %2240 = vmatprep.mubr.bf16.mxu0 %v3855_v28  ;;  %v3872_v42 = vpop.f32.mrf.mxu1  ;;  %v3515_v28 = vld [vmem:[#allocation8 + $0x48c] ss:$16 sps:$4 sm:$0xff]  }
 0x140   :  { %v3870_v41 = vpop.f32.mrf.mxu0  ;;  %2200 = vmatmul.mubr.bf16.vlgmr.msra.gmra.mxu1 %v3858_v26  ;;  %2210 = vmatprep.subr.bf16.mxu0 %v3509_v35  ;;  %v3563_v26 = vld [vmem:[#allocation10 + $0x44] ss:$8 sps:$4 sm:$0xff]   ;;  %v3880_v35 = vsub.s32 0, %v3877_v29 }
 0x141   :  { %2654 = vmatpush1.bf16.msra.mxu1 %v3552_v36  ;;  %v3875_v45 = vpop.f32.mrf.mxu1  ;;  %v3548_v34 = vld [vmem:[#allocation8 + $0x52c] ss:$16 sps:$4 sm:$0xff]   ;;  %v3591_v36 = vld [vmem:[#allocation10 + $0xa0] ss:$8 sps:$4 sm:$0xff]  }
 0x142   :  { %v744_v44 = vpop.f32.mrf.mxu0  ;;  %2655 = vmatprep.subr.bf16.mxu1 %v3557_v38  ;;  %v214_v38 = vld [vmem:[%s3919_s3] sm:$0x3] }
 0x143   :  { %2211 = vmatpush1.bf16.msra.mxu0 %v3507_v39  ;;  %v785_v47 = vpop.f32.mrf.mxu1  ;;  %v3596_v39 = vld [vmem:[#allocation10 + $0x94] ss:$8 sps:$4 sm:$0xff]  }
 0x144   :  { %v745_v24 = vpop.f32.mrf.mxu0  ;;  %2212 = vmatprep.subr.bf16.mxu0 %v3512_v43  ;;  %v3886_v43 = vsub.s32 1, %v3877_v29  ;;  %v3551_v44 = vld [vmem:[#allocation8 + $0x50c] ss:$16 sps:$4 sm:$0xff]   ;;  %v3549_v47 = vld [vmem:[#allocation8 + $0x508] ss:$16 sps:$4 sm:$0xff]  }
 0x145   :  { %2656 = vmatpush1.bf16.msra.mxu1 %v3555_v40  ;;  %v786_v49 = vpop.f32.mrf.mxu1  ;;  %v3546_v40 = vld [vmem:[#allocation8 + $0x528] ss:$16 sps:$4 sm:$0xff]   ;;  %v3599_v24 = vld [vmem:[#allocation10 + $0x84] ss:$8 sps:$4 sm:$0xff]  }
 0x146   :  { %2657 = vmatprep.subr.bf16.mxu1 %v3560_v18  ;;  %v219_v18 = vrot.slane %v214_v38, %v3880_v35  ;;  %v3597_v49 = vld [vmem:[#allocation10 + $0x80] ss:$8 sps:$4 sm:$0xff]  }
 0x147   :  { %2213 = vmatpush1.bf16.msra.mxu0 %v3510_v46  ;;  %v3594_v46 = vld [vmem:[#allocation10 + $0x90] ss:$8 sps:$4 sm:$0xff]  }
 0x148   :  { %2214 = vmatprep.subr.bf16.mxu0 %v3515_v28  ;;  %v223_v28 = vrot.slane %v214_v38, %v3886_v43 }
 0x149   :  { %2658 = vmatpush1.bf16.msra.mxu1 %v3558_v48  ;;  %v741_v48 = vadd.f32 %v3866_v37, %v219_v18 }
 0x14a   :  { %2659 = vmatprep.subr.bf16.mxu1 %v3563_v26  ;;  %v743_v26 = vadd.f32 %v3870_v41, %v223_v28 }
 0x14b   :  { %2215 = vmatpush1.bf16.msra.mxu0 %v3513_v50  ;;  %v782_v50 = vadd.f32 %v3872_v42, %v741_v48  ;;  %v3602_v42 = vld [vmem:[#allocation10 + $0x174] ss:$8 sps:$4 sm:$0xff]  }
 0x14c   :  { %2216 = vmatprep.subr.bf16.mxu0 %v3518_v51 }
 0x14d   :  { %2660 = vmatpush1.bf16.msra.mxu1 %v3561_v52  ;;  %v784_v52 = vadd.f32 %v3875_v45, %v743_v26  ;;  %v3608_v45 = vld [vmem:[#allocation10 + $0x154] ss:$8 sps:$4 sm:$0xff]  }
 0x14e   :  { %2661 = vmatprep.subr.bf16.mxu1 %v3566_v53 }
 0x14f   :  { %2217 = vmatpush1.bf16.msra.mxu0 %v3516_v54 }
 0x150   :  { %2218 = vmatprep.subr.bf16.mxu0 %v3521_v55 }
 0x151   :  { %2662 = vmatpush1.bf16.msra.mxu1 %v3564_v56 }
 0x152   :  { %2663 = vmatprep.subr.bf16.mxu1 %v3569_v57 }
 0x153   :  { %2219 = vmatpush1.bf16.msra.mxu0 %v3519_v58 }
 0x154   :  { %2220 = vmatprep.subr.bf16.mxu0 %v3524_v59  ;;  %v3600_v59 = vld [vmem:[#allocation10 + $0x170] ss:$8 sps:$4 sm:$0xff]  }
 0x155   :  { %2664 = vmatpush1.bf16.msra.mxu1 %v3567_v60  ;;  %v3605_v60 = vld [vmem:[#allocation10 + $0x164] ss:$8 sps:$4 sm:$0xff]  }
 0x156   :  { %2665 = vmatprep.subr.bf16.mxu1 %v3572_v61 }
 0x157   :  { %2221 = vmatpush1.bf16.msra.mxu0 %v3522_v62  ;;  %v3606_v62 = vld [vmem:[#allocation10 + $0x150] ss:$8 sps:$4 sm:$0xff]  }
 0x158   :  { %2222 = vmatprep.subr.bf16.mxu0 %v3527_v63  ;;  %v3611_v63 = vld [vmem:[#allocation10 + $0x144] ss:$8 sps:$4 sm:$0xff]  }
 0x159   :  { %2666 = vmatpush1.bf16.msra.mxu1 %v3570_v0  ;;  %v3609_v0 = vld [vmem:[#allocation10 + $0x140] ss:$8 sps:$4 sm:$0xff]  }
 0x15a   :  { %2667 = vmatprep.subr.bf16.mxu1 %v3575_v1  ;;  %v3614_v1 = vld [vmem:[#allocation10 + $0x134] ss:$8 sps:$4 sm:$0xff]  }
 0x15b   :  { %2223 = vmatpush1.bf16.msra.mxu0 %v3525_v2  ;;  %v3612_v2 = vld [vmem:[#allocation10 + $0x130] ss:$8 sps:$4 sm:$0xff]  }
 0x15c   :  { %2224 = vmatprep.subr.bf16.mxu0 %v3530_v3  ;;  %v3617_v3 = vld [vmem:[#allocation10 + $0x124] ss:$8 sps:$4 sm:$0xff]  }
 0x15d   :  { %2668 = vmatpush1.bf16.msra.mxu1 %v3573_v4  ;;  %v3615_v4 = vld [vmem:[#allocation10 + $0x120] ss:$8 sps:$4 sm:$0xff]  }
 0x15e   :  { %2669 = vmatprep.subr.bf16.mxu1 %v3578_v5  ;;  %v3620_v5 = vld [vmem:[#allocation10 + $0x114] ss:$8 sps:$4 sm:$0xff]  }
 0x15f   :  { %2225 = vmatpush2.bf16.msra.mxu0 %v3528_v6  ;;  %v3618_v6 = vld [vmem:[#allocation10 + $0x110] ss:$8 sps:$4 sm:$0xff]  }
 0x160   :  { %2226 = vmatprep.subr.bf16.mxu0 %v3533_v7  ;;  %v3623_v7 = vld [vmem:[#allocation10 + $0x104] ss:$8 sps:$4 sm:$0xff]  }
 0x161   :  { %2670 = vmatpush2.bf16.msra.mxu1 %v3576_v8  ;;  %v3621_v8 = vld [vmem:[#allocation10 + $0x100] ss:$8 sps:$4 sm:$0xff]  }
 0x162   :  { %2671 = vmatprep.subr.bf16.mxu1 %v3581_v9  ;;  %v3626_v9 = vld [vmem:[#allocation10 + $0x1f4] ss:$8 sps:$4 sm:$0xff]  }
 0x163   :  { %2227 = vmatpush2.bf16.msra.mxu0 %v3531_v10  ;;  %v3624_v10 = vld [vmem:[#allocation10 + $0x1f0] ss:$8 sps:$4 sm:$0xff]  }
 0x164   :  { %2228 = vmatprep.subr.bf16.mxu0 %v3536_v11  ;;  %v3629_v11 = vld [vmem:[#allocation10 + $0x1e4] ss:$8 sps:$4 sm:$0xff]  }
 0x165   :  { %2672 = vmatpush2.bf16.msra.mxu1 %v3579_v12  ;;  %v3627_v12 = vld [vmem:[#allocation10 + $0x1e0] ss:$8 sps:$4 sm:$0xff]  }
 0x166   :  { %2673 = vmatprep.subr.bf16.mxu1 %v3584_v13  ;;  %v3632_v13 = vld [vmem:[#allocation10 + $0x1d4] ss:$8 sps:$4 sm:$0xff]  }
 0x167   :  { %2229 = vmatpush2.bf16.msra.mxu0 %v3534_v14  ;;  %v3630_v14 = vld [vmem:[#allocation10 + $0x1d0] ss:$8 sps:$4 sm:$0xff]  }
 0x168   :  { %2230 = vmatprep.subr.bf16.mxu0 %v3539_v15  ;;  %v3635_v15 = vld [vmem:[#allocation10 + $0x1c4] ss:$8 sps:$4 sm:$0xff]  }
 0x169   :  { %2674 = vmatpush2.bf16.msra.mxu1 %v3582_v16  ;;  %v3633_v16 = vld [vmem:[#allocation10 + $0x1c0] ss:$8 sps:$4 sm:$0xff]  }
 0x16a   :  { %2675 = vmatprep.subr.bf16.mxu1 %v3587_v17  ;;  %v3638_v17 = vld [vmem:[#allocation10 + $0x1b4] ss:$8 sps:$4 sm:$0xff]  }
 0x16b   :  { %2231 = vmatpush2.bf16.msra.mxu0 %v3537_v19  ;;  %v3636_v19 = vld [vmem:[#allocation10 + $0x1b0] ss:$8 sps:$4 sm:$0xff]  }
 0x16c   :  { %2232 = vmatprep.subr.bf16.mxu0 %v3542_v20  ;;  %v1021_v20 = vld [vmem:[%s3921_s5] sm:$0xf] }
 0x16d   :  { %2676 = vmatpush2.bf16.msra.mxu1 %v3585_v22  ;;  %v1026_v22 = vrot.slane %v1021_v20, %v3880_v35 }
 0x16e   :  { %2677 = vmatprep.subr.bf16.mxu1 %v3590_v23  ;;  %v3639_v23 = vld [vmem:[#allocation10 + $0x1a0] ss:$8 sps:$4 sm:$0xff]  }
 0x16f   :  { %2233 = vmatpush2.bf16.msra.mxu0 %v3540_v25  ;;  %v1030_v25 = vrot.slane %v1021_v20, %v3886_v43 }
 0x170   :  { %2234 = vmatprep.subr.bf16.mxu0 %v3545_v27 }
 0x171   :  { %2678 = vmatpush2.bf16.msra.mxu1 %v3588_v31 }
 0x172   :  { %2679 = vmatprep.subr.bf16.mxu1 %v3593_v32 }
 0x173   :  { %2235 = vmatpush2.bf16.msra.mxu0 %v3543_v33  ;;  %v3644_v33 = vld [vmem:[#allocation10 + $0x194] ss:$8 sps:$4 sm:$0xff]  }
 0x174   :  { %2236 = vmatprep.subr.bf16.mxu0 %v3548_v34 }
 0x175   :  { %2680 = vmatpush2.bf16.msra.mxu1 %v3591_v36  ;;  %v3642_v36 = vld [vmem:[#allocation10 + $0x190] ss:$8 sps:$4 sm:$0xff]  }
 0x176   :  { %2681 = vmatprep.subr.bf16.mxu1 %v3596_v39 }
 0x177   :  { %2237 = vmatpush2.bf16.msra.mxu0 %v3546_v40 }
 0x178   :  { %2238 = vmatprep.subr.bf16.mxu0 %v3551_v44 }
 0x179   :  { %2682 = vmatpush2.bf16.msra.mxu1 %v3594_v46 }
 0x17a   :  { %2683 = vmatprep.subr.bf16.mxu1 %v3599_v24  ;;  %v3647_v24 = vld [vmem:[#allocation10 + $0x184] ss:$8 sps:$4 sm:$0xff]  }
 0x17b   :  { %2239 = vmatpush2.bf16.msra.mxu0 %v3549_v47  ;;  %v3645_v47 = vld [vmem:[#allocation10 + $0x180] ss:$8 sps:$4 sm:$0xff]  }
 0x17c   :  { %2694 = vmatprep.subr.bf16.mxu0 %v3602_v42  ;;  %v1033_v42 = vsub.s32 2, %v3877_v29 }
 0x17d   :  { %2684 = vmatpush2.bf16.msra.mxu1 %v3597_v49 }
 0x17e   :  { %v822_v51 = vpop.f32.mrf.mxu0  ;;  %2241 = vmatmul.mubr.bf16.vlgmr.msra.gmra.mxu0 %v3860_v30  ;;  %v3603_v30 = vld [vmem:[#allocation10 + $0x160] ss:$8 sps:$4 sm:$0xff]  }
 0x17f   :  { %v823_v53 = vadd.f32 %v822_v51, %v782_v50  ;;  %v3895_v55 = vpop.f32.mrf.mxu1  ;;  %2695 = vmatpush1.bf16.msra.mxu0 %v3600_v59 }
 0x180   :  { %v824_v54 = vpop.f32.mrf.mxu0  ;;  %2696 = vmatprep.subr.bf16.mxu0 %v3605_v60  ;;  %v2038_v27 = vadd.f32 %v3895_v55, %v1026_v22  ;;  %v1037_v60 = vsub.s32 3, %v3877_v29 }
 0x181   :  { %2737 = vst [vmem:[#allocation11] sm:$0xff] %v823_v53  ;;  %v825_v37 = vadd.f32 %v824_v54, %v784_v52  ;;  %v3897_v57 = vpop.f32.mrf.mxu1 }
 0x182   :  { %v826_v56 = vpop.f32.mrf.mxu0  ;;  %v2040_v31 = vadd.f32 %v3897_v57, %v1030_v25 }
 0x183   :  { %2738 = vst [vmem:[#allocation11 + $0x8] sm:$0xff] %v825_v37  ;;  %v2041_v58 = vpop.f32.mrf.mxu1  ;;  %2697 = vmatpush1.bf16.msra.mxu0 %v3603_v30  ;;  %v1038_v30 = vrot.slane %v1021_v20, %v1037_v60 }
 0x184   :  { %v827_v41 = vpop.f32.mrf.mxu0  ;;  %2698 = vmatprep.subr.bf16.mxu0 %v3608_v45 }
 0x185   :  { %v2042_v61 = vpop.f32.mrf.mxu1 }
 0x186   :  { %v1034_v61 = vrot.slane %v1021_v20, %v1033_v42 }
 0x187   :  { %2699 = vmatpush1.bf16.msra.mxu0 %v3606_v62 }
 0x188   :  { %2700 = vmatprep.subr.bf16.mxu0 %v3611_v63 }
 0x18b   :  { %2701 = vmatpush1.bf16.msra.mxu0 %v3609_v0 }
 0x18c   :  { %2702 = vmatprep.subr.bf16.mxu0 %v3614_v1 }
 0x18f   :  { %2703 = vmatpush1.bf16.msra.mxu0 %v3612_v2 }
 0x190   :  { %2704 = vmatprep.subr.bf16.mxu0 %v3617_v3 }
 0x193   :  { %2705 = vmatpush1.bf16.msra.mxu0 %v3615_v4 }
 0x194   :  { %2706 = vmatprep.subr.bf16.mxu0 %v3620_v5 }
 0x197   :  { %2707 = vmatpush1.bf16.msra.mxu0 %v3618_v6 }
 0x198   :  { %2708 = vmatprep.subr.bf16.mxu0 %v3623_v7 }
 0x19b   :  { %2709 = vmatpush1.bf16.msra.mxu0 %v3621_v8 }
 0x19c   :  { %2710 = vmatprep.subr.bf16.mxu0 %v3626_v9 }
 0x19f   :  { %2711 = vmatpush2.bf16.msra.mxu0 %v3624_v10 }
 0x1a0   :  { %2712 = vmatprep.subr.bf16.mxu0 %v3629_v11 }
 0x1a3   :  { %2713 = vmatpush2.bf16.msra.mxu0 %v3627_v12 }
 0x1a4   :  { %2714 = vmatprep.subr.bf16.mxu0 %v3632_v13 }
 0x1a7   :  { %2715 = vmatpush2.bf16.msra.mxu0 %v3630_v14  ;;  %v2321_v14 = vld [vmem:[%s3923_s7] sm:$0x3]  ;;  %s3748_s7 = scalar_lea.vmem %s2748_s12, 512 }
 0x1a8   :  { %2716 = vmatprep.subr.bf16.mxu0 %v3635_v15  ;;  %v2326_v15 = vrot.slane %v2321_v14, %v3880_v35  ;;  %p3749_p11 = scmp.ne.s32.totalorder %s2748_s12, %s3748_s7  ;;  %p3754_p13 = scmp.lt.s32.totalorder %s3748_s7, %s3748_s7 }
 0x1aa   :  { %p3755_p0 = por %p3754_p13, %p3753_p12 }
 0x1ab   :  { %2717 = vmatpush2.bf16.msra.mxu0 %v3633_v16  ;;  %v2330_v16 = vrot.slane %v2321_v14, %v3886_v43 }
 0x1ac   :  { %2718 = vmatprep.subr.bf16.mxu0 %v3638_v17  ;;  %p3756_p1 = pnand %p3755_p0, %p3749_p11 }
 0x1af   :  { %2719 = vmatpush2.bf16.msra.mxu0 %v3636_v19 }
 0x1b0   :  { %2720 = vmatprep.subr.bf16.mxu0 %v3641_v21 }
 0x1b3   :  { %2721 = vmatpush2.bf16.msra.mxu0 %v3639_v23 }
 0x1b4   :  { %2722 = vmatprep.subr.bf16.mxu0 %v3644_v33 }
 0x1b7   :  { %2723 = vmatpush2.bf16.msra.mxu0 %v3642_v36 }
 0x1b8   :  { %2724 = vmatprep.subr.bf16.mxu0 %v3647_v24 }
 0x1bb   :  { %2725 = vmatpush2.bf16.msra.mxu0 %v3645_v47 }
 0x1be   :  { %v2078_v32 = vpop.f32.mrf.mxu0 }
 0x1bf   :  { %v2079_v34 = vadd.f32 %v2078_v32, %v2038_v27 }
 0x1c0   :  { %v2080_v38 = vpop.f32.mrf.mxu0  ;;  %v2119_v39 = vpop.f32.mrf.mxu1 }
 0x1c1   :  { %v2081_v40 = vadd.f32 %v2080_v38, %v2040_v31  ;;  %v2120_v44 = vadd.f32 %v2119_v39, %v2079_v34 }
 0x1c2   :  { %v2082_v18 = vpop.f32.mrf.mxu0  ;;  %v2121_v46 = vpop.f32.mrf.mxu1 }
 0x1c3   :  { %v2122_v28 = vadd.f32 %v2121_v46, %v2081_v40  ;;  %v2249_v48 = vmax.f32 %v2120_v44, 0.0 }
 0x1c4   :  { %v2083_v49 = vpop.f32.mrf.mxu0  ;;  %v2123_v26 = vpop.f32.mrf.mxu1 }
 0x1c5   :  { %v2250_v50 = vmax.f32 %v2122_v28, 0.0  ;;  %v2253_v53 = vpack.c.bf16 %v2249_v48, %v2249_v48 }
 0x1c6   :  { %v2124_v51 = vpop.f32.mrf.mxu1 }
 0x1c7   :  { %v2254_v52 = vpack.c.bf16 %v2250_v50, %v2250_v50 }
 0x1c9   :  { %2685 = vmatprep.mubr.bf16.mxu1 %v2254_v52 }
 0x1ca   :  { %2686 = vmatmul.mubr.bf16.vlgmr.msra.gmra.mxu1 %v2253_v53 }
 0x1fe   :  { %v2160_v54 = vpop.f32.mrf.mxu0 }
 0x1ff   :  { %v2161_v45 = vadd.f32 %v2160_v54, %v1034_v61 }
 0x200   :  { %v2162_v55 = vpop.f32.mrf.mxu0  ;;  %v2201_v37 = vpop.f32.mrf.mxu1 }
 0x201   :  { %v2163_v62 = vadd.f32 %v2162_v55, %v1038_v30  ;;  %v2202_v63 = vadd.f32 %v2201_v37, %v2161_v45 }
 0x202   :  { %v2164_v56 = vpop.f32.mrf.mxu0  ;;  %v2203_v57 = vpop.f32.mrf.mxu1 }
 0x203   :  { %v2204_v1 = vadd.f32 %v2203_v57, %v2163_v62 }
 0x204   :  { %v2165_v41 = vpop.f32.mrf.mxu0  ;;  %v2205_v58 = vpop.f32.mrf.mxu1 }
 0x206   :  { %v2206_v59 = vpop.f32.mrf.mxu1 }
 0x23e   :  { %v2242_v0 = vpop.f32.mrf.mxu0 }
 0x23f   :  { %v2243_v2 = vadd.f32 %v2242_v0, %v2202_v63 }
 0x240   :  { %v2244_v3 = vpop.f32.mrf.mxu0 }
 0x241   :  { %v2245_v4 = vadd.f32 %v2244_v3, %v2204_v1  ;;  %v2251_v5 = vmax.f32 %v2243_v2, 0.0 }
 0x242   :  { %v2246_v6 = vpop.f32.mrf.mxu0 }
 0x243   :  { %v2252_v7 = vmax.f32 %v2245_v4, 0.0  ;;  %v2255_v10 = vpack.c.bf16 %v2251_v5, %v2251_v5 }
 0x244   :  { %v2247_v8 = vpop.f32.mrf.mxu0 }
 0x245   :  { %v2256_v9 = vpack.c.bf16 %v2252_v7, %v2252_v7 }
 0x247   :  { %2726 = vmatprep.mubr.bf16.mxu0 %v2256_v9 }
 0x248   :  { %2727 = vmatmul.mubr.bf16.vlgmr.msra.gmra.mxu0 %v2255_v10 }
 0x28a   :  { %v2687_v11 = vpop.f32.mrf.mxu1 }
 0x28b   :  { %v2688_v17 = vadd.f32 %v2687_v11, %v2326_v15 }
 0x28c   :  { %v2689_v29 = vpop.f32.mrf.mxu1 }
 0x28d   :  { %v2690_v20 = vadd.f32 %v2689_v29, %v2330_v16 }
 0x28e   :  { %v2691_v12 = vpop.f32.mrf.mxu1 }
 0x290   :  { %v2692_v13 = vpop.f32.mrf.mxu1 }
 0x308   :  { %v2728_v19 = vpop.f32.mrf.mxu0 }
 0x309   :  { %v2729_v21 = vadd.f32 %v2728_v19, %v2688_v17 }
 0x30a   :  { %v2730_v22 = vpop.f32.mrf.mxu0 }
 0x30b   :  { %v2735_v23 = vmax.f32 %v2729_v21, 0.0  ;;  %v2731_v25 = vadd.f32 %v2730_v22, %v2690_v20 }
 0x30c   :  { %v2732_v27 = vpop.f32.mrf.mxu0 }
 0x30d   :  { %2739 = vst [vmem:[#allocation11 + $0x10] sm:$0xff] %v2735_v23  ;;  %v2736_v31 = vmax.f32 %v2731_v25, 0.0 }
 0x30e   :  { %v2733_v32 = vpop.f32.mrf.mxu0 }
 0x30f   :  { %2740 = vst [vmem:[#allocation11 + $0x18] sm:$0xff] %v2736_v31 }
 0x310   :  { %3759 = shalt.err (!%p3756_p1)
}
 0x311   :  { %2750 = dma.vmem_to_hbm [thread:$0]  %s2748_s12, 512, %s3924_s8, [#allocation4]  }
 0x312   :  { %3774 = dma.done.wait [#allocation4], 512  }
 0x313   :  { %3775 = vsyncadd [#allocation4], 4294966784 }
 0x314   :  { %2754 = vsyncpa [#allocation3], 1 }
 0x315   :  { %2755 = vsyncpa [#allocation6], 1 }
 0x316   :  { %2756 = vsyncpa [#allocation9], 1 }
 0x317   :  { %2757 = vsyncpa [#allocation4], 1 }

// kernel: _llm_embedding.1
= control target key start
LH: loop header
LB: loop body
LE: loop exit
PB: predicated region body
PF: predicated region fallthrough
CT: control target
= control target key end

     0   :  { %13 = vsyncpa [#allocation3], 0  ;;  %s3916_s0 = inlined_call_operand.hbm [shape: f32[8,768], index: 0, kind: input, shape index: {}]   ;;  %s3917_s1 = inlined_call_operand.hbm [shape: f32[8,768], index: 1, kind: input, shape index: {}]   ;;  %s3918_s2 = inlined_call_operand.hbm [shape: bf16[768,256], index: 2, kind: input, shape index: {}]   ;;  %s3919_s3 = inlined_call_operand.vmem [shape: f32[1,256], index: 3, kind: input, shape index: {}]   ;;  %s3920_s4 = inlined_call_operand.hbm [shape: bf16[768,512], index: 4, kind: input, shape index: {}]   ;;  %s3921_s5 = inlined_call_operand.vmem [shape: f32[1,512], index: 5, kind: input, shape index: {}]   ;;  %s3922_s6 = inlined_call_operand.hbm [shape: bf16[512,256], index: 6, kind: input, shape index: {}]   ;;  %s3923_s7 = inlined_call_operand.vmem [shape: f32[1,256], index: 7, kind: input, shape index: {}]   ;;  %s3924_s8 = inlined_call_operand.hbm [shape: f32[8,512], index: 8, kind: output, shape index: {}]  }
   0x1   :  { %14 = vsyncpa [#allocation6], 0 }
   0x2   :  { %15 = vsyncpa [#allocation9], 0 }
   0x3   :  { %16 = vsyncpa [#allocation4], 0  ;;  %s3776_s27 = smov [#allocation5]   ;;  %s3777_s29 = smov [#allocation8]  }
   0x4   :  { %s33_s28 = sshll.u32 %s3776_s27, 4  ;;  %s56_s30 = sshll.u32 %s3777_s29, 4  ;;  %s34_s28 = int_to_ptr.vmem [resolvable:$true] %s33_s28  ;;  %s57_s30 = int_to_ptr.vmem [resolvable:$true] %s56_s30 }
   0x5   :  { %s3656_s9 = scalar_lea.vmem %s34_s28, 768  ;;  %p3661_p1 = scmp.lt.s32.totalorder %s34_s28, %s34_s28 }
   0x6   :  { %p3657_p0 = scmp.ne.s32.totalorder %s34_s28, %s3656_s9  ;;  %p3662_p2 = scmp.lt.s32.totalorder %s3656_s9, %s3656_s9 }
   0x8   :  { %p3663_p3 = por %p3662_p2, %p3661_p1 }
   0xa   :  { %p3664_p4 = pnand %p3663_p3, %p3657_p0 }
   0xc   :  { %3667 = shalt.err (!%p3664_p4)
}
   0xd   :  { %36 = dma.hbm_to_vmem [thread:$0]  %s3917_s1, 768, %s34_s28, [#allocation6]  }
   0xe   :  { %s3676_s12 = scalar_lea.vmem %s57_s30, 24576  ;;  %p3681_p6 = scmp.lt.s32.totalorder %s57_s30, %s57_s30 }
   0xf   :  { %p3677_p5 = scmp.ne.s32.totalorder %s57_s30, %s3676_s12  ;;  %p3682_p7 = scmp.lt.s32.totalorder %s3676_s12, %s3676_s12 }
  0x11   :  { %p3683_p8 = por %p3682_p7, %p3681_p6 }
  0x13   :  { %p3684_p9 = pnand %p3683_p8, %p3677_p5 }
  0x15   :  { %3687 = shalt.err (!%p3684_p9)
}
  0x16   :  { %s3778_s13 = smov 256   ;;  %s3779_s14 = smov 16  }
  0x17   :  { %62 = dma.hbm_to_vmem [thread:$0]  %s3920_s4, 24576, %s57_s30, [#allocation9], %s3778_s13, %s3778_s13, %s3779_s14  }
  0x18   :  { %s3780_s17 = smov [#allocation2]   ;;  %s3781_s19 = smov [#allocation7]  }
  0x19   :  { %s23_s18 = sshll.u32 %s3780_s17, 4  ;;  %s42_s20 = sshll.u32 %s3781_s19, 4  ;;  %s24_s18 = int_to_ptr.vmem [resolvable:$true] %s23_s18  ;;  %s43_s20 = int_to_ptr.vmem [resolvable:$true] %s42_s20 }
  0x1a   :  { %s3696_s1 = scalar_lea.vmem %s24_s18, 768  ;;  %p3701_p11 = scmp.lt.s32.totalorder %s24_s18, %s24_s18 }
  0x1b   :  { %p3697_p10 = scmp.ne.s32.totalorder %s24_s18, %s3696_s1  ;;  %p3702_p12 = scmp.lt.s32.totalorder %s3696_s1, %s3696_s1 }
  0x1d   :  { %p3703_p13 = por %p3702_p12, %p3701_p11 }
  0x1f   :  { %p3704_p0 = pnand %p3703_p13, %p3697_p10 }
  0x21   :  { %3707 = shalt.err (!%p3704_p0)
}
  0x22   :  { %26 = dma.hbm_to_vmem [thread:$0]  %s3916_s0, 768, %s24_s18, [#allocation3]  }
  0x23   :  { %s3716_s23 = scalar_lea.vmem %s43_s20, 12288  ;;  %p3721_p2 = scmp.lt.s32.totalorder %s43_s20, %s43_s20 }
  0x24   :  { %p3717_p1 = scmp.ne.s32.totalorder %s43_s20, %s3716_s23  ;;  %p3722_p3 = scmp.lt.s32.totalorder %s3716_s23, %s3716_s23 }
  0x26   :  { %p3723_p4 = por %p3722_p3, %p3721_p2 }
  0x28   :  { %p3724_p5 = pnand %p3723_p4, %p3717_p1 }
  0x2a   :  { %3727 = shalt.err (!%p3724_p5)
}
  0x2b   :  { %s3782_s4 = smov 128   ;;  %s3783_s24 = smov 8  }
  0x2c   :  { %48 = dma.hbm_to_vmem [thread:$0]  %s3918_s2, 12288, %s43_s20, [#allocation6], %s3782_s4, %s3782_s4, %s3783_s24  }
  0x2d   :  { %s3784_s27 = smov [#allocation10]  }
  0x2e   :  { %s70_s28 = sshll.u32 %s3784_s27, 4  ;;  %s71_s28 = int_to_ptr.vmem [resolvable:$true] %s70_s28 }
  0x2f   :  { %s3736_s29 = scalar_lea.vmem %s71_s28, 8192  ;;  %p3741_p7 = scmp.lt.s32.totalorder %s71_s28, %s71_s28 }
  0x30   :  { %p3737_p6 = scmp.ne.s32.totalorder %s71_s28, %s3736_s29  ;;  %p3742_p8 = scmp.lt.s32.totalorder %s3736_s29, %s3736_s29 }
  0x32   :  { %p3743_p9 = por %p3742_p8, %p3741_p7 }
  0x34   :  { %p3744_p10 = pnand %p3743_p9, %p3737_p6 }
  0x36   :  { %3747 = shalt.err (!%p3744_p10)
}
  0x37   :  { %76 = dma.hbm_to_vmem [thread:$0]  %s3922_s6, 8192, %s71_s28, [#allocation9], %s3782_s4, %s3782_s4, %s3783_s24  }
  0x38   :  { %3768 = dma.done.wait [#allocation3], 768  }
  0x39   :  { %3769 = vsyncadd [#allocation3], 4294966528 }
  0x3a   :  { %3770 = dma.done.wait [#allocation6], 13056  }
  0x3b   :  { %3771 = vsyncadd [#allocation6], 4294954240 }
  0x3c   :  { %3772 = dma.done.wait [#allocation9], 32768  }
  0x3d   :  { %3773 = vsyncadd [#allocation9], 4294934528  ;;  %v3120_v0 = vld [vmem:[#allocation7 + $0x74] ss:$8 sps:$4 sm:$0xff]   ;;  %v3122_v1 = vld [vmem:[#allocation7 + $0x70] ss:$8 sps:$4 sm:$0xff]  }
  0x3e   :  { %706 = vmatprep.subr.bf16.mxu0 %v3120_v0  ;;  %v3123_v2 = vld [vmem:[#allocation7 + $0x174] ss:$8 sps:$4 sm:$0xff]   ;;  %v3125_v3 = vld [vmem:[#allocation7 + $0x170] ss:$8 sps:$4 sm:$0xff]   ;;  %v3126_v4 = vld [vmem:[#allocation7 + $0x64] ss:$8 sps:$4 sm:$0xff]  }
  0x3f   :  { %707 = vmatpush1.bf16.msra.mxu0 %v3122_v1  ;;  %v3128_v5 = vld [vmem:[#allocation7 + $0x60] ss:$8 sps:$4 sm:$0xff]   ;;  %747 = vmatprep.subr.bf16.mxu1 %v3123_v2  ;;  %v3129_v6 = vld [vmem:[#allocation7 + $0x164] ss:$8 sps:$4 sm:$0xff]   ;;  %v3132_v8 = vld [vmem:[#allocation7 + $0x54] ss:$8 sps:$4 sm:$0xff]  }
  0x40   :  { %748 = vmatpush1.bf16.msra.mxu1 %v3125_v3  ;;  %708 = vmatprep.subr.bf16.mxu0 %v3126_v4  ;;  %v3131_v7 = vld [vmem:[#allocation7 + $0x160] ss:$8 sps:$4 sm:$0xff]   ;;  %v3134_v9 = vld [vmem:[#allocation7 + $0x50] ss:$8 sps:$4 sm:$0xff]   ;;  %v3135_v10 = vld [vmem:[#allocation7 + $0x154] ss:$8 sps:$4 sm:$0xff]  }
  0x41   :  { %749 = vmatprep.subr.bf16.mxu1 %v3129_v6  ;;  %v3138_v11 = vld [vmem:[#allocation7 + $0x44] ss:$8 sps:$4 sm:$0xff]   ;;  %v3137_v12 = vld [vmem:[#allocation7 + $0x150] ss:$8 sps:$4 sm:$0xff]   ;;  %v3140_v14 = vld [vmem:[#allocation7 + $0x40] ss:$8 sps:$4 sm:$0xff]  }
  0x42   :  { %v3141_v13 = vld [vmem:[#allocation7 + $0x144] ss:$8 sps:$4 sm:$0xff]   ;;  %v3144_v15 = vld [vmem:[#allocation7 + $0x34] ss:$8 sps:$4 sm:$0xff]   ;;  %v3143_v16 = vld [vmem:[#allocation7 + $0x140] ss:$8 sps:$4 sm:$0xff]  }
  0x43   :  { %709 = vmatpush1.bf16.msra.mxu0 %v3128_v5  ;;  %v3147_v17 = vld [vmem:[#allocation7 + $0x134] ss:$8 sps:$4 sm:$0xff]   ;;  %v3146_v18 = vld [vmem:[#allocation7 + $0x30] ss:$8 sps:$4 sm:$0xff]   ;;  %v3150_v19 = vld [vmem:[#allocation7 + $0x24] ss:$8 sps:$4 sm:$0xff]  }
  0x44   :  { %710 = vmatprep.subr.bf16.mxu0 %v3132_v8  ;;  %750 = vmatpush1.bf16.msra.mxu1 %v3131_v7  ;;  %v3149_v20 = vld [vmem:[#allocation7 + $0x130] ss:$8 sps:$4 sm:$0xff]   ;;  %v3153_v21 = vld [vmem:[#allocation7 + $0x124] ss:$8 sps:$4 sm:$0xff]   ;;  %v3152_v22 = vld [vmem:[#allocation7 + $0x20] ss:$8 sps:$4 sm:$0xff]  }
  0x45   :  { %751 = vmatprep.subr.bf16.mxu1 %v3135_v10  ;;  %v3156_v23 = vld [vmem:[#allocation7 + $0x14] ss:$8 sps:$4 sm:$0xff]   ;;  %v3155_v24 = vld [vmem:[#allocation7 + $0x120] ss:$8 sps:$4 sm:$0xff]   ;;  %v3158_v26 = vld [vmem:[#allocation7 + $0x10] ss:$8 sps:$4 sm:$0xff]  }
  0x46   :  { %v3159_v25 = vld [vmem:[#allocation7 + $0x114] ss:$8 sps:$4 sm:$0xff]   ;;  %v3162_v27 = vld [vmem:[#allocation7 + $0x4] ss:$8 sps:$4 sm:$0xff]   ;;  %v3161_v28 = vld [vmem:[#allocation7 + $0x110] ss:$8 sps:$4 sm:$0xff]  }
  0x47   :  { %711 = vmatpush1.bf16.msra.mxu0 %v3134_v9  ;;  %v3165_v29 = vld [vmem:[#allocation7 + $0x104] ss:$8 sps:$4 sm:$0xff]   ;;  %v3164_v30 = vld [vmem:[#allocation7] ss:$8 sps:$4 sm:$0xff]   ;;  %v3168_v31 = vld [vmem:[#allocation7 + $0xf4] ss:$8 sps:$4 sm:$0xff]  }
  0x48   :  { %712 = vmatprep.subr.bf16.mxu0 %v3138_v11  ;;  %752 = vmatpush1.bf16.msra.mxu1 %v3137_v12  ;;  %v3167_v32 = vld [vmem:[#allocation7 + $0x100] ss:$8 sps:$4 sm:$0xff]   ;;  %v3171_v33 = vld [vmem:[#allocation7 + $0x1f4] ss:$8 sps:$4 sm:$0xff]   ;;  %v3170_v34 = vld [vmem:[#allocation7 + $0xf0] ss:$8 sps:$4 sm:$0xff]  }
  0x49   :  { %753 = vmatprep.subr.bf16.mxu1 %v3141_v13  ;;  %v3174_v35 = vld [vmem:[#allocation7 + $0xe4] ss:$8 sps:$4 sm:$0xff]   ;;  %v3173_v36 = vld [vmem:[#allocation7 + $0x1f0] ss:$8 sps:$4 sm:$0xff]   ;;  %v3176_v38 = vld [vmem:[#allocation7 + $0xe0] ss:$8 sps:$4 sm:$0xff]  }
  0x4a   :  { %v3177_v37 = vld [vmem:[#allocation7 + $0x1e4] ss:$8 sps:$4 sm:$0xff]   ;;  %v3180_v39 = vld [vmem:[#allocation7 + $0xd4] ss:$8 sps:$4 sm:$0xff]   ;;  %v3179_v40 = vld [vmem:[#allocation7 + $0x1e0] ss:$8 sps:$4 sm:$0xff]  }
  0x4b   :  { %713 = vmatpush1.bf16.msra.mxu0 %v3140_v14  ;;  %v3183_v41 = vld [vmem:[#allocation7 + $0x1d4] ss:$8 sps:$4 sm:$0xff]   ;;  %v3182_v42 = vld [vmem:[#allocation7 + $0xd0] ss:$8 sps:$4 sm:$0xff]   ;;  %v3186_v43 = vld [vmem:[#allocation7 + $0xc4] ss:$8 sps:$4 sm:$0xff]  }
  0x4c   :  { %714 = vmatprep.subr.bf16.mxu0 %v3144_v15  ;;  %754 = vmatpush1.bf16.msra.mxu1 %v3143_v16  ;;  %v3185_v44 = vld [vmem:[#allocation7 + $0x1d0] ss:$8 sps:$4 sm:$0xff]   ;;  %v3189_v45 = vld [vmem:[#allocation7 + $0x1c4] ss:$8 sps:$4 sm:$0xff]   ;;  %v3188_v47 = vld [vmem:[#allocation7 + $0xc0] ss:$8 sps:$4 sm:$0xff]  }
  0x4d   :  { %755 = vmatprep.subr.bf16.mxu1 %v3147_v17  ;;  %v95_v46 = vld [vmem:[#allocation2 + $0x8] sm:$0xff]  ;;  %v3192_v49 = vld [vmem:[#allocation7 + $0xb4] ss:$8 sps:$4 sm:$0xff]   ;;  %v3194_v54 = vld [vmem:[#allocation7 + $0xb0] ss:$8 sps:$4 sm:$0xff]   ;;  %s3785_s11 = smov [#allocation11]  }
  0x4e   :  { %v107_v48 = vpack.c.bf16 %v95_v46, %v95_v46  ;;  %v97_v50 = vld [vmem:[#allocation2 + $0x18] sm:$0xff]  ;;  %v3191_v51 = vld [vmem:[#allocation7 + $0x1c0] ss:$8 sps:$4 sm:$0xff]   ;;  %v3198_v55 = vld [vmem:[#allocation7 + $0xa4] ss:$8 sps:$4 sm:$0xff]   ;;  %s2747_s12 = sshll.u32 %s3785_s11, 4  ;;  %s2748_s12 = int_to_ptr.vmem [resolvable:$true] %s2747_s12 }
  0x4f   :  { %715 = vmatpush1.bf16.msra.mxu0 %v3146_v18  ;;  %v109_v52 = vpack.c.bf16 %v97_v50, %v97_v50  ;;  %v3195_v53 = vld [vmem:[#allocation7 + $0x1b4] ss:$8 sps:$4 sm:$0xff]   ;;  %v3197_v56 = vld [vmem:[#allocation7 + $0x1b0] ss:$8 sps:$4 sm:$0xff]   ;;  %v3201_v57 = vld [vmem:[#allocation7 + $0x1a4] ss:$8 sps:$4 sm:$0xff]   ;;  %p3753_p12 = scmp.lt.s32.totalorder %s2748_s12, %s2748_s12 }
  0x50   :  { %716 = vmatprep.subr.bf16.mxu0 %v3150_v19  ;;  %756 = vmatpush1.bf16.msra.mxu1 %v3149_v20  ;;  %v3200_v58 = vld [vmem:[#allocation7 + $0xa0] ss:$8 sps:$4 sm:$0xff]   ;;  %v3204_v59 = vld [vmem:[#allocation7 + $0x94] ss:$8 sps:$4 sm:$0xff]   ;;  %v3206_v62 = vld [vmem:[#allocation7 + $0x90] ss:$8 sps:$4 sm:$0xff]  }
  0x51   :  { %757 = vmatprep.subr.bf16.mxu1 %v3153_v21  ;;  %738 = vmatprep.mubr.bf16.mxu0 %v107_v48  ;;  %v3203_v60 = vld [vmem:[#allocation7 + $0x1a0] ss:$8 sps:$4 sm:$0xff]   ;;  %v3207_v61 = vld [vmem:[#allocation7 + $0x194] ss:$8 sps:$4 sm:$0xff]   ;;  %v3210_v63 = vld [vmem:[#allocation7 + $0x84] ss:$8 sps:$4 sm:$0xff]  }
  0x52   :  { %779 = vmatprep.mubr.bf16.mxu1 %v109_v52  ;;  %v3209_v0 = vld [vmem:[#allocation7 + $0x190] ss:$8 sps:$4 sm:$0xff]   ;;  %v3212_v1 = vld [vmem:[#allocation7 + $0x80] ss:$8 sps:$4 sm:$0xff]   ;;  %v3213_v2 = vld [vmem:[#allocation7 + $0x184] ss:$8 sps:$4 sm:$0xff]  }
  0x53   :  { %717 = vmatpush1.bf16.msra.mxu0 %v3152_v22  ;;  %v3215_v3 = vld [vmem:[#allocation7 + $0x180] ss:$8 sps:$4 sm:$0xff]   ;;  %v3218_v5 = vld [vmem:[#allocation7 + $0x274] ss:$8 sps:$4 sm:$0xff]   ;;  %v3216_v9 = vld [vmem:[#allocation7 + $0x270] ss:$8 sps:$4 sm:$0xff]  }
  0x54   :  { %718 = vmatprep.subr.bf16.mxu0 %v3156_v23  ;;  %758 = vmatpush1.bf16.msra.mxu1 %v3155_v24  ;;  %v94_v4 = vld [vmem:[#allocation2] sm:$0xff]  ;;  %v96_v6 = vld [vmem:[#allocation2 + $0x10] sm:$0xff] }
  0x55   :  { %759 = vmatprep.subr.bf16.mxu1 %v3159_v25  ;;  %v106_v7 = vpack.c.bf16 %v94_v4, %v94_v4  ;;  %v3221_v8 = vld [vmem:[#allocation8 + $0xe4] ss:$16 sps:$4 sm:$0xff]   ;;  %v108_v10 = vpack.c.bf16 %v96_v6, %v96_v6  ;;  %v3219_v12 = vld [vmem:[#allocation8 + $0xe0] ss:$16 sps:$4 sm:$0xff]  }
  0x56   :  { %v3224_v11 = vld [vmem:[#allocation7 + $0x264] ss:$8 sps:$4 sm:$0xff]   ;;  %v3222_v14 = vld [vmem:[#allocation7 + $0x260] ss:$8 sps:$4 sm:$0xff]   ;;  %v3230_v15 = vld [vmem:[#allocation7 + $0x254] ss:$8 sps:$4 sm:$0xff]  }
  0x57   :  { %719 = vmatpush1.bf16.msra.mxu0 %v3158_v26  ;;  %v3227_v13 = vld [vmem:[#allocation8 + $0xc4] ss:$16 sps:$4 sm:$0xff]   ;;  %v3225_v16 = vld [vmem:[#allocation8 + $0xc0] ss:$16 sps:$4 sm:$0xff]  }
  0x58   :  { %720 = vmatprep.subr.bf16.mxu0 %v3162_v27  ;;  %760 = vmatpush1.bf16.msra.mxu1 %v3161_v28  ;;  %v3233_v17 = vld [vmem:[#allocation8 + $0xa4] ss:$16 sps:$4 sm:$0xff]   ;;  %v3228_v18 = vld [vmem:[#allocation7 + $0x250] ss:$8 sps:$4 sm:$0xff]   ;;  %v3234_v22 = vld [vmem:[#allocation7 + $0x240] ss:$8 sps:$4 sm:$0xff]  }
  0x59   :  { %761 = vmatprep.subr.bf16.mxu1 %v3165_v29  ;;  %v3236_v19 = vld [vmem:[#allocation7 + $0x244] ss:$8 sps:$4 sm:$0xff]   ;;  %v3231_v20 = vld [vmem:[#allocation8 + $0xa0] ss:$16 sps:$4 sm:$0xff]   ;;  %v3242_v23 = vld [vmem:[#allocation7 + $0x234] ss:$8 sps:$4 sm:$0xff]  }
  0x5a   :  { %v3239_v21 = vld [vmem:[#allocation8 + $0x84] ss:$16 sps:$4 sm:$0xff]   ;;  %v3237_v24 = vld [vmem:[#allocation8 + $0x80] ss:$16 sps:$4 sm:$0xff]  }
  0x5b   :  { %721 = vmatpush1.bf16.msra.mxu0 %v3164_v30  ;;  %v3245_v25 = vld [vmem:[#allocation8 + $0x64] ss:$16 sps:$4 sm:$0xff]   ;;  %v3240_v26 = vld [vmem:[#allocation7 + $0x230] ss:$8 sps:$4 sm:$0xff]   ;;  %v3246_v30 = vld [vmem:[#allocation7 + $0x220] ss:$8 sps:$4 sm:$0xff]  }
  0x5c   :  { %722 = vmatprep.subr.bf16.mxu0 %v3168_v31  ;;  %762 = vmatpush1.bf16.msra.mxu1 %v3167_v32  ;;  %v3248_v27 = vld [vmem:[#allocation7 + $0x224] ss:$8 sps:$4 sm:$0xff]   ;;  %v3243_v28 = vld [vmem:[#allocation8 + $0x60] ss:$16 sps:$4 sm:$0xff]   ;;  %v3254_v31 = vld [vmem:[#allocation7 + $0x214] ss:$8 sps:$4 sm:$0xff]  }
  0x5d   :  { %763 = vmatprep.subr.bf16.mxu1 %v3171_v33  ;;  %v3251_v29 = vld [vmem:[#allocation8 + $0x44] ss:$16 sps:$4 sm:$0xff]   ;;  %v3249_v32 = vld [vmem:[#allocation8 + $0x40] ss:$16 sps:$4 sm:$0xff]  }
  0x5e   :  { %v3257_v33 = vld [vmem:[#allocation8 + $0x24] ss:$16 sps:$4 sm:$0xff]   ;;  %v3264_v46 = vld [vmem:[#allocation7 + $0x2f0] ss:$8 sps:$4 sm:$0xff]   ;;  %v3270_v50 = vld [vmem:[#allocation7 + $0x2e0] ss:$8 sps:$4 sm:$0xff]  }
  0x5f   :  { %723 = vmatpush2.bf16.msra.mxu0 %v3170_v34  ;;  %v99_v34 = vld [vmem:[#allocation2 + $0x28] sm:$0xff]  ;;  %v3267_v48 = vld [vmem:[#allocation8 + $0x1e0] ss:$16 sps:$4 sm:$0xff]  }
  0x60   :  { %724 = vmatprep.subr.bf16.mxu0 %v3174_v35  ;;  %764 = vmatpush2.bf16.msra.mxu1 %v3173_v36  ;;  %v3252_v35 = vld [vmem:[#allocation7 + $0x210] ss:$8 sps:$4 sm:$0xff]   ;;  %v111_v36 = vpack.c.bf16 %v99_v34, %v99_v34 }
  0x61   :  { %765 = vmatprep.subr.bf16.mxu1 %v3177_v37  ;;  %v3260_v37 = vld [vmem:[#allocation7 + $0x204] ss:$8 sps:$4 sm:$0xff]   ;;  %v3273_v52 = vld [vmem:[#allocation8 + $0x1c0] ss:$16 sps:$4 sm:$0xff]  }
  0x62   :  { %v3297_v4 = vld [vmem:[#allocation8 + $0x140] ss:$16 sps:$4 sm:$0xff]  }
  0x63   :  { %725 = vmatpush2.bf16.msra.mxu0 %v3176_v38  ;;  %v101_v38 = vld [vmem:[#allocation5 + $0x8] sm:$0xff]  ;;  %v3330_v34 = vld [vmem:[#allocation8 + $0x280] ss:$16 sps:$4 sm:$0xff]  }
  0x64   :  { %726 = vmatprep.subr.bf16.mxu0 %v3180_v39  ;;  %766 = vmatpush2.bf16.msra.mxu1 %v3179_v40  ;;  %v3255_v39 = vld [vmem:[#allocation8 + $0x20] ss:$16 sps:$4 sm:$0xff]   ;;  %v3846_v40 = vpack.c.bf16 %v101_v38, %v101_v38 }
  0x65   :  { %767 = vmatprep.subr.bf16.mxu1 %v3183_v41  ;;  %v3263_v41 = vld [vmem:[#allocation8 + $0x4] ss:$16 sps:$4 sm:$0xff]   ;;  %v3300_v6 = vld [vmem:[#allocation7 + $0x290] ss:$8 sps:$4 sm:$0xff]  }
  0x66   :  { %v3336_v38 = vld [vmem:[#allocation8 + $0x260] ss:$16 sps:$4 sm:$0xff]  }
  0x67   :  { %727 = vmatpush2.bf16.msra.mxu0 %v3182_v42  ;;  %v3258_v42 = vld [vmem:[#allocation7 + $0x200] ss:$8 sps:$4 sm:$0xff]  }
  0x68   :  { %728 = vmatprep.subr.bf16.mxu0 %v3186_v43  ;;  %768 = vmatpush2.bf16.msra.mxu1 %v3185_v44  ;;  %v3266_v43 = vld [vmem:[#allocation7 + $0x2f4] ss:$8 sps:$4 sm:$0xff]   ;;  %v3261_v44 = vld [vmem:[#allocation8] ss:$16 sps:$4 sm:$0xff]  }
  0x69   :  { %769 = vmatprep.subr.bf16.mxu1 %v3189_v45  ;;  %v3269_v45 = vld [vmem:[#allocation8 + $0x1e4] ss:$16 sps:$4 sm:$0xff]  }
  0x6b   :  { %729 = vmatpush2.bf16.msra.mxu0 %v3188_v47  ;;  %v3272_v47 = vld [vmem:[#allocation7 + $0x2e4] ss:$8 sps:$4 sm:$0xff]  }
  0x6c   :  { %730 = vmatprep.subr.bf16.mxu0 %v3192_v49  ;;  %770 = vmatpush2.bf16.msra.mxu1 %v3191_v51  ;;  %v3275_v49 = vld [vmem:[#allocation8 + $0x1c4] ss:$16 sps:$4 sm:$0xff]  }
  0x6d   :  { %771 = vmatprep.subr.bf16.mxu1 %v3195_v53  ;;  %v3278_v51 = vld [vmem:[#allocation7 + $0x2d4] ss:$8 sps:$4 sm:$0xff]  }
  0x6e   :  { %v3281_v53 = vld [vmem:[#allocation8 + $0x1a4] ss:$16 sps:$4 sm:$0xff]  }
  0x6f   :  { %731 = vmatpush2.bf16.msra.mxu0 %v3194_v54  ;;  %v3276_v54 = vld [vmem:[#allocation7 + $0x2d0] ss:$8 sps:$4 sm:$0xff]  }
  0x70   :  { %732 = vmatprep.subr.bf16.mxu0 %v3198_v55  ;;  %772 = vmatpush2.bf16.msra.mxu1 %v3197_v56  ;;  %v3284_v55 = vld [vmem:[#allocation7 + $0x2c4] ss:$8 sps:$4 sm:$0xff]   ;;  %v3279_v56 = vld [vmem:[#allocation8 + $0x1a0] ss:$16 sps:$4 sm:$0xff]  }
  0x71   :  { %773 = vmatprep.subr.bf16.mxu1 %v3201_v57  ;;  %v3287_v57 = vld [vmem:[#allocation8 + $0x184] ss:$16 sps:$4 sm:$0xff]  }
  0x73   :  { %733 = vmatpush2.bf16.msra.mxu0 %v3200_v58  ;;  %v3282_v58 = vld [vmem:[#allocation7 + $0x2c0] ss:$8 sps:$4 sm:$0xff]  }
  0x74   :  { %734 = vmatprep.subr.bf16.mxu0 %v3204_v59  ;;  %774 = vmatpush2.bf16.msra.mxu1 %v3203_v60  ;;  %v3290_v59 = vld [vmem:[#allocation7 + $0x2b4] ss:$8 sps:$4 sm:$0xff]   ;;  %v3285_v60 = vld [vmem:[#allocation8 + $0x180] ss:$16 sps:$4 sm:$0xff]  }
  0x75   :  { %775 = vmatprep.subr.bf16.mxu1 %v3207_v61  ;;  %v3293_v61 = vld [vmem:[#allocation8 + $0x164] ss:$16 sps:$4 sm:$0xff]  }
  0x77   :  { %735 = vmatpush2.bf16.msra.mxu0 %v3206_v62  ;;  %v3288_v62 = vld [vmem:[#allocation7 + $0x2b0] ss:$8 sps:$4 sm:$0xff]  }
  0x78   :  { %736 = vmatprep.subr.bf16.mxu0 %v3210_v63  ;;  %776 = vmatpush2.bf16.msra.mxu1 %v3209_v0  ;;  %v3296_v63 = vld [vmem:[#allocation7 + $0x2a4] ss:$8 sps:$4 sm:$0xff]   ;;  %v3291_v0 = vld [vmem:[#allocation8 + $0x160] ss:$16 sps:$4 sm:$0xff]  }
  0x79   :  { %777 = vmatprep.subr.bf16.mxu1 %v3213_v2  ;;  %v3294_v2 = vld [vmem:[#allocation7 + $0x2a0] ss:$8 sps:$4 sm:$0xff]  }
  0x7b   :  { %737 = vmatpush2.bf16.msra.mxu0 %v3212_v1  ;;  %v3299_v1 = vld [vmem:[#allocation8 + $0x144] ss:$16 sps:$4 sm:$0xff]  }
  0x7c   :  { %788 = vmatprep.subr.bf16.mxu0 %v3218_v5  ;;  %778 = vmatpush2.bf16.msra.mxu1 %v3215_v3  ;;  %v3302_v3 = vld [vmem:[#allocation7 + $0x294] ss:$8 sps:$4 sm:$0xff]  }
  0x7d   :  { %2003 = vmatprep.subr.bf16.mxu1 %v3221_v8  ;;  %v3305_v5 = vld [vmem:[#allocation8 + $0x124] ss:$16 sps:$4 sm:$0xff]   ;;  %v3303_v8 = vld [vmem:[#allocation8 + $0x120] ss:$16 sps:$4 sm:$0xff]  }
  0x7e   :  { %739 = vmatmul.mubr.bf16.vlgmr.msra.gmra.mxu0 %v106_v7  ;;  %v3308_v7 = vld [vmem:[#allocation7 + $0x284] ss:$8 sps:$4 sm:$0xff]  }
  0x7f   :  { %789 = vmatpush1.bf16.msra.mxu0 %v3216_v9  ;;  %780 = vmatmul.mubr.bf16.vlgmr.msra.gmra.mxu1 %v108_v10  ;;  %v3306_v9 = vld [vmem:[#allocation7 + $0x280] ss:$8 sps:$4 sm:$0xff]   ;;  %v3311_v10 = vld [vmem:[#allocation8 + $0x104] ss:$16 sps:$4 sm:$0xff]  }
  0x80   :  { %790 = vmatprep.subr.bf16.mxu0 %v3224_v11  ;;  %2004 = vmatpush1.bf16.msra.mxu1 %v3219_v12  ;;  %v3309_v11 = vld [vmem:[#allocation8 + $0x100] ss:$16 sps:$4 sm:$0xff]  }
  0x81   :  { %2005 = vmatprep.subr.bf16.mxu1 %v3227_v13  ;;  %820 = vmatprep.mubr.bf16.mxu0 %v111_v36  ;;  %v98_v12 = vld [vmem:[#allocation2 + $0x20] sm:$0xff] }
  0x82   :  { %2035 = vmatprep.mubr.bf16.mxu1 %v3846_v40  ;;  %v3314_v13 = vld [vmem:[#allocation8 + $0x2e4] ss:$16 sps:$4 sm:$0xff]   ;;  %v3333_v36 = vld [vmem:[#allocation8 + $0x480] ss:$16 sps:$4 sm:$0xff]  }
  0x83   :  { %791 = vmatpush1.bf16.msra.mxu0 %v3222_v14  ;;  %v100_v14 = vld [vmem:[#allocation5] sm:$0xff] }
  0x84   :  { %792 = vmatprep.subr.bf16.mxu0 %v3230_v15  ;;  %2006 = vmatpush1.bf16.msra.mxu1 %v3225_v16  ;;  %v110_v15 = vpack.c.bf16 %v98_v12, %v98_v12  ;;  %v3317_v16 = vld [vmem:[#allocation8 + $0x4e4] ss:$16 sps:$4 sm:$0xff]  }
  0x85   :  { %2007 = vmatprep.subr.bf16.mxu1 %v3233_v17  ;;  %v3312_v17 = vld [vmem:[#allocation8 + $0x2e0] ss:$16 sps:$4 sm:$0xff]   ;;  %v3398_v12 = vld [vmem:[#allocation8 + $0x324] ss:$16 sps:$4 sm:$0xff]  }
  0x87   :  { %793 = vmatpush1.bf16.msra.mxu0 %v3228_v18  ;;  %v3849_v18 = vpack.c.bf16 %v100_v14, %v100_v14  ;;  %v3401_v14 = vld [vmem:[#allocation8 + $0x524] ss:$16 sps:$4 sm:$0xff]  }
  0x88   :  { %794 = vmatprep.subr.bf16.mxu0 %v3236_v19  ;;  %2008 = vmatpush1.bf16.msra.mxu1 %v3231_v20  ;;  %v3320_v19 = vld [vmem:[#allocation8 + $0x2c4] ss:$16 sps:$4 sm:$0xff]   ;;  %v3315_v20 = vld [vmem:[#allocation8 + $0x4e0] ss:$16 sps:$4 sm:$0xff]  }
  0x89   :  { %2009 = vmatprep.subr.bf16.mxu1 %v3239_v21  ;;  %v3323_v21 = vld [vmem:[#allocation8 + $0x4c4] ss:$16 sps:$4 sm:$0xff]  }
  0x8b   :  { %795 = vmatpush1.bf16.msra.mxu0 %v3234_v22  ;;  %v103_v22 = vld [vmem:[#allocation5 + $0x18] sm:$0xff] }
  0x8c   :  { %796 = vmatprep.subr.bf16.mxu0 %v3242_v23  ;;  %2010 = vmatpush1.bf16.msra.mxu1 %v3237_v24  ;;  %v3318_v23 = vld [vmem:[#allocation8 + $0x2c0] ss:$16 sps:$4 sm:$0xff]   ;;  %v3851_v24 = vpack.c.bf16 %v103_v22, %v103_v22  ;;  %v3410_v22 = vld [vmem:[#allocation8 + $0xec] ss:$16 sps:$4 sm:$0xff]  }
  0x8d   :  { %2011 = vmatprep.subr.bf16.mxu1 %v3245_v25  ;;  %v3326_v25 = vld [vmem:[#allocation8 + $0x2a4] ss:$16 sps:$4 sm:$0xff]  }
  0x8f   :  { %797 = vmatpush1.bf16.msra.mxu0 %v3240_v26  ;;  %v105_v26 = vld [vmem:[#allocation5 + $0x28] sm:$0xff] }
  0x90   :  { %798 = vmatprep.subr.bf16.mxu0 %v3248_v27  ;;  %2012 = vmatpush1.bf16.msra.mxu1 %v3243_v28  ;;  %v3321_v27 = vld [vmem:[#allocation8 + $0x4c0] ss:$16 sps:$4 sm:$0xff]   ;;  %v3855_v28 = vpack.c.bf16 %v105_v26, %v105_v26 }
  0x91   :  { %2013 = vmatprep.subr.bf16.mxu1 %v3251_v29  ;;  %v3329_v29 = vld [vmem:[#allocation8 + $0x4a4] ss:$16 sps:$4 sm:$0xff]  }
  0x93   :  { %799 = vmatpush1.bf16.msra.mxu0 %v3246_v30  ;;  %v3324_v30 = vld [vmem:[#allocation8 + $0x2a0] ss:$16 sps:$4 sm:$0xff]  }
  0x94   :  { %800 = vmatprep.subr.bf16.mxu0 %v3254_v31  ;;  %2014 = vmatpush1.bf16.msra.mxu1 %v3249_v32  ;;  %v3332_v31 = vld [vmem:[#allocation8 + $0x284] ss:$16 sps:$4 sm:$0xff]   ;;  %v3327_v32 = vld [vmem:[#allocation8 + $0x4a0] ss:$16 sps:$4 sm:$0xff]  }
  0x95   :  { %2015 = vmatprep.subr.bf16.mxu1 %v3257_v33  ;;  %v3335_v33 = vld [vmem:[#allocation8 + $0x484] ss:$16 sps:$4 sm:$0xff]  }
  0x97   :  { %801 = vmatpush1.bf16.msra.mxu0 %v3252_v35  ;;  %v3338_v35 = vld [vmem:[#allocation8 + $0x264] ss:$16 sps:$4 sm:$0xff]  }
  0x98   :  { %802 = vmatprep.subr.bf16.mxu0 %v3260_v37  ;;  %2016 = vmatpush1.bf16.msra.mxu1 %v3255_v39  ;;  %v3341_v37 = vld [vmem:[#allocation8 + $0x464] ss:$16 sps:$4 sm:$0xff]  }
  0x99   :  { %2017 = vmatprep.subr.bf16.mxu1 %v3263_v41  ;;  %v3344_v39 = vld [vmem:[#allocation8 + $0x244] ss:$16 sps:$4 sm:$0xff]   ;;  %v3339_v41 = vld [vmem:[#allocation8 + $0x460] ss:$16 sps:$4 sm:$0xff]  }
  0x9b   :  { %803 = vmatpush1.bf16.msra.mxu0 %v3258_v42  ;;  %v3347_v42 = vld [vmem:[#allocation8 + $0x444] ss:$16 sps:$4 sm:$0xff]  }
  0x9c   :  { %804 = vmatprep.subr.bf16.mxu0 %v3266_v43  ;;  %2018 = vmatpush1.bf16.msra.mxu1 %v3261_v44  ;;  %v3342_v43 = vld [vmem:[#allocation8 + $0x240] ss:$16 sps:$4 sm:$0xff]   ;;  %v3350_v44 = vld [vmem:[#allocation8 + $0x224] ss:$16 sps:$4 sm:$0xff]  }
  0x9d   :  { %2019 = vmatprep.subr.bf16.mxu1 %v3269_v45  ;;  %v3345_v45 = vld [vmem:[#allocation8 + $0x440] ss:$16 sps:$4 sm:$0xff]  }
  0x9f   :  { %805 = vmatpush2.bf16.msra.mxu0 %v3264_v46  ;;  %v3353_v46 = vld [vmem:[#allocation8 + $0x424] ss:$16 sps:$4 sm:$0xff]  }
  0xa0   :  { %806 = vmatprep.subr.bf16.mxu0 %v3272_v47  ;;  %2020 = vmatpush2.bf16.msra.mxu1 %v3267_v48  ;;  %v3348_v47 = vld [vmem:[#allocation8 + $0x220] ss:$16 sps:$4 sm:$0xff]   ;;  %v3356_v48 = vld [vmem:[#allocation8 + $0x204] ss:$16 sps:$4 sm:$0xff]  }
  0xa1   :  { %2021 = vmatprep.subr.bf16.mxu1 %v3275_v49  ;;  %v3351_v49 = vld [vmem:[#allocation8 + $0x420] ss:$16 sps:$4 sm:$0xff]  }
  0xa3   :  { %807 = vmatpush2.bf16.msra.mxu0 %v3270_v50  ;;  %v3359_v50 = vld [vmem:[#allocation8 + $0x404] ss:$16 sps:$4 sm:$0xff]  }
  0xa4   :  { %808 = vmatprep.subr.bf16.mxu0 %v3278_v51  ;;  %2022 = vmatpush2.bf16.msra.mxu1 %v3273_v52  ;;  %v3354_v51 = vld [vmem:[#allocation8 + $0x200] ss:$16 sps:$4 sm:$0xff]   ;;  %v3362_v52 = vld [vmem:[#allocation8 + $0x3e4] ss:$16 sps:$4 sm:$0xff]  }
  0xa5   :  { %2023 = vmatprep.subr.bf16.mxu1 %v3281_v53  ;;  %v3357_v53 = vld [vmem:[#allocation8 + $0x400] ss:$16 sps:$4 sm:$0xff]  }
  0xa7   :  { %809 = vmatpush2.bf16.msra.mxu0 %v3276_v54  ;;  %v3365_v54 = vld [vmem:[#allocation8 + $0x5e4] ss:$16 sps:$4 sm:$0xff]  }
  0xa8   :  { %810 = vmatprep.subr.bf16.mxu0 %v3284_v55  ;;  %2024 = vmatpush2.bf16.msra.mxu1 %v3279_v56  ;;  %v3360_v55 = vld [vmem:[#allocation8 + $0x3e0] ss:$16 sps:$4 sm:$0xff]   ;;  %v3368_v56 = vld [vmem:[#allocation8 + $0x3c4] ss:$16 sps:$4 sm:$0xff]  }
  0xa9   :  { %2025 = vmatprep.subr.bf16.mxu1 %v3287_v57  ;;  %v3363_v57 = vld [vmem:[#allocation8 + $0x5e0] ss:$16 sps:$4 sm:$0xff]  }
  0xab   :  { %811 = vmatpush2.bf16.msra.mxu0 %v3282_v58  ;;  %v3371_v58 = vld [vmem:[#allocation8 + $0x5c4] ss:$16 sps:$4 sm:$0xff]  }
  0xac   :  { %812 = vmatprep.subr.bf16.mxu0 %v3290_v59  ;;  %2026 = vmatpush2.bf16.msra.mxu1 %v3285_v60  ;;  %v3366_v59 = vld [vmem:[#allocation8 + $0x3c0] ss:$16 sps:$4 sm:$0xff]   ;;  %v3374_v60 = vld [vmem:[#allocation8 + $0x3a4] ss:$16 sps:$4 sm:$0xff]  }
  0xad   :  { %2027 = vmatprep.subr.bf16.mxu1 %v3293_v61  ;;  %v3369_v61 = vld [vmem:[#allocation8 + $0x5c0] ss:$16 sps:$4 sm:$0xff]  }
  0xaf   :  { %813 = vmatpush2.bf16.msra.mxu0 %v3288_v62  ;;  %v3377_v62 = vld [vmem:[#allocation8 + $0x5a4] ss:$16 sps:$4 sm:$0xff]  }
  0xb0   :  { %814 = vmatprep.subr.bf16.mxu0 %v3296_v63  ;;  %2028 = vmatpush2.bf16.msra.mxu1 %v3291_v0  ;;  %v3372_v63 = vld [vmem:[#allocation8 + $0x3a0] ss:$16 sps:$4 sm:$0xff]   ;;  %v3380_v0 = vld [vmem:[#allocation8 + $0x384] ss:$16 sps:$4 sm:$0xff]  }
  0xb1   :  { %2029 = vmatprep.subr.bf16.mxu1 %v3299_v1  ;;  %v3375_v1 = vld [vmem:[#allocation8 + $0x5a0] ss:$16 sps:$4 sm:$0xff]  }
  0xb3   :  { %815 = vmatpush2.bf16.msra.mxu0 %v3294_v2  ;;  %v3383_v2 = vld [vmem:[#allocation8 + $0x584] ss:$16 sps:$4 sm:$0xff]  }
  0xb4   :  { %816 = vmatprep.subr.bf16.mxu0 %v3302_v3  ;;  %2030 = vmatpush2.bf16.msra.mxu1 %v3297_v4  ;;  %v3378_v3 = vld [vmem:[#allocation8 + $0x380] ss:$16 sps:$4 sm:$0xff]   ;;  %v3386_v4 = vld [vmem:[#allocation8 + $0x364] ss:$16 sps:$4 sm:$0xff]  }
  0xb5   :  { %2031 = vmatprep.subr.bf16.mxu1 %v3305_v5  ;;  %v3381_v5 = vld [vmem:[#allocation8 + $0x580] ss:$16 sps:$4 sm:$0xff]  }
  0xb7   :  { %817 = vmatpush2.bf16.msra.mxu0 %v3300_v6  ;;  %v3389_v6 = vld [vmem:[#allocation8 + $0x564] ss:$16 sps:$4 sm:$0xff]  }
  0xb8   :  { %818 = vmatprep.subr.bf16.mxu0 %v3308_v7  ;;  %2032 = vmatpush2.bf16.msra.mxu1 %v3303_v8  ;;  %v3384_v7 = vld [vmem:[#allocation8 + $0x360] ss:$16 sps:$4 sm:$0xff]   ;;  %v3392_v8 = vld [vmem:[#allocation8 + $0x344] ss:$16 sps:$4 sm:$0xff]  }
  0xb9   :  { %2033 = vmatprep.subr.bf16.mxu1 %v3311_v10  ;;  %v3395_v10 = vld [vmem:[#allocation8 + $0x544] ss:$16 sps:$4 sm:$0xff]  }
  0xbb   :  { %819 = vmatpush2.bf16.msra.mxu0 %v3306_v9  ;;  %v3387_v9 = vld [vmem:[#allocation8 + $0x560] ss:$16 sps:$4 sm:$0xff]  }
  0xbc   :  { %2044 = vmatprep.subr.bf16.mxu0 %v3314_v13  ;;  %2034 = vmatpush2.bf16.msra.mxu1 %v3309_v11  ;;  %v3390_v11 = vld [vmem:[#allocation8 + $0x340] ss:$16 sps:$4 sm:$0xff]  }
  0xbd   :  { %2085 = vmatprep.subr.bf16.mxu1 %v3317_v16  ;;  %v3393_v13 = vld [vmem:[#allocation8 + $0x540] ss:$16 sps:$4 sm:$0xff]   ;;  %v3404_v16 = vld [vmem:[#allocation8 + $0x304] ss:$16 sps:$4 sm:$0xff]  }
  0xbe   :  { %821 = vmatmul.mubr.bf16.vlgmr.msra.gmra.mxu0 %v110_v15  ;;  %v3396_v15 = vld [vmem:[#allocation8 + $0x320] ss:$16 sps:$4 sm:$0xff]  }
  0xbf   :  { %2045 = vmatpush1.bf16.msra.mxu0 %v3312_v17  ;;  %2036 = vmatmul.mubr.bf16.vlgmr.msra.gmra.mxu1 %v3849_v18  ;;  %v3399_v17 = vld [vmem:[#allocation8 + $0x520] ss:$16 sps:$4 sm:$0xff]  }
  0xc0   :  { %2046 = vmatprep.subr.bf16.mxu0 %v3320_v19  ;;  %2086 = vmatpush1.bf16.msra.mxu1 %v3315_v20  ;;  %v3402_v19 = vld [vmem:[#allocation8 + $0x300] ss:$16 sps:$4 sm:$0xff]   ;;  %v3407_v20 = vld [vmem:[#allocation8 + $0x504] ss:$16 sps:$4 sm:$0xff]  }
  0xc1   :  { %2076 = vmatprep.mubr.bf16.mxu0 %v3851_v24  ;;  %2087 = vmatprep.subr.bf16.mxu1 %v3323_v21  ;;  %v102_v21 = vld [vmem:[#allocation5 + $0x10] sm:$0xff] }
  0xc2   :  { %2117 = vmatprep.mubr.bf16.mxu1 %v3855_v28  ;;  %v3858_v26 = vpack.c.bf16 %v102_v21, %v102_v21  ;;  %v3497_v21 = vld [vmem:[#allocation8 + $0x32c] ss:$16 sps:$4 sm:$0xff]  }
  0xc3   :  { %2047 = vmatpush1.bf16.msra.mxu0 %v3318_v23  ;;  %v3405_v23 = vld [vmem:[#allocation8 + $0x500] ss:$16 sps:$4 sm:$0xff]  }
  0xc4   :  { %2048 = vmatprep.subr.bf16.mxu0 %v3326_v25  ;;  %2088 = vmatpush1.bf16.msra.mxu1 %v3321_v27  ;;  %v104_v25 = vld [vmem:[#allocation5 + $0x20] sm:$0xff]  ;;  %v3413_v27 = vld [vmem:[#allocation8 + $0x2ec] ss:$16 sps:$4 sm:$0xff]  }
  0xc5   :  { %2089 = vmatprep.subr.bf16.mxu1 %v3329_v29  ;;  %v3408_v29 = vld [vmem:[#allocation8 + $0xe8] ss:$16 sps:$4 sm:$0xff]  }
  0xc7   :  { %2049 = vmatpush1.bf16.msra.mxu0 %v3324_v30  ;;  %v3860_v30 = vpack.c.bf16 %v104_v25, %v104_v25  ;;  %v3495_v25 = vld [vmem:[#allocation8 + $0x328] ss:$16 sps:$4 sm:$0xff]  }
  0xc8   :  { %2050 = vmatprep.subr.bf16.mxu0 %v3332_v31  ;;  %2090 = vmatpush1.bf16.msra.mxu1 %v3327_v32  ;;  %v3416_v31 = vld [vmem:[#allocation8 + $0xcc] ss:$16 sps:$4 sm:$0xff]   ;;  %v3411_v32 = vld [vmem:[#allocation8 + $0x2e8] ss:$16 sps:$4 sm:$0xff]  }
  0xc9   :  { %2091 = vmatprep.subr.bf16.mxu1 %v3335_v33  ;;  %v3414_v33 = vld [vmem:[#allocation8 + $0xc8] ss:$16 sps:$4 sm:$0xff]  }
  0xcb   :  { %2051 = vmatpush1.bf16.msra.mxu0 %v3330_v34  ;;  %v3419_v34 = vld [vmem:[#allocation8 + $0x2cc] ss:$16 sps:$4 sm:$0xff]  }
  0xcc   :  { %2052 = vmatprep.subr.bf16.mxu0 %v3338_v35  ;;  %2092 = vmatpush1.bf16.msra.mxu1 %v3333_v36  ;;  %v3417_v35 = vld [vmem:[#allocation8 + $0x2c8] ss:$16 sps:$4 sm:$0xff]   ;;  %v3422_v36 = vld [vmem:[#allocation8 + $0xac] ss:$16 sps:$4 sm:$0xff]  }
  0xcd   :  { %2093 = vmatprep.subr.bf16.mxu1 %v3341_v37  ;;  %v3425_v37 = vld [vmem:[#allocation8 + $0x2ac] ss:$16 sps:$4 sm:$0xff]  }
  0xcf   :  { %2053 = vmatpush1.bf16.msra.mxu0 %v3336_v38  ;;  %v3420_v38 = vld [vmem:[#allocation8 + $0xa8] ss:$16 sps:$4 sm:$0xff]  }
  0xd0   :  { %2054 = vmatprep.subr.bf16.mxu0 %v3344_v39  ;;  %2094 = vmatpush1.bf16.msra.mxu1 %v3339_v41  ;;  %v3428_v39 = vld [vmem:[#allocation8 + $0x8c] ss:$16 sps:$4 sm:$0xff]   ;;  %v3423_v41 = vld [vmem:[#allocation8 + $0x2a8] ss:$16 sps:$4 sm:$0xff]  }
  0xd1   :  { %2095 = vmatprep.subr.bf16.mxu1 %v3347_v42  ;;  %v3431_v42 = vld [vmem:[#allocation8 + $0x28c] ss:$16 sps:$4 sm:$0xff]  }
  0xd3   :  { %2055 = vmatpush1.bf16.msra.mxu0 %v3342_v43  ;;  %v3426_v43 = vld [vmem:[#allocation8 + $0x88] ss:$16 sps:$4 sm:$0xff]  }
  0xd4   :  { %2056 = vmatprep.subr.bf16.mxu0 %v3350_v44  ;;  %2096 = vmatpush1.bf16.msra.mxu1 %v3345_v45  ;;  %v3429_v44 = vld [vmem:[#allocation8 + $0x288] ss:$16 sps:$4 sm:$0xff]   ;;  %v3437_v45 = vld [vmem:[#allocation8 + $0x26c] ss:$16 sps:$4 sm:$0xff]  }
  0xd5   :  { %2097 = vmatprep.subr.bf16.mxu1 %v3353_v46  ;;  %v3432_v46 = vld [vmem:[#allocation8 + $0x68] ss:$16 sps:$4 sm:$0xff]  }
  0xd7   :  { %2057 = vmatpush1.bf16.msra.mxu0 %v3348_v47  ;;  %v3435_v47 = vld [vmem:[#allocation8 + $0x268] ss:$16 sps:$4 sm:$0xff]  }
  0xd8   :  { %2058 = vmatprep.subr.bf16.mxu0 %v3356_v48  ;;  %2098 = vmatpush1.bf16.msra.mxu1 %v3351_v49  ;;  %v3443_v48 = vld [vmem:[#allocation8 + $0x24c] ss:$16 sps:$4 sm:$0xff]   ;;  %v3438_v49 = vld [vmem:[#allocation8 + $0x48] ss:$16 sps:$4 sm:$0xff]  }
  0xd9   :  { %2099 = vmatprep.subr.bf16.mxu1 %v3359_v50  ;;  %v3441_v50 = vld [vmem:[#allocation8 + $0x248] ss:$16 sps:$4 sm:$0xff]  }
  0xdb   :  { %2059 = vmatpush1.bf16.msra.mxu0 %v3354_v51  ;;  %v3446_v51 = vld [vmem:[#allocation8 + $0x2c] ss:$16 sps:$4 sm:$0xff]  }
  0xdc   :  { %2060 = vmatprep.subr.bf16.mxu0 %v3362_v52  ;;  %2100 = vmatpush1.bf16.msra.mxu1 %v3357_v53  ;;  %v3444_v52 = vld [vmem:[#allocation8 + $0x28] ss:$16 sps:$4 sm:$0xff]   ;;  %v3449_v53 = vld [vmem:[#allocation8 + $0x22c] ss:$16 sps:$4 sm:$0xff]  }
  0xdd   :  { %2101 = vmatprep.subr.bf16.mxu1 %v3365_v54  ;;  %v3452_v54 = vld [vmem:[#allocation8 + $0xc] ss:$16 sps:$4 sm:$0xff]  }
  0xdf   :  { %2061 = vmatpush2.bf16.msra.mxu0 %v3360_v55  ;;  %v3447_v55 = vld [vmem:[#allocation8 + $0x228] ss:$16 sps:$4 sm:$0xff]  }
  0xe0   :  { %2062 = vmatprep.subr.bf16.mxu0 %v3368_v56  ;;  %2102 = vmatpush2.bf16.msra.mxu1 %v3363_v57  ;;  %v3455_v56 = vld [vmem:[#allocation8 + $0x20c] ss:$16 sps:$4 sm:$0xff]   ;;  %v3450_v57 = vld [vmem:[#allocation8 + $0x8] ss:$16 sps:$4 sm:$0xff]  }
  0xe1   :  { %2103 = vmatprep.subr.bf16.mxu1 %v3371_v58  ;;  %v3458_v58 = vld [vmem:[#allocation8 + $0x1ec] ss:$16 sps:$4 sm:$0xff]  }
  0xe3   :  { %2063 = vmatpush2.bf16.msra.mxu0 %v3366_v59  ;;  %v3453_v59 = vld [vmem:[#allocation8 + $0x208] ss:$16 sps:$4 sm:$0xff]  }
  0xe4   :  { %2064 = vmatprep.subr.bf16.mxu0 %v3374_v60  ;;  %2104 = vmatpush2.bf16.msra.mxu1 %v3369_v61  ;;  %v3461_v60 = vld [vmem:[#allocation8 + $0x3ec] ss:$16 sps:$4 sm:$0xff]   ;;  %v3456_v61 = vld [vmem:[#allocation8 + $0x1e8] ss:$16 sps:$4 sm:$0xff]  }
  0xe5   :  { %2105 = vmatprep.subr.bf16.mxu1 %v3377_v62  ;;  %v3464_v62 = vld [vmem:[#allocation8 + $0x1cc] ss:$16 sps:$4 sm:$0xff]  }
  0xe7   :  { %2065 = vmatpush2.bf16.msra.mxu0 %v3372_v63  ;;  %v3459_v63 = vld [vmem:[#allocation8 + $0x3e8] ss:$16 sps:$4 sm:$0xff]  }
  0xe8   :  { %2066 = vmatprep.subr.bf16.mxu0 %v3380_v0  ;;  %2106 = vmatpush2.bf16.msra.mxu1 %v3375_v1  ;;  %v3467_v0 = vld [vmem:[#allocation8 + $0x3cc] ss:$16 sps:$4 sm:$0xff]   ;;  %v3462_v1 = vld [vmem:[#allocation8 + $0x1c8] ss:$16 sps:$4 sm:$0xff]  }
  0xe9   :  { %2107 = vmatprep.subr.bf16.mxu1 %v3383_v2  ;;  %v3470_v2 = vld [vmem:[#allocation8 + $0x1ac] ss:$16 sps:$4 sm:$0xff]  }
  0xeb   :  { %2067 = vmatpush2.bf16.msra.mxu0 %v3378_v3  ;;  %v3465_v3 = vld [vmem:[#allocation8 + $0x3c8] ss:$16 sps:$4 sm:$0xff]  }
  0xec   :  { %2068 = vmatprep.subr.bf16.mxu0 %v3386_v4  ;;  %2108 = vmatpush2.bf16.msra.mxu1 %v3381_v5  ;;  %v3473_v4 = vld [vmem:[#allocation8 + $0x3ac] ss:$16 sps:$4 sm:$0xff]   ;;  %v3468_v5 = vld [vmem:[#allocation8 + $0x1a8] ss:$16 sps:$4 sm:$0xff]  }
  0xed   :  { %2109 = vmatprep.subr.bf16.mxu1 %v3389_v6  ;;  %v3476_v6 = vld [vmem:[#allocation8 + $0x18c] ss:$16 sps:$4 sm:$0xff]  }
  0xef   :  { %2069 = vmatpush2.bf16.msra.mxu0 %v3384_v7  ;;  %v3471_v7 = vld [vmem:[#allocation8 + $0x3a8] ss:$16 sps:$4 sm:$0xff]  }
  0xf0   :  { %2070 = vmatprep.subr.bf16.mxu0 %v3392_v8  ;;  %2110 = vmatpush2.bf16.msra.mxu1 %v3387_v9  ;;  %v3479_v8 = vld [vmem:[#allocation8 + $0x38c] ss:$16 sps:$4 sm:$0xff]   ;;  %v3474_v9 = vld [vmem:[#allocation8 + $0x188] ss:$16 sps:$4 sm:$0xff]  }
  0xf1   :  { %2111 = vmatprep.subr.bf16.mxu1 %v3395_v10  ;;  %v3482_v10 = vld [vmem:[#allocation8 + $0x16c] ss:$16 sps:$4 sm:$0xff]  }
  0xf3   :  { %2071 = vmatpush2.bf16.msra.mxu0 %v3390_v11  ;;  %v3477_v11 = vld [vmem:[#allocation8 + $0x388] ss:$16 sps:$4 sm:$0xff]  }
  0xf4   :  { %2072 = vmatprep.subr.bf16.mxu0 %v3398_v12  ;;  %2112 = vmatpush2.bf16.msra.mxu1 %v3393_v13  ;;  %v3485_v12 = vld [vmem:[#allocation8 + $0x36c] ss:$16 sps:$4 sm:$0xff]   ;;  %v3480_v13 = vld [vmem:[#allocation8 + $0x168] ss:$16 sps:$4 sm:$0xff]  }
  0xf5   :  { %2113 = vmatprep.subr.bf16.mxu1 %v3401_v14  ;;  %v3488_v14 = vld [vmem:[#allocation8 + $0x14c] ss:$16 sps:$4 sm:$0xff]  }
  0xf7   :  { %2073 = vmatpush2.bf16.msra.mxu0 %v3396_v15  ;;  %v3483_v15 = vld [vmem:[#allocation8 + $0x368] ss:$16 sps:$4 sm:$0xff]  }
  0xf8   :  { %2074 = vmatprep.subr.bf16.mxu0 %v3404_v16  ;;  %2114 = vmatpush2.bf16.msra.mxu1 %v3399_v17  ;;  %v3491_v16 = vld [vmem:[#allocation8 + $0x34c] ss:$16 sps:$4 sm:$0xff]   ;;  %v3486_v17 = vld [vmem:[#allocation8 + $0x148] ss:$16 sps:$4 sm:$0xff]  }
  0xf9   :  { %2115 = vmatprep.subr.bf16.mxu1 %v3407_v20  ;;  %v3489_v20 = vld [vmem:[#allocation8 + $0x348] ss:$16 sps:$4 sm:$0xff]  }
  0xfb   :  { %2075 = vmatpush2.bf16.msra.mxu0 %v3402_v19  ;;  %v3494_v19 = vld [vmem:[#allocation8 + $0x12c] ss:$16 sps:$4 sm:$0xff]  }
  0xfc   :  { %2126 = vmatprep.subr.bf16.mxu0 %v3410_v22  ;;  %2116 = vmatpush2.bf16.msra.mxu1 %v3405_v23  ;;  %v3492_v22 = vld [vmem:[#allocation8 + $0x128] ss:$16 sps:$4 sm:$0xff]   ;;  %v3500_v23 = vld [vmem:[#allocation8 + $0x10c] ss:$16 sps:$4 sm:$0xff]  }
  0xfd   :  { %2167 = vmatprep.subr.bf16.mxu1 %v3413_v27  ;;  %v3503_v27 = vld [vmem:[#allocation8 + $0x30c] ss:$16 sps:$4 sm:$0xff]  }
  0xfe   :  { %2077 = vmatmul.mubr.bf16.vlgmr.msra.gmra.mxu0 %v3858_v26 }
  0xff   :  { %2127 = vmatpush1.bf16.msra.mxu0 %v3408_v29  ;;  %2158 = vmatprep.mubr.bf16.mxu0 %v3846_v40  ;;  %v3434_v40 = vld [vmem:[#allocation8 + $0x6c] ss:$16 sps:$4 sm:$0xff]   ;;  %v3498_v29 = vld [vmem:[#allocation8 + $0x108] ss:$16 sps:$4 sm:$0xff]  }
 0x100   :  { %2118 = vmatmul.mubr.bf16.vlgmr.msra.gmra.mxu1 %v3860_v30  ;;  %2128 = vmatprep.subr.bf16.mxu0 %v3416_v31  ;;  %v3506_v31 = vld [vmem:[#allocation8 + $0x4ec] ss:$16 sps:$4 sm:$0xff]  }
 0x101   :  { %2168 = vmatpush1.bf16.msra.mxu1 %v3411_v32  ;;  %2199 = vmatprep.mubr.bf16.mxu1 %v3851_v24  ;;  %v3440_v24 = vld [vmem:[#allocation8 + $0x4c] ss:$16 sps:$4 sm:$0xff]   ;;  %v3501_v32 = vld [vmem:[#allocation8 + $0x308] ss:$16 sps:$4 sm:$0xff]  }
 0x102   :  { %2169 = vmatprep.subr.bf16.mxu1 %v3419_v34  ;;  %v3504_v34 = vld [vmem:[#allocation8 + $0x4e8] ss:$16 sps:$4 sm:$0xff]  }
 0x103   :  { %2129 = vmatpush1.bf16.msra.mxu0 %v3414_v33  ;;  %v3554_v33 = vld [vmem:[#allocation10 + $0x74] ss:$8 sps:$4 sm:$0xff]  }
 0x104   :  { %2130 = vmatprep.subr.bf16.mxu0 %v3422_v36  ;;  %v3552_v36 = vld [vmem:[#allocation10 + $0x70] ss:$8 sps:$4 sm:$0xff]  }
 0x105   :  { %2170 = vmatpush1.bf16.msra.mxu1 %v3417_v35  ;;  %v3509_v35 = vld [vmem:[#allocation8 + $0x4cc] ss:$16 sps:$4 sm:$0xff]  }
 0x106   :  { %2171 = vmatprep.subr.bf16.mxu1 %v3425_v37 }
 0x107   :  { %2131 = vmatpush1.bf16.msra.mxu0 %v3420_v38  ;;  %v3557_v38 = vld [vmem:[#allocation10 + $0x64] ss:$8 sps:$4 sm:$0xff]  }
 0x108   :  { %2132 = vmatprep.subr.bf16.mxu0 %v3428_v39  ;;  %v3507_v39 = vld [vmem:[#allocation8 + $0x4c8] ss:$16 sps:$4 sm:$0xff]  }
 0x109   :  { %2172 = vmatpush1.bf16.msra.mxu1 %v3423_v41 }
 0x10a   :  { %2173 = vmatprep.subr.bf16.mxu1 %v3431_v42 }
 0x10b   :  { %2133 = vmatpush1.bf16.msra.mxu0 %v3426_v43  ;;  %v3512_v43 = vld [vmem:[#allocation8 + $0x4ac] ss:$16 sps:$4 sm:$0xff]  }
 0x10c   :  { %2134 = vmatprep.subr.bf16.mxu0 %v3434_v40  ;;  %v3555_v40 = vld [vmem:[#allocation10 + $0x60] ss:$8 sps:$4 sm:$0xff]  }
 0x10d   :  { %2174 = vmatpush1.bf16.msra.mxu1 %v3429_v44 }
 0x10e   :  { %2175 = vmatprep.subr.bf16.mxu1 %v3437_v45 }
 0x10f   :  { %2135 = vmatpush1.bf16.msra.mxu0 %v3432_v46  ;;  %v3510_v46 = vld [vmem:[#allocation8 + $0x4a8] ss:$16 sps:$4 sm:$0xff]  }
 0x110   :  { %2136 = vmatprep.subr.bf16.mxu0 %v3440_v24 }
 0x111   :  { %2176 = vmatpush1.bf16.msra.mxu1 %v3435_v47 }
 0x112   :  { %2177 = vmatprep.subr.bf16.mxu1 %v3443_v48  ;;  %v3558_v48 = vld [vmem:[#allocation10 + $0x50] ss:$8 sps:$4 sm:$0xff]  }
 0x113   :  { %2137 = vmatpush1.bf16.msra.mxu0 %v3438_v49 }
 0x114   :  { %2138 = vmatprep.subr.bf16.mxu0 %v3446_v51  ;;  %v3518_v51 = vld [vmem:[#allocation8 + $0x46c] ss:$16 sps:$4 sm:$0xff]  }
 0x115   :  { %2178 = vmatpush1.bf16.msra.mxu1 %v3441_v50  ;;  %v3513_v50 = vld [vmem:[#allocation8 + $0x488] ss:$16 sps:$4 sm:$0xff]  }
 0x116   :  { %2179 = vmatprep.subr.bf16.mxu1 %v3449_v53  ;;  %v3566_v53 = vld [vmem:[#allocation10 + $0x34] ss:$8 sps:$4 sm:$0xff]  }
 0x117   :  { %2139 = vmatpush1.bf16.msra.mxu0 %v3444_v52  ;;  %v3561_v52 = vld [vmem:[#allocation10 + $0x40] ss:$8 sps:$4 sm:$0xff]  }
 0x118   :  { %2140 = vmatprep.subr.bf16.mxu0 %v3452_v54  ;;  %v3516_v54 = vld [vmem:[#allocation8 + $0x468] ss:$16 sps:$4 sm:$0xff]  }
 0x119   :  { %2180 = vmatpush1.bf16.msra.mxu1 %v3447_v55  ;;  %v3521_v55 = vld [vmem:[#allocation8 + $0x44c] ss:$16 sps:$4 sm:$0xff]  }
 0x11a   :  { %2181 = vmatprep.subr.bf16.mxu1 %v3455_v56  ;;  %v3564_v56 = vld [vmem:[#allocation10 + $0x30] ss:$8 sps:$4 sm:$0xff]  }
 0x11b   :  { %2141 = vmatpush1.bf16.msra.mxu0 %v3450_v57  ;;  %v3569_v57 = vld [vmem:[#allocation10 + $0x24] ss:$8 sps:$4 sm:$0xff]  }
 0x11c   :  { %2142 = vmatprep.subr.bf16.mxu0 %v3458_v58  ;;  %v3519_v58 = vld [vmem:[#allocation8 + $0x448] ss:$16 sps:$4 sm:$0xff]  }
 0x11d   :  { %2182 = vmatpush1.bf16.msra.mxu1 %v3453_v59  ;;  %v3524_v59 = vld [vmem:[#allocation8 + $0x42c] ss:$16 sps:$4 sm:$0xff]  }
 0x11e   :  { %2183 = vmatprep.subr.bf16.mxu1 %v3461_v60  ;;  %v3567_v60 = vld [vmem:[#allocation10 + $0x20] ss:$8 sps:$4 sm:$0xff]  }
 0x11f   :  { %2143 = vmatpush2.bf16.msra.mxu0 %v3456_v61  ;;  %v3572_v61 = vld [vmem:[#allocation10 + $0x14] ss:$8 sps:$4 sm:$0xff]  }
 0x120   :  { %2144 = vmatprep.subr.bf16.mxu0 %v3464_v62  ;;  %v3522_v62 = vld [vmem:[#allocation8 + $0x428] ss:$16 sps:$4 sm:$0xff]  }
 0x121   :  { %2184 = vmatpush2.bf16.msra.mxu1 %v3459_v63  ;;  %v3527_v63 = vld [vmem:[#allocation8 + $0x40c] ss:$16 sps:$4 sm:$0xff]  }
 0x122   :  { %2185 = vmatprep.subr.bf16.mxu1 %v3467_v0  ;;  %v3570_v0 = vld [vmem:[#allocation10 + $0x10] ss:$8 sps:$4 sm:$0xff]  }
 0x123   :  { %2145 = vmatpush2.bf16.msra.mxu0 %v3462_v1  ;;  %v3575_v1 = vld [vmem:[#allocation10 + $0x4] ss:$8 sps:$4 sm:$0xff]  }
 0x124   :  { %2146 = vmatprep.subr.bf16.mxu0 %v3470_v2  ;;  %v3525_v2 = vld [vmem:[#allocation8 + $0x408] ss:$16 sps:$4 sm:$0xff]  }
 0x125   :  { %2186 = vmatpush2.bf16.msra.mxu1 %v3465_v3  ;;  %v3530_v3 = vld [vmem:[#allocation8 + $0x5ec] ss:$16 sps:$4 sm:$0xff]  }
 0x126   :  { %2187 = vmatprep.subr.bf16.mxu1 %v3473_v4  ;;  %v3573_v4 = vld [vmem:[#allocation10] ss:$8 sps:$4 sm:$0xff]  }
 0x127   :  { %2147 = vmatpush2.bf16.msra.mxu0 %v3468_v5  ;;  %v3578_v5 = vld [vmem:[#allocation10 + $0xf4] ss:$8 sps:$4 sm:$0xff]  }
 0x128   :  { %2148 = vmatprep.subr.bf16.mxu0 %v3476_v6  ;;  %v3528_v6 = vld [vmem:[#allocation8 + $0x5e8] ss:$16 sps:$4 sm:$0xff]  }
 0x129   :  { %2188 = vmatpush2.bf16.msra.mxu1 %v3471_v7  ;;  %v3533_v7 = vld [vmem:[#allocation8 + $0x5cc] ss:$16 sps:$4 sm:$0xff]  }
 0x12a   :  { %2189 = vmatprep.subr.bf16.mxu1 %v3479_v8  ;;  %v3576_v8 = vld [vmem:[#allocation10 + $0xf0] ss:$8 sps:$4 sm:$0xff]  }
 0x12b   :  { %2149 = vmatpush2.bf16.msra.mxu0 %v3474_v9  ;;  %v3581_v9 = vld [vmem:[#allocation10 + $0xe4] ss:$8 sps:$4 sm:$0xff]  }
 0x12c   :  { %2150 = vmatprep.subr.bf16.mxu0 %v3482_v10  ;;  %v3531_v10 = vld [vmem:[#allocation8 + $0x5c8] ss:$16 sps:$4 sm:$0xff]  }
 0x12d   :  { %2190 = vmatpush2.bf16.msra.mxu1 %v3477_v11  ;;  %v3536_v11 = vld [vmem:[#allocation8 + $0x5ac] ss:$16 sps:$4 sm:$0xff]  }
 0x12e   :  { %2191 = vmatprep.subr.bf16.mxu1 %v3485_v12  ;;  %v3579_v12 = vld [vmem:[#allocation10 + $0xe0] ss:$8 sps:$4 sm:$0xff]  }
 0x12f   :  { %2151 = vmatpush2.bf16.msra.mxu0 %v3480_v13  ;;  %v3584_v13 = vld [vmem:[#allocation10 + $0xd4] ss:$8 sps:$4 sm:$0xff]  }
 0x130   :  { %2152 = vmatprep.subr.bf16.mxu0 %v3488_v14  ;;  %v3534_v14 = vld [vmem:[#allocation8 + $0x5a8] ss:$16 sps:$4 sm:$0xff]  }
 0x131   :  { %2192 = vmatpush2.bf16.msra.mxu1 %v3483_v15  ;;  %v3539_v15 = vld [vmem:[#allocation8 + $0x58c] ss:$16 sps:$4 sm:$0xff]  }
 0x132   :  { %2193 = vmatprep.subr.bf16.mxu1 %v3491_v16  ;;  %v3582_v16 = vld [vmem:[#allocation10 + $0xd0] ss:$8 sps:$4 sm:$0xff]  }
 0x133   :  { %2153 = vmatpush2.bf16.msra.mxu0 %v3486_v17  ;;  %v3587_v17 = vld [vmem:[#allocation10 + $0xc4] ss:$8 sps:$4 sm:$0xff]  }
 0x134   :  { %2154 = vmatprep.subr.bf16.mxu0 %v3494_v19  ;;  %v3537_v19 = vld [vmem:[#allocation8 + $0x588] ss:$16 sps:$4 sm:$0xff]  }
 0x135   :  { %2194 = vmatpush2.bf16.msra.mxu1 %v3489_v20  ;;  %v3542_v20 = vld [vmem:[#allocation8 + $0x56c] ss:$16 sps:$4 sm:$0xff]  }
 0x136   :  { %2195 = vmatprep.subr.bf16.mxu1 %v3497_v21  ;;  %v216_v21 = vlaneseq }
 0x137   :  { %2155 = vmatpush2.bf16.msra.mxu0 %v3492_v22  ;;  %v3585_v22 = vld [vmem:[#allocation10 + $0xc0] ss:$8 sps:$4 sm:$0xff]  }
 0x138   :  { %2156 = vmatprep.subr.bf16.mxu0 %v3500_v23  ;;  %v3590_v23 = vld [vmem:[#allocation10 + $0xb4] ss:$8 sps:$4 sm:$0xff]  }
 0x139   :  { %2196 = vmatpush2.bf16.msra.mxu1 %v3495_v25  ;;  %v3540_v25 = vld [vmem:[#allocation8 + $0x568] ss:$16 sps:$4 sm:$0xff]  }
 0x13a   :  { %2197 = vmatprep.subr.bf16.mxu1 %v3503_v27  ;;  %v3545_v27 = vld [vmem:[#allocation8 + $0x54c] ss:$16 sps:$4 sm:$0xff]  }
 0x13b   :  { %2157 = vmatpush2.bf16.msra.mxu0 %v3498_v29  ;;  %v3877_v29 = vshrl.u32 %v216_v21, 7  ;;  %v3641_v21 = vld [vmem:[#allocation10 + $0x1a4] ss:$8 sps:$4 sm:$0xff]  }
 0x13c   :  { %2208 = vmatprep.subr.bf16.mxu0 %v3506_v31  ;;  %v3588_v31 = vld [vmem:[#allocation10 + $0xb0] ss:$8 sps:$4 sm:$0xff]  }
 0x13d   :  { %2198 = vmatpush2.bf16.msra.mxu1 %v3501_v32  ;;  %v3593_v32 = vld [vmem:[#allocation10 + $0xa4] ss:$8 sps:$4 sm:$0xff]  }
 0x13e   :  { %v3866_v37 = vpop.f32.mrf.mxu0  ;;  %2159 = vmatmul.mubr.bf16.vlgmr.msra.gmra.mxu0 %v3849_v18  ;;  %2653 = vmatprep.subr.bf16.mxu1 %v3554_v33  ;;  %v3560_v18 = vld [vmem:[#allocation10 + $0x54] ss:$8 sps:$4 sm:$0xff]   ;;  %v3543_v33 = vld [vmem:[#allocation8 + $0x548] ss:$16 sps:$4 sm:$0xff]  }
 0x13f   :  { %2209 = vmatpush1.bf16.msra.mxu0 %v3504_v34  ;;  %2240 = vmatprep.mubr.bf16.mxu0 %v3855_v28  ;;  %v3872_v42 = vpop.f32.mrf.mxu1  ;;  %v3515_v28 = vld [vmem:[#allocation8 + $0x48c] ss:$16 sps:$4 sm:$0xff]  }
 0x140   :  { %v3870_v41 = vpop.f32.mrf.mxu0  ;;  %2200 = vmatmul.mubr.bf16.vlgmr.msra.gmra.mxu1 %v3858_v26  ;;  %2210 = vmatprep.subr.bf16.mxu0 %v3509_v35  ;;  %v3563_v26 = vld [vmem:[#allocation10 + $0x44] ss:$8 sps:$4 sm:$0xff]   ;;  %v3880_v35 = vsub.s32 0, %v3877_v29 }
 0x141   :  { %2654 = vmatpush1.bf16.msra.mxu1 %v3552_v36  ;;  %v3875_v45 = vpop.f32.mrf.mxu1  ;;  %v3548_v34 = vld [vmem:[#allocation8 + $0x52c] ss:$16 sps:$4 sm:$0xff]   ;;  %v3591_v36 = vld [vmem:[#allocation10 + $0xa0] ss:$8 sps:$4 sm:$0xff]  }
 0x142   :  { %v744_v44 = vpop.f32.mrf.mxu0  ;;  %2655 = vmatprep.subr.bf16.mxu1 %v3557_v38  ;;  %v214_v38 = vld [vmem:[%s3919_s3] sm:$0x3] }
 0x143   :  { %2211 = vmatpush1.bf16.msra.mxu0 %v3507_v39  ;;  %v785_v47 = vpop.f32.mrf.mxu1  ;;  %v3596_v39 = vld [vmem:[#allocation10 + $0x94] ss:$8 sps:$4 sm:$0xff]  }
 0x144   :  { %v745_v24 = vpop.f32.mrf.mxu0  ;;  %2212 = vmatprep.subr.bf16.mxu0 %v3512_v43  ;;  %v3886_v43 = vsub.s32 1, %v3877_v29  ;;  %v3551_v44 = vld [vmem:[#allocation8 + $0x50c] ss:$16 sps:$4 sm:$0xff]   ;;  %v3549_v47 = vld [vmem:[#allocation8 + $0x508] ss:$16 sps:$4 sm:$0xff]  }
 0x145   :  { %2656 = vmatpush1.bf16.msra.mxu1 %v3555_v40  ;;  %v786_v49 = vpop.f32.mrf.mxu1  ;;  %v3546_v40 = vld [vmem:[#allocation8 + $0x528] ss:$16 sps:$4 sm:$0xff]   ;;  %v3599_v24 = vld [vmem:[#allocation10 + $0x84] ss:$8 sps:$4 sm:$0xff]  }
 0x146   :  { %2657 = vmatprep.subr.bf16.mxu1 %v3560_v18  ;;  %v219_v18 = vrot.slane %v214_v38, %v3880_v35  ;;  %v3597_v49 = vld [vmem:[#allocation10 + $0x80] ss:$8 sps:$4 sm:$0xff]  }
 0x147   :  { %2213 = vmatpush1.bf16.msra.mxu0 %v3510_v46  ;;  %v3594_v46 = vld [vmem:[#allocation10 + $0x90] ss:$8 sps:$4 sm:$0xff]  }
 0x148   :  { %2214 = vmatprep.subr.bf16.mxu0 %v3515_v28  ;;  %v223_v28 = vrot.slane %v214_v38, %v3886_v43 }
 0x149   :  { %2658 = vmatpush1.bf16.msra.mxu1 %v3558_v48  ;;  %v741_v48 = vadd.f32 %v3866_v37, %v219_v18 }
 0x14a   :  { %2659 = vmatprep.subr.bf16.mxu1 %v3563_v26  ;;  %v743_v26 = vadd.f32 %v3870_v41, %v223_v28 }
 0x14b   :  { %2215 = vmatpush1.bf16.msra.mxu0 %v3513_v50  ;;  %v782_v50 = vadd.f32 %v3872_v42, %v741_v48  ;;  %v3602_v42 = vld [vmem:[#allocation10 + $0x174] ss:$8 sps:$4 sm:$0xff]  }
 0x14c   :  { %2216 = vmatprep.subr.bf16.mxu0 %v3518_v51 }
 0x14d   :  { %2660 = vmatpush1.bf16.msra.mxu1 %v3561_v52  ;;  %v784_v52 = vadd.f32 %v3875_v45, %v743_v26  ;;  %v3608_v45 = vld [vmem:[#allocation10 + $0x154] ss:$8 sps:$4 sm:$0xff]  }
 0x14e   :  { %2661 = vmatprep.subr.bf16.mxu1 %v3566_v53 }
 0x14f   :  { %2217 = vmatpush1.bf16.msra.mxu0 %v3516_v54 }
 0x150   :  { %2218 = vmatprep.subr.bf16.mxu0 %v3521_v55 }
 0x151   :  { %2662 = vmatpush1.bf16.msra.mxu1 %v3564_v56 }
 0x152   :  { %2663 = vmatprep.subr.bf16.mxu1 %v3569_v57 }
 0x153   :  { %2219 = vmatpush1.bf16.msra.mxu0 %v3519_v58 }
 0x154   :  { %2220 = vmatprep.subr.bf16.mxu0 %v3524_v59  ;;  %v3600_v59 = vld [vmem:[#allocation10 + $0x170] ss:$8 sps:$4 sm:$0xff]  }
 0x155   :  { %2664 = vmatpush1.bf16.msra.mxu1 %v3567_v60  ;;  %v3605_v60 = vld [vmem:[#allocation10 + $0x164] ss:$8 sps:$4 sm:$0xff]  }
 0x156   :  { %2665 = vmatprep.subr.bf16.mxu1 %v3572_v61 }
 0x157   :  { %2221 = vmatpush1.bf16.msra.mxu0 %v3522_v62  ;;  %v3606_v62 = vld [vmem:[#allocation10 + $0x150] ss:$8 sps:$4 sm:$0xff]  }
 0x158   :  { %2222 = vmatprep.subr.bf16.mxu0 %v3527_v63  ;;  %v3611_v63 = vld [vmem:[#allocation10 + $0x144] ss:$8 sps:$4 sm:$0xff]  }
 0x159   :  { %2666 = vmatpush1.bf16.msra.mxu1 %v3570_v0  ;;  %v3609_v0 = vld [vmem:[#allocation10 + $0x140] ss:$8 sps:$4 sm:$0xff]  }
 0x15a   :  { %2667 = vmatprep.subr.bf16.mxu1 %v3575_v1  ;;  %v3614_v1 = vld [vmem:[#allocation10 + $0x134] ss:$8 sps:$4 sm:$0xff]  }
 0x15b   :  { %2223 = vmatpush1.bf16.msra.mxu0 %v3525_v2  ;;  %v3612_v2 = vld [vmem:[#allocation10 + $0x130] ss:$8 sps:$4 sm:$0xff]  }
 0x15c   :  { %2224 = vmatprep.subr.bf16.mxu0 %v3530_v3  ;;  %v3617_v3 = vld [vmem:[#allocation10 + $0x124] ss:$8 sps:$4 sm:$0xff]  }
 0x15d   :  { %2668 = vmatpush1.bf16.msra.mxu1 %v3573_v4  ;;  %v3615_v4 = vld [vmem:[#allocation10 + $0x120] ss:$8 sps:$4 sm:$0xff]  }
 0x15e   :  { %2669 = vmatprep.subr.bf16.mxu1 %v3578_v5  ;;  %v3620_v5 = vld [vmem:[#allocation10 + $0x114] ss:$8 sps:$4 sm:$0xff]  }
 0x15f   :  { %2225 = vmatpush2.bf16.msra.mxu0 %v3528_v6  ;;  %v3618_v6 = vld [vmem:[#allocation10 + $0x110] ss:$8 sps:$4 sm:$0xff]  }
 0x160   :  { %2226 = vmatprep.subr.bf16.mxu0 %v3533_v7  ;;  %v3623_v7 = vld [vmem:[#allocation10 + $0x104] ss:$8 sps:$4 sm:$0xff]  }
 0x161   :  { %2670 = vmatpush2.bf16.msra.mxu1 %v3576_v8  ;;  %v3621_v8 = vld [vmem:[#allocation10 + $0x100] ss:$8 sps:$4 sm:$0xff]  }
 0x162   :  { %2671 = vmatprep.subr.bf16.mxu1 %v3581_v9  ;;  %v3626_v9 = vld [vmem:[#allocation10 + $0x1f4] ss:$8 sps:$4 sm:$0xff]  }
 0x163   :  { %2227 = vmatpush2.bf16.msra.mxu0 %v3531_v10  ;;  %v3624_v10 = vld [vmem:[#allocation10 + $0x1f0] ss:$8 sps:$4 sm:$0xff]  }
 0x164   :  { %2228 = vmatprep.subr.bf16.mxu0 %v3536_v11  ;;  %v3629_v11 = vld [vmem:[#allocation10 + $0x1e4] ss:$8 sps:$4 sm:$0xff]  }
 0x165   :  { %2672 = vmatpush2.bf16.msra.mxu1 %v3579_v12  ;;  %v3627_v12 = vld [vmem:[#allocation10 + $0x1e0] ss:$8 sps:$4 sm:$0xff]  }
 0x166   :  { %2673 = vmatprep.subr.bf16.mxu1 %v3584_v13  ;;  %v3632_v13 = vld [vmem:[#allocation10 + $0x1d4] ss:$8 sps:$4 sm:$0xff]  }
 0x167   :  { %2229 = vmatpush2.bf16.msra.mxu0 %v3534_v14  ;;  %v3630_v14 = vld [vmem:[#allocation10 + $0x1d0] ss:$8 sps:$4 sm:$0xff]  }
 0x168   :  { %2230 = vmatprep.subr.bf16.mxu0 %v3539_v15  ;;  %v3635_v15 = vld [vmem:[#allocation10 + $0x1c4] ss:$8 sps:$4 sm:$0xff]  }
 0x169   :  { %2674 = vmatpush2.bf16.msra.mxu1 %v3582_v16  ;;  %v3633_v16 = vld [vmem:[#allocation10 + $0x1c0] ss:$8 sps:$4 sm:$0xff]  }
 0x16a   :  { %2675 = vmatprep.subr.bf16.mxu1 %v3587_v17  ;;  %v3638_v17 = vld [vmem:[#allocation10 + $0x1b4] ss:$8 sps:$4 sm:$0xff]  }
 0x16b   :  { %2231 = vmatpush2.bf16.msra.mxu0 %v3537_v19  ;;  %v3636_v19 = vld [vmem:[#allocation10 + $0x1b0] ss:$8 sps:$4 sm:$0xff]  }
 0x16c   :  { %2232 = vmatprep.subr.bf16.mxu0 %v3542_v20  ;;  %v1021_v20 = vld [vmem:[%s3921_s5] sm:$0xf] }
 0x16d   :  { %2676 = vmatpush2.bf16.msra.mxu1 %v3585_v22  ;;  %v1026_v22 = vrot.slane %v1021_v20, %v3880_v35 }
 0x16e   :  { %2677 = vmatprep.subr.bf16.mxu1 %v3590_v23  ;;  %v3639_v23 = vld [vmem:[#allocation10 + $0x1a0] ss:$8 sps:$4 sm:$0xff]  }
 0x16f   :  { %2233 = vmatpush2.bf16.msra.mxu0 %v3540_v25  ;;  %v1030_v25 = vrot.slane %v1021_v20, %v3886_v43 }
 0x170   :  { %2234 = vmatprep.subr.bf16.mxu0 %v3545_v27 }
 0x171   :  { %2678 = vmatpush2.bf16.msra.mxu1 %v3588_v31 }
 0x172   :  { %2679 = vmatprep.subr.bf16.mxu1 %v3593_v32 }
 0x173   :  { %2235 = vmatpush2.bf16.msra.mxu0 %v3543_v33  ;;  %v3644_v33 = vld [vmem:[#allocation10 + $0x194] ss:$8 sps:$4 sm:$0xff]  }
 0x174   :  { %2236 = vmatprep.subr.bf16.mxu0 %v3548_v34 }
 0x175   :  { %2680 = vmatpush2.bf16.msra.mxu1 %v3591_v36  ;;  %v3642_v36 = vld [vmem:[#allocation10 + $0x190] ss:$8 sps:$4 sm:$0xff]  }
 0x176   :  { %2681 = vmatprep.subr.bf16.mxu1 %v3596_v39 }
 0x177   :  { %2237 = vmatpush2.bf16.msra.mxu0 %v3546_v40 }
 0x178   :  { %2238 = vmatprep.subr.bf16.mxu0 %v3551_v44 }
 0x179   :  { %2682 = vmatpush2.bf16.msra.mxu1 %v3594_v46 }
 0x17a   :  { %2683 = vmatprep.subr.bf16.mxu1 %v3599_v24  ;;  %v3647_v24 = vld [vmem:[#allocation10 + $0x184] ss:$8 sps:$4 sm:$0xff]  }
 0x17b   :  { %2239 = vmatpush2.bf16.msra.mxu0 %v3549_v47  ;;  %v3645_v47 = vld [vmem:[#allocation10 + $0x180] ss:$8 sps:$4 sm:$0xff]  }
 0x17c   :  { %2694 = vmatprep.subr.bf16.mxu0 %v3602_v42  ;;  %v1033_v42 = vsub.s32 2, %v3877_v29 }
 0x17d   :  { %2684 = vmatpush2.bf16.msra.mxu1 %v3597_v49 }
 0x17e   :  { %v822_v51 = vpop.f32.mrf.mxu0  ;;  %2241 = vmatmul.mubr.bf16.vlgmr.msra.gmra.mxu0 %v3860_v30  ;;  %v3603_v30 = vld [vmem:[#allocation10 + $0x160] ss:$8 sps:$4 sm:$0xff]  }
 0x17f   :  { %v823_v53 = vadd.f32 %v822_v51, %v782_v50  ;;  %v3895_v55 = vpop.f32.mrf.mxu1  ;;  %2695 = vmatpush1.bf16.msra.mxu0 %v3600_v59 }
 0x180   :  { %v824_v54 = vpop.f32.mrf.mxu0  ;;  %2696 = vmatprep.subr.bf16.mxu0 %v3605_v60  ;;  %v2038_v27 = vadd.f32 %v3895_v55, %v1026_v22  ;;  %v1037_v60 = vsub.s32 3, %v3877_v29 }
 0x181   :  { %2737 = vst [vmem:[#allocation11] sm:$0xff] %v823_v53  ;;  %v825_v37 = vadd.f32 %v824_v54, %v784_v52  ;;  %v3897_v57 = vpop.f32.mrf.mxu1 }
 0x182   :  { %v826_v56 = vpop.f32.mrf.mxu0  ;;  %v2040_v31 = vadd.f32 %v3897_v57, %v1030_v25 }
 0x183   :  { %2738 = vst [vmem:[#allocation11 + $0x8] sm:$0xff] %v825_v37  ;;  %v2041_v58 = vpop.f32.mrf.mxu1  ;;  %2697 = vmatpush1.bf16.msra.mxu0 %v3603_v30  ;;  %v1038_v30 = vrot.slane %v1021_v20, %v1037_v60 }
 0x184   :  { %v827_v41 = vpop.f32.mrf.mxu0  ;;  %2698 = vmatprep.subr.bf16.mxu0 %v3608_v45 }
 0x185   :  { %v2042_v61 = vpop.f32.mrf.mxu1 }
 0x186   :  { %v1034_v61 = vrot.slane %v1021_v20, %v1033_v42 }
 0x187   :  { %2699 = vmatpush1.bf16.msra.mxu0 %v3606_v62 }
 0x188   :  { %2700 = vmatprep.subr.bf16.mxu0 %v3611_v63 }
 0x18b   :  { %2701 = vmatpush1.bf16.msra.mxu0 %v3609_v0 }
 0x18c   :  { %2702 = vmatprep.subr.bf16.mxu0 %v3614_v1 }
 0x18f   :  { %2703 = vmatpush1.bf16.msra.mxu0 %v3612_v2 }
 0x190   :  { %2704 = vmatprep.subr.bf16.mxu0 %v3617_v3 }
 0x193   :  { %2705 = vmatpush1.bf16.msra.mxu0 %v3615_v4 }
 0x194   :  { %2706 = vmatprep.subr.bf16.mxu0 %v3620_v5 }
 0x197   :  { %2707 = vmatpush1.bf16.msra.mxu0 %v3618_v6 }
 0x198   :  { %2708 = vmatprep.subr.bf16.mxu0 %v3623_v7 }
 0x19b   :  { %2709 = vmatpush1.bf16.msra.mxu0 %v3621_v8 }
 0x19c   :  { %2710 = vmatprep.subr.bf16.mxu0 %v3626_v9 }
 0x19f   :  { %2711 = vmatpush2.bf16.msra.mxu0 %v3624_v10 }
 0x1a0   :  { %2712 = vmatprep.subr.bf16.mxu0 %v3629_v11 }
 0x1a3   :  { %2713 = vmatpush2.bf16.msra.mxu0 %v3627_v12 }
 0x1a4   :  { %2714 = vmatprep.subr.bf16.mxu0 %v3632_v13 }
 0x1a7   :  { %2715 = vmatpush2.bf16.msra.mxu0 %v3630_v14  ;;  %v2321_v14 = vld [vmem:[%s3923_s7] sm:$0x3]  ;;  %s3748_s7 = scalar_lea.vmem %s2748_s12, 512 }
 0x1a8   :  { %2716 = vmatprep.subr.bf16.mxu0 %v3635_v15  ;;  %v2326_v15 = vrot.slane %v2321_v14, %v3880_v35  ;;  %p3749_p11 = scmp.ne.s32.totalorder %s2748_s12, %s3748_s7  ;;  %p3754_p13 = scmp.lt.s32.totalorder %s3748_s7, %s3748_s7 }
 0x1aa   :  { %p3755_p0 = por %p3754_p13, %p3753_p12 }
 0x1ab   :  { %2717 = vmatpush2.bf16.msra.mxu0 %v3633_v16  ;;  %v2330_v16 = vrot.slane %v2321_v14, %v3886_v43 }
 0x1ac   :  { %2718 = vmatprep.subr.bf16.mxu0 %v3638_v17  ;;  %p3756_p1 = pnand %p3755_p0, %p3749_p11 }
 0x1af   :  { %2719 = vmatpush2.bf16.msra.mxu0 %v3636_v19 }
 0x1b0   :  { %2720 = vmatprep.subr.bf16.mxu0 %v3641_v21 }
 0x1b3   :  { %2721 = vmatpush2.bf16.msra.mxu0 %v3639_v23 }
 0x1b4   :  { %2722 = vmatprep.subr.bf16.mxu0 %v3644_v33 }
 0x1b7   :  { %2723 = vmatpush2.bf16.msra.mxu0 %v3642_v36 }
 0x1b8   :  { %2724 = vmatprep.subr.bf16.mxu0 %v3647_v24 }
 0x1bb   :  { %2725 = vmatpush2.bf16.msra.mxu0 %v3645_v47 }
 0x1be   :  { %v2078_v32 = vpop.f32.mrf.mxu0 }
 0x1bf   :  { %v2079_v34 = vadd.f32 %v2078_v32, %v2038_v27 }
 0x1c0   :  { %v2080_v38 = vpop.f32.mrf.mxu0  ;;  %v2119_v39 = vpop.f32.mrf.mxu1 }
 0x1c1   :  { %v2081_v40 = vadd.f32 %v2080_v38, %v2040_v31  ;;  %v2120_v44 = vadd.f32 %v2119_v39, %v2079_v34 }
 0x1c2   :  { %v2082_v18 = vpop.f32.mrf.mxu0  ;;  %v2121_v46 = vpop.f32.mrf.mxu1 }
 0x1c3   :  { %v2122_v28 = vadd.f32 %v2121_v46, %v2081_v40  ;;  %v2249_v48 = vmax.f32 %v2120_v44, 0.0 }
 0x1c4   :  { %v2083_v49 = vpop.f32.mrf.mxu0  ;;  %v2123_v26 = vpop.f32.mrf.mxu1 }
 0x1c5   :  { %v2250_v50 = vmax.f32 %v2122_v28, 0.0  ;;  %v2253_v53 = vpack.c.bf16 %v2249_v48, %v2249_v48 }
 0x1c6   :  { %v2124_v51 = vpop.f32.mrf.mxu1 }
 0x1c7   :  { %v2254_v52 = vpack.c.bf16 %v2250_v50, %v2250_v50 }
 0x1c9   :  { %2685 = vmatprep.mubr.bf16.mxu1 %v2254_v52 }
 0x1ca   :  { %2686 = vmatmul.mubr.bf16.vlgmr.msra.gmra.mxu1 %v2253_v53 }
 0x1fe   :  { %v2160_v54 = vpop.f32.mrf.mxu0 }
 0x1ff   :  { %v2161_v45 = vadd.f32 %v2160_v54, %v1034_v61 }
 0x200   :  { %v2162_v55 = vpop.f32.mrf.mxu0  ;;  %v2201_v37 = vpop.f32.mrf.mxu1 }
 0x201   :  { %v2163_v62 = vadd.f32 %v2162_v55, %v1038_v30  ;;  %v2202_v63 = vadd.f32 %v2201_v37, %v2161_v45 }
 0x202   :  { %v2164_v56 = vpop.f32.mrf.mxu0  ;;  %v2203_v57 = vpop.f32.mrf.mxu1 }
 0x203   :  { %v2204_v1 = vadd.f32 %v2203_v57, %v2163_v62 }
 0x204   :  { %v2165_v41 = vpop.f32.mrf.mxu0  ;;  %v2205_v58 = vpop.f32.mrf.mxu1 }
 0x206   :  { %v2206_v59 = vpop.f32.mrf.mxu1 }
 0x23e   :  { %v2242_v0 = vpop.f32.mrf.mxu0 }
 0x23f   :  { %v2243_v2 = vadd.f32 %v2242_v0, %v2202_v63 }
 0x240   :  { %v2244_v3 = vpop.f32.mrf.mxu0 }
 0x241   :  { %v2245_v4 = vadd.f32 %v2244_v3, %v2204_v1  ;;  %v2251_v5 = vmax.f32 %v2243_v2, 0.0 }
 0x242   :  { %v2246_v6 = vpop.f32.mrf.mxu0 }
 0x243   :  { %v2252_v7 = vmax.f32 %v2245_v4, 0.0  ;;  %v2255_v10 = vpack.c.bf16 %v2251_v5, %v2251_v5 }
 0x244   :  { %v2247_v8 = vpop.f32.mrf.mxu0 }
 0x245   :  { %v2256_v9 = vpack.c.bf16 %v2252_v7, %v2252_v7 }
 0x247   :  { %2726 = vmatprep.mubr.bf16.mxu0 %v2256_v9 }
 0x248   :  { %2727 = vmatmul.mubr.bf16.vlgmr.msra.gmra.mxu0 %v2255_v10 }
 0x28a   :  { %v2687_v11 = vpop.f32.mrf.mxu1 }
 0x28b   :  { %v2688_v17 = vadd.f32 %v2687_v11, %v2326_v15 }
 0x28c   :  { %v2689_v29 = vpop.f32.mrf.mxu1 }
 0x28d   :  { %v2690_v20 = vadd.f32 %v2689_v29, %v2330_v16 }
 0x28e   :  { %v2691_v12 = vpop.f32.mrf.mxu1 }
 0x290   :  { %v2692_v13 = vpop.f32.mrf.mxu1 }
 0x308   :  { %v2728_v19 = vpop.f32.mrf.mxu0 }
 0x309   :  { %v2729_v21 = vadd.f32 %v2728_v19, %v2688_v17 }
 0x30a   :  { %v2730_v22 = vpop.f32.mrf.mxu0 }
 0x30b   :  { %v2735_v23 = vmax.f32 %v2729_v21, 0.0  ;;  %v2731_v25 = vadd.f32 %v2730_v22, %v2690_v20 }
 0x30c   :  { %v2732_v27 = vpop.f32.mrf.mxu0 }
 0x30d   :  { %2739 = vst [vmem:[#allocation11 + $0x10] sm:$0xff] %v2735_v23  ;;  %v2736_v31 = vmax.f32 %v2731_v25, 0.0 }
 0x30e   :  { %v2733_v32 = vpop.f32.mrf.mxu0 }
 0x30f   :  { %2740 = vst [vmem:[#allocation11 + $0x18] sm:$0xff] %v2736_v31 }
 0x310   :  { %3759 = shalt.err (!%p3756_p1)
}
 0x311   :  { %2750 = dma.vmem_to_hbm [thread:$0]  %s2748_s12, 512, %s3924_s8, [#allocation4]  }
 0x312   :  { %3774 = dma.done.wait [#allocation4], 512  }
 0x313   :  { %3775 = vsyncadd [#allocation4], 4294966784 }
 0x314   :  { %2754 = vsyncpa [#allocation3], 1 }
 0x315   :  { %2755 = vsyncpa [#allocation6], 1 }
 0x316   :  { %2756 = vsyncpa [#allocation9], 1 }
 0x317   :  { %2757 = vsyncpa [#allocation4], 1 }

</bundles_post_ra>
